<compile_context>
chip_gen: v7x
topology: tpu7x:2x2x1
jax: 0.10.0
libtpu: 0.0.40
codegen_flags: <defaults>
</compile_context>

<pallas_src>
import math
import functools

import jax
import jax.numpy as jnp
import numpy as np
from jax.experimental import pallas as pl
from jax.experimental.pallas import tpu as pltpu

LN_EPS = 1e-5  # PyTorch nn.LayerNorm default


def _round_up(n, m):
    return ((n + m - 1) // m) * m


def _cross_attn_kernel(
    tgt_ref, mem_ref, tpos_ref, mpos_ref,
    sa_qk_w_ref, sa_qk_b_ref, sa_v_w_ref, sa_v_b_ref, sa_o_w_ref, sa_o_b_ref,
    ma_qkv_w_ref, ma_qkv_b_ref, ma_o_w_ref, ma_o_b_ref,
    w1_ref, b1_ref, w2_ref, b2_ref, ln_g_ref, ln_b_ref,
    out_ref,
    *, nhead, dkp, d_real, bb, s_q, s_kv, cdt, approx_recip,
):
    Dp = out_ref.shape[-1]
    HDp = nhead * dkp
    M = bb * s_q          # query rows after flattening batch into matmul M dim
    Mk = bb * s_kv        # key/value rows

    # Residual stream stays f32; flatten batch into the matmul M dimension.
    x = tgt_ref[...].astype(jnp.float32).reshape(M, Dp)
    mem = mem_ref[...].astype(jnp.float32).reshape(Mk, Dp)
    tpos = tpos_ref[...].astype(jnp.float32).reshape(M, Dp)
    mpos = mpos_ref[...].astype(jnp.float32).reshape(Mk, Dp)

    inv_d = 1.0 / d_real

    def layer_norm(v, g, b):
        # Statistics over the real feature width only (padding lanes are 0);
        # E[x^2] - mu^2 form so zero pads drop out of both sums.  gamma/beta
        # are zero-padded, so padded lanes stay exactly zero.
        mu = jnp.sum(v, axis=-1, keepdims=True) * inv_d
        msq = jnp.sum(v * v, axis=-1, keepdims=True) * inv_d
        var = msq - mu * mu
        return (v - mu) * jax.lax.rsqrt(var + LN_EPS) * g + b

    def mm(a, w):
        # MXU matmul: operands in compute dtype, accumulate in f32.
        return jnp.dot(a.astype(cdt), w, preferred_element_type=jnp.float32)

    def softmax_rows(sc):
        sc = sc - jnp.max(sc, axis=-1, keepdims=True)
        e = jnp.exp(sc)
        denom = jnp.sum(e, axis=-1, keepdims=True)
        if approx_recip:
            return e * pl.reciprocal(denom, approx=True)
        return e / denom

    def attention(q, k, v, o_w, o_b, n_kv):
        # q: (M, HDp), k/v: (bb*n_kv, HDp); head blocks are 128-aligned lanes.
        q3 = q.reshape(bb, s_q, HDp)
        k3 = k.reshape(bb, n_kv, HDp)
        v3 = v.reshape(bb, n_kv, HDp)
        acc = jnp.zeros((M, Dp), jnp.float32)
        for h in range(nhead):                      # static, small head loop
            sl = slice(h * dkp, (h + 1) * dkp)      # 128-aligned lane slice
            qh = q3[:, :, sl].astype(cdt)
            kh = k3[:, :, sl].astype(cdt)
            vh = v3[:, :, sl].astype(cdt)
            sc = jnp.einsum("bqd,bkd->bqk", qh, kh,
                            preferred_element_type=jnp.float32)
            p = softmax_rows(sc)
            oh = jnp.einsum("bqk,bkd->bqd", p.astype(cdt), vh,
                            preferred_element_type=jnp.float32)
            # Accumulate this head straight into the output projection
            # (replaces the head concat with MXU accumulation).
            acc = acc + mm(oh.reshape(M, dkp), o_w[sl, :])
        return acc + o_b

    sa_qk_w = sa_qk_w_ref[...]
    sa_v_w = sa_v_w_ref[...]
    sa_o_w = sa_o_w_ref[...]
    ma_o_w = ma_o_w_ref[...]
    w1 = w1_ref[...]
    w2 = w2_ref[...]

    # --- self attention block (forward_post); Q scale pre-folded in weights ---
    q_in = x + tpos
    qk = mm(q_in, sa_qk_w) + sa_qk_b_ref[...]          # fused Q|K projection
    q = qk[:, :HDp]
    k = qk[:, HDp:]
    v = mm(x, sa_v_w) + sa_v_b_ref[...]
    sa = attention(q, k, v, sa_o_w, sa_o_b_ref[...], s_q)
    x1 = layer_norm(x + sa, ln_g_ref[0:1, :], ln_b_ref[0:1, :])

    # --- cross (memory) attention block ---
    mq_in = x1 + tpos
    mk_in = mem + mpos
    q2 = mm(mq_in, ma_qkv_w_ref[0]) + ma_qkv_b_ref[0:1, :]
    k2 = mm(mk_in, ma_qkv_w_ref[1]) + ma_qkv_b_ref[1:2, :]
    v2 = mm(mem, ma_qkv_w_ref[2]) + ma_qkv_b_ref[2:3, :]
    ca = attention(q2, k2, v2, ma_o_w, ma_o_b_ref[...], s_kv)
    x2 = layer_norm(x1 + ca, ln_g_ref[1:2, :], ln_b_ref[1:2, :])

    # --- MLP block ---
    h = jnp.maximum(mm(x2, w1) + b1_ref[...], 0.0)
    m = mm(h, w2) + b2_ref[...]
    x3 = layer_norm(x2 + m, ln_g_ref[2:3, :], ln_b_ref[2:3, :])

    out_ref[...] = x3.reshape(bb, s_q, Dp).astype(out_ref.dtype)


def _pack_mha(w, b, *, nhead, d_k, dkp, D, Dp, cdt):
    """Pack one MHA's projections into head-blocked, lane-padded layout.

    w: (4, D, D) with (in, out) orientation (torch weights pre-transposed),
    b: (4, D).  1/sqrt(d_k) is folded into the Q weights/bias.
    """
    HDp = nhead * dkp
    q_scale = 1.0 / math.sqrt(d_k)

    def head_block(wi, bi, scale):
        wp = jnp.zeros((Dp, HDp), jnp.float32)
        bp = jnp.zeros((1, HDp), jnp.float32)
        for h in range(nhead):
            wp = wp.at[:D, h * dkp:h * dkp + d_k].set(
                wi[:, h * d_k:(h + 1) * d_k] * scale)
            bp = bp.at[0, h * dkp:h * dkp + d_k].set(
                bi[h * d_k:(h + 1) * d_k] * scale)
        return wp, bp

    wq, bq = head_block(w[0], b[0], q_scale)
    wk, bk = head_block(w[1], b[1], 1.0)
    wv, bv = head_block(w[2], b[2], 1.0)

    wo = jnp.zeros((HDp, Dp), jnp.float32)
    for h in range(nhead):
        wo = wo.at[h * dkp:h * dkp + d_k, :D].set(w[3][h * d_k:(h + 1) * d_k, :])
    bo = jnp.zeros((1, Dp), jnp.float32).at[0, :D].set(b[3])

    return dict(wq=wq.astype(cdt), bq=bq, wk=wk.astype(cdt), bk=bk,
                wv=wv.astype(cdt), bv=bv, wo=wo.astype(cdt), bo=bo)


def cross_attn_layer(tgt, memory, tgt_pos, memory_pos, params, *, nhead,
                     compute_dtype=jnp.bfloat16, batch_block=None):
    """forward_post of CrossAttnLayer (eval mode, no masks).

    tgt: (B, S, D), memory: (B, Sm, D); pos tensors match (or None).
    params use (in, out) weight orientation: sa_w/ma_w (4,D,D), sa_b/ma_b (4,D),
    w1 (D,H), b1 (1,H), w2 (H,D), b2 (1,D), ln_g/ln_b (3,D).
    """
    B, S, D = tgt.shape
    Sm = memory.shape[1]
    H = params["w1"].shape[1]
    assert D % nhead == 0
    d_k = D // nhead

    if tgt_pos is None:
        tgt_pos = jnp.zeros_like(tgt)
    if memory_pos is None:
        memory_pos = jnp.zeros_like(memory)

    cdt = compute_dtype
    Dp = _round_up(D, 128)
    Hp = _round_up(H, 128)
    dkp = _round_up(d_k, 128)

    bb = B if batch_block is None else batch_block
    assert B % bb == 0

    pad_feat = lambda a: jnp.pad(a.astype(jnp.float32),
                                 ((0, 0), (0, 0), (0, Dp - D)))
    tgt_p, mem_p = pad_feat(tgt), pad_feat(memory)
    tpos_p, mpos_p = pad_feat(tgt_pos), pad_feat(memory_pos)

    sa = _pack_mha(params["sa_w"], params["sa_b"],
                   nhead=nhead, d_k=d_k, dkp=dkp, D=D, Dp=Dp, cdt=cdt)
    ma = _pack_mha(params["ma_w"], params["ma_b"],
                   nhead=nhead, d_k=d_k, dkp=dkp, D=D, Dp=Dp, cdt=cdt)

    # Self-attn Q and K share their input -> fuse into one projection.
    sa_qk_w = jnp.concatenate([sa["wq"], sa["wk"]], axis=1)             # (Dp, 2*HDp)
    sa_qk_b = jnp.concatenate([sa["bq"], sa["bk"]], axis=1)             # (1, 2*HDp)
    ma_qkv_w = jnp.stack([ma["wq"], ma["wk"], ma["wv"]])                # (3, Dp, HDp)
    ma_qkv_b = jnp.concatenate([ma["bq"], ma["bk"], ma["bv"]], axis=0)  # (3, HDp)

    w1p = jnp.zeros((Dp, Hp), jnp.float32).at[:D, :H].set(params["w1"]).astype(cdt)
    b1p = jnp.zeros((1, Hp), jnp.float32).at[:, :H].set(params["b1"])
    w2p = jnp.zeros((Hp, Dp), jnp.float32).at[:H, :D].set(params["w2"]).astype(cdt)
    b2p = jnp.zeros((1, Dp), jnp.float32).at[:, :D].set(params["b2"])
    ln_g = jnp.zeros((3, Dp), jnp.float32).at[:, :D].set(params["ln_g"])
    ln_b = jnp.zeros((3, Dp), jnp.float32).at[:, :D].set(params["ln_b"])

    def batched(sdim):
        return pl.BlockSpec((bb, sdim, Dp), lambda i: (i, 0, 0))

    def const(shape):
        nd = len(shape)
        return pl.BlockSpec(shape, lambda i, _nd=nd: (0,) * _nd)

    kernel = functools.partial(
        _cross_attn_kernel, nhead=nhead, dkp=dkp, d_real=D, bb=bb,
        s_q=S, s_kv=Sm, cdt=cdt,
        approx_recip=(cdt != jnp.float32))

    out = pl.pallas_call(
        kernel,
        out_shape=jax.ShapeDtypeStruct((B, S, Dp), jnp.float32),
        grid=(B // bb,),
        in_specs=[
            batched(S), batched(Sm), batched(S), batched(Sm),
            const(sa_qk_w.shape), const(sa_qk_b.shape),
            const(sa["wv"].shape), const(sa["bv"].shape),
            const(sa["wo"].shape), const(sa["bo"].shape),
            const(ma_qkv_w.shape), const(ma_qkv_b.shape),
            const(ma["wo"].shape), const(ma["bo"].shape),
            const(w1p.shape), const(b1p.shape),
            const(w2p.shape), const(b2p.shape),
            const(ln_g.shape), const(ln_b.shape),
        ],
        out_specs=pl.BlockSpec((bb, S, Dp), lambda i: (i, 0, 0)),
        compiler_params=pltpu.CompilerParams(
            dimension_semantics=("parallel",),
            vmem_limit_bytes=64 * 1024 * 1024,
        ),
    )(
        tgt_p, mem_p, tpos_p, mpos_p,
        sa_qk_w, sa_qk_b, sa["wv"], sa["bv"], sa["wo"], sa["bo"],
        ma_qkv_w, ma_qkv_b, ma["wo"], ma["bo"],
        w1p, b1p, w2p, b2p, ln_g, ln_b,
    )
    return out[..., :D]


def _reference(tgt, memory, tpos, mpos, p, *, nhead):
    """Pure-JAX reference mirroring PyTorch forward_post (eval mode)."""
    D = tgt.shape[-1]
    d_k = D // nhead

    def ln(v, g, b):
        mu = jnp.mean(v, -1, keepdims=True)
        var = jnp.mean((v - mu) ** 2, -1, keepdims=True)
        return (v - mu) / jnp.sqrt(var + LN_EPS) * g + b

    def mha(q, k, v, w, b):
        B, Sq, _ = q.shape
        Sk = k.shape[1]
        proj = lambda x, i: x @ w[i] + b[i]
        Q = proj(q, 0).reshape(B, Sq, nhead, d_k).transpose(0, 2, 1, 3)
        K = proj(k, 1).reshape(B, Sk, nhead, d_k).transpose(0, 2, 1, 3)
        V = proj(v, 2).reshape(B, Sk, nhead, d_k).transpose(0, 2, 1, 3)
        s = jnp.einsum("bhqd,bhkd->bhqk", Q, K) / math.sqrt(d_k)
        a = jax.nn.softmax(s, axis=-1)
        o = jnp.einsum("bhqk,bhkd->bhqd", a, V).transpose(0, 2, 1, 3).reshape(B, Sq, D)
        return o @ w[3] + b[3]

    x = tgt
    q = x + tpos
    x = ln(x + mha(q, q, x, p["sa_w"], p["sa_b"]), p["ln_g"][0], p["ln_b"][0])
    mq = x + tpos
    mk = memory + mpos
    x = ln(x + mha(mq, mk, memory, p["ma_w"], p["ma_b"]), p["ln_g"][1], p["ln_b"][1])
    h = jnp.maximum(x @ p["w1"] + p["b1"][0], 0.0)
    x = ln(x + (h @ p["w2"] + p["b2"][0]), p["ln_g"][2], p["ln_b"][2])
    return x


if __name__ == "__main__":
    B, S, Sm = 2, 8, 16
    D, HID, NHEAD = 32, 64, 4

    key = jax.random.PRNGKey(0)
    ks = jax.random.split(key, 12)
    nrm = lambda k, shape, s=0.05: (s * jax.random.normal(k, shape)).astype(jnp.float32)

    tgt = nrm(ks[0], (B, S, D), 1.0)
    memory = nrm(ks[1], (B, Sm, D), 1.0)
    tgt_pos = nrm(ks[2], (B, S, D), 1.0)
    memory_pos = nrm(ks[3], (B, Sm, D), 1.0)

    params = {
        "sa_w": nrm(ks[4], (4, D, D)),
        "sa_b": nrm(ks[5], (4, D)),
        "ma_w": nrm(ks[6], (4, D, D)),
        "ma_b": nrm(ks[7], (4, D)),
        "w1": nrm(ks[8], (D, HID)),
        "b1": nrm(ks[9], (1, HID)),
        "w2": nrm(ks[10], (HID, D)),
        "b2": nrm(ks[11], (1, D)),
        "ln_g": jnp.ones((3, D), jnp.float32),
        "ln_b": jnp.zeros((3, D), jnp.float32),
    }

    ref = _reference(tgt, memory, tgt_pos, memory_pos, params, nhead=NHEAD)

    # f32 MXU operands + exact softmax divide: tight check.
    out_f32 = cross_attn_layer(tgt, memory, tgt_pos, memory_pos, params,
                               nhead=NHEAD, compute_dtype=jnp.float32)
    out_f32 = jax.block_until_ready(out_f32)
    np.testing.assert_allclose(np.asarray(out_f32), np.asarray(ref),
                               rtol=3e-3, atol=3e-3)

    # bf16 MXU operands (default fast path for v6e/v7x): looser tolerance.
    out_bf16 = cross_attn_layer(tgt, memory, tgt_pos, memory_pos, params,
                                nhead=NHEAD)
    out_bf16 = jax.block_until_ready(out_bf16)
    np.testing.assert_allclose(np.asarray(out_bf16), np.asarray(ref),
                               rtol=5e-2, atol=5e-2)

    print("KERNEL_OK")
</pallas_src>

<mosaic_0001>
module attributes {stable_mosaic.version = 11 : i64} {
  func.func @_cross_attn_kernel(%arg0: i32, %arg1: memref<2x8x128xf32, #tpu.memory_space<vmem>>, %arg2: memref<2x16x128xf32, #tpu.memory_space<vmem>>, %arg3: memref<2x8x128xf32, #tpu.memory_space<vmem>>, %arg4: memref<2x16x128xf32, #tpu.memory_space<vmem>>, %arg5: memref<128x1024xf32, #tpu.memory_space<vmem>>, %arg6: memref<1x1024xf32, #tpu.memory_space<vmem>>, %arg7: memref<128x512xf32, #tpu.memory_space<vmem>>, %arg8: memref<1x512xf32, #tpu.memory_space<vmem>>, %arg9: memref<512x128xf32, #tpu.memory_space<vmem>>, %arg10: memref<1x128xf32, #tpu.memory_space<vmem>>, %arg11: memref<3x128x512xf32, #tpu.memory_space<vmem>>, %arg12: memref<3x512xf32, #tpu.memory_space<vmem>>, %arg13: memref<512x128xf32, #tpu.memory_space<vmem>>, %arg14: memref<1x128xf32, #tpu.memory_space<vmem>>, %arg15: memref<128x128xf32, #tpu.memory_space<vmem>>, %arg16: memref<1x128xf32, #tpu.memory_space<vmem>>, %arg17: memref<128x128xf32, #tpu.memory_space<vmem>>, %arg18: memref<1x128xf32, #tpu.memory_space<vmem>>, %arg19: memref<3x128xf32, #tpu.memory_space<vmem>>, %arg20: memref<3x128xf32, #tpu.memory_space<vmem>>, %arg21: memref<2x8x128xf32, #tpu.memory_space<vmem>>) attributes {dimension_semantics = [#tpu.dimension_semantics<parallel>], iteration_bounds = array<i64: 1>, scalar_prefetch = 0 : i64, scratch_operands = 0 : i64, tpu.core_type = #tpu.core_type<tc>, window_params = [{transform_indices = @transform_0, window_bounds = array<i64: 2, 8, 128>}, {transform_indices = @transform_1, window_bounds = array<i64: 2, 16, 128>}, {transform_indices = @transform_2, window_bounds = array<i64: 2, 8, 128>}, {transform_indices = @transform_3, window_bounds = array<i64: 2, 16, 128>}, {pipeline_mode = #tpu.pipeline_mode<synchronous>, transform_indices = @transform_4, window_bounds = array<i64: 128, 1024>}, {pipeline_mode = #tpu.pipeline_mode<synchronous>, transform_indices = @transform_5, window_bounds = array<i64: 1, 1024>}, {pipeline_mode = #tpu.pipeline_mode<synchronous>, transform_indices = @transform_6, window_bounds = array<i64: 128, 512>}, {pipeline_mode = #tpu.pipeline_mode<synchronous>, transform_indices = @transform_7, window_bounds = array<i64: 1, 512>}, {pipeline_mode = #tpu.pipeline_mode<synchronous>, transform_indices = @transform_8, window_bounds = array<i64: 512, 128>}, {pipeline_mode = #tpu.pipeline_mode<synchronous>, transform_indices = @transform_9, window_bounds = array<i64: 1, 128>}, {pipeline_mode = #tpu.pipeline_mode<synchronous>, transform_indices = @transform_10, window_bounds = array<i64: 3, 128, 512>}, {pipeline_mode = #tpu.pipeline_mode<synchronous>, transform_indices = @transform_11, window_bounds = array<i64: 3, 512>}, {pipeline_mode = #tpu.pipeline_mode<synchronous>, transform_indices = @transform_12, window_bounds = array<i64: 512, 128>}, {pipeline_mode = #tpu.pipeline_mode<synchronous>, transform_indices = @transform_13, window_bounds = array<i64: 1, 128>}, {pipeline_mode = #tpu.pipeline_mode<synchronous>, transform_indices = @transform_14, window_bounds = array<i64: 128, 128>}, {pipeline_mode = #tpu.pipeline_mode<synchronous>, transform_indices = @transform_15, window_bounds = array<i64: 1, 128>}, {pipeline_mode = #tpu.pipeline_mode<synchronous>, transform_indices = @transform_16, window_bounds = array<i64: 128, 128>}, {pipeline_mode = #tpu.pipeline_mode<synchronous>, transform_indices = @transform_17, window_bounds = array<i64: 1, 128>}, {pipeline_mode = #tpu.pipeline_mode<synchronous>, transform_indices = @transform_18, window_bounds = array<i64: 3, 128>}, {pipeline_mode = #tpu.pipeline_mode<synchronous>, transform_indices = @transform_19, window_bounds = array<i64: 3, 128>}, {transform_indices = @transform_20, window_bounds = array<i64: 2, 8, 128>}]} {
    %c0 = arith.constant 0 : index
    %c0_0 = arith.constant 0 : index
    %c0_1 = arith.constant 0 : index
    %0 = vector.load %arg1[%c0, %c0_0, %c0_1] : memref<2x8x128xf32, #tpu.memory_space<vmem>>, vector<2x8x128xf32>
    %1 = vector.shape_cast %0 : vector<2x8x128xf32> to vector<16x128xf32>
    %c0_2 = arith.constant 0 : index
    %c0_3 = arith.constant 0 : index
    %c0_4 = arith.constant 0 : index
    %2 = vector.load %arg2[%c0_2, %c0_3, %c0_4] : memref<2x16x128xf32, #tpu.memory_space<vmem>>, vector<2x16x128xf32>
    %3 = vector.shape_cast %2 : vector<2x16x128xf32> to vector<32x128xf32>
    %c0_5 = arith.constant 0 : index
    %c0_6 = arith.constant 0 : index
    %c0_7 = arith.constant 0 : index
    %4 = vector.load %arg3[%c0_5, %c0_6, %c0_7] : memref<2x8x128xf32, #tpu.memory_space<vmem>>, vector<2x8x128xf32>
    %5 = vector.shape_cast %4 : vector<2x8x128xf32> to vector<16x128xf32>
    %c0_8 = arith.constant 0 : index
    %c0_9 = arith.constant 0 : index
    %c0_10 = arith.constant 0 : index
    %6 = vector.load %arg4[%c0_8, %c0_9, %c0_10] : memref<2x16x128xf32, #tpu.memory_space<vmem>>, vector<2x16x128xf32>
    %7 = vector.shape_cast %6 : vector<2x16x128xf32> to vector<32x128xf32>
    %c0_11 = arith.constant 0 : index
    %c0_12 = arith.constant 0 : index
    %8 = vector.load %arg5[%c0_11, %c0_12] : memref<128x1024xf32, #tpu.memory_space<vmem>>, vector<128x1024xf32>
    %c0_13 = arith.constant 0 : index
    %c0_14 = arith.constant 0 : index
    %9 = vector.load %arg7[%c0_13, %c0_14] : memref<128x512xf32, #tpu.memory_space<vmem>>, vector<128x512xf32>
    %c0_15 = arith.constant 0 : index
    %c0_16 = arith.constant 0 : index
    %10 = vector.load %arg9[%c0_15, %c0_16] : memref<512x128xf32, #tpu.memory_space<vmem>>, vector<512x128xf32>
    %c0_17 = arith.constant 0 : index
    %c0_18 = arith.constant 0 : index
    %11 = vector.load %arg13[%c0_17, %c0_18] : memref<512x128xf32, #tpu.memory_space<vmem>>, vector<512x128xf32>
    %c0_19 = arith.constant 0 : index
    %c0_20 = arith.constant 0 : index
    %12 = vector.load %arg15[%c0_19, %c0_20] : memref<128x128xf32, #tpu.memory_space<vmem>>, vector<128x128xf32>
    %c0_21 = arith.constant 0 : index
    %c0_22 = arith.constant 0 : index
    %13 = vector.load %arg17[%c0_21, %c0_22] : memref<128x128xf32, #tpu.memory_space<vmem>>, vector<128x128xf32>
    %14 = arith.addf %1, %5 : vector<16x128xf32>
    %cst = arith.constant dense<0.000000e+00> : vector<16x1024xf32>
    %15 = tpu.matmul %14, %8, %cst {dimension_numbers = #tpu.dot_dimension_numbers<[1], [0], [0], [1], [0, 0, 1, 1], [], []>} : vector<16x128xf32>, vector<128x1024xf32>, vector<16x1024xf32> -> vector<16x1024xf32>
    %c0_23 = arith.constant 0 : index
    %c0_24 = arith.constant 0 : index
    %16 = vector.load %arg6[%c0_23, %c0_24] : memref<1x1024xf32, #tpu.memory_space<vmem>>, vector<1x1024xf32>
    %17 = vector.broadcast %16 : vector<1x1024xf32> to vector<16x1024xf32>
    %18 = arith.addf %15, %17 : vector<16x1024xf32>
    %19 = vector.extract_strided_slice %18 {offsets = [0, 0], sizes = [16, 512], strides = [1, 1]} : vector<16x1024xf32> to vector<16x512xf32>
    %20 = vector.extract_strided_slice %18 {offsets = [0, 512], sizes = [16, 512], strides = [1, 1]} : vector<16x1024xf32> to vector<16x512xf32>
    %cst_25 = arith.constant dense<0.000000e+00> : vector<16x512xf32>
    %21 = tpu.matmul %1, %9, %cst_25 {dimension_numbers = #tpu.dot_dimension_numbers<[1], [0], [0], [1], [0, 0, 1, 1], [], []>} : vector<16x128xf32>, vector<128x512xf32>, vector<16x512xf32> -> vector<16x512xf32>
    %c0_26 = arith.constant 0 : index
    %c0_27 = arith.constant 0 : index
    %22 = vector.load %arg8[%c0_26, %c0_27] : memref<1x512xf32, #tpu.memory_space<vmem>>, vector<1x512xf32>
    %23 = vector.broadcast %22 : vector<1x512xf32> to vector<16x512xf32>
    %24 = arith.addf %21, %23 : vector<16x512xf32>
    %c0_28 = arith.constant 0 : index
    %c0_29 = arith.constant 0 : index
    %25 = vector.load %arg10[%c0_28, %c0_29] : memref<1x128xf32, #tpu.memory_space<vmem>>, vector<1x128xf32>
    %26 = vector.shape_cast %19 : vector<16x512xf32> to vector<2x8x512xf32>
    %27 = vector.shape_cast %20 : vector<16x512xf32> to vector<2x8x512xf32>
    %28 = vector.shape_cast %24 : vector<16x512xf32> to vector<2x8x512xf32>
    %cst_30 = arith.constant 0.000000e+00 : f32
    %29 = vector.broadcast %cst_30 : f32 to vector<16x128xf32>
    %30 = vector.extract_strided_slice %26 {offsets = [0, 0, 0], sizes = [2, 8, 128], strides = [1, 1, 1]} : vector<2x8x512xf32> to vector<2x8x128xf32>
    %31 = vector.extract_strided_slice %27 {offsets = [0, 0, 0], sizes = [2, 8, 128], strides = [1, 1, 1]} : vector<2x8x512xf32> to vector<2x8x128xf32>
    %32 = vector.extract_strided_slice %28 {offsets = [0, 0, 0], sizes = [2, 8, 128], strides = [1, 1, 1]} : vector<2x8x512xf32> to vector<2x8x128xf32>
    "tpu.trace_start"() <{level = 10 : i32, message = "bqd,bkd->bqk"}> : () -> ()
    %cst_31 = arith.constant dense<0.000000e+00> : vector<2x8x8xf32>
    %33 = tpu.matmul %30, %31, %cst_31 {dimension_numbers = #tpu.dot_dimension_numbers<[2], [2], [1], [1], [0, 0, 0, 1, 1, 1], [0], [0]>} : vector<2x8x128xf32>, vector<2x8x128xf32>, vector<2x8x8xf32> -> vector<2x8x8xf32>
    "tpu.trace_stop"() : () -> ()
    %cst_32 = arith.constant dense<0xFF800000> : vector<2x8xf32>
    %34 = vector.multi_reduction <maximumf>, %33, %cst_32 [2] : vector<2x8x8xf32> to vector<2x8xf32>
    %35 = vector.shape_cast %34 : vector<2x8xf32> to vector<2x8x1xf32>
    %36 = vector.broadcast %35 : vector<2x8x1xf32> to vector<2x8x8xf32>
    %37 = arith.subf %33, %36 : vector<2x8x8xf32>
    %38 = math.exp %37 : vector<2x8x8xf32>
    %cst_33 = arith.constant dense<0.000000e+00> : vector<2x8xf32>
    %39 = vector.multi_reduction <add>, %38, %cst_33 [2] : vector<2x8x8xf32> to vector<2x8xf32>
    %40 = vector.shape_cast %39 : vector<2x8xf32> to vector<2x8x1xf32>
    %41 = vector.broadcast %40 : vector<2x8x1xf32> to vector<2x8x8xf32>
    %42 = arith.divf %38, %41 : vector<2x8x8xf32>
    "tpu.trace_start"() <{level = 10 : i32, message = "bqk,bkd->bqd"}> : () -> ()
    %cst_34 = arith.constant dense<0.000000e+00> : vector<2x8x128xf32>
    %43 = tpu.matmul %42, %32, %cst_34 {dimension_numbers = #tpu.dot_dimension_numbers<[2], [1], [1], [2], [0, 0, 0, 1, 1, 2], [0], [0]>} : vector<2x8x8xf32>, vector<2x8x128xf32>, vector<2x8x128xf32> -> vector<2x8x128xf32>
    "tpu.trace_stop"() : () -> ()
    %44 = vector.shape_cast %43 : vector<2x8x128xf32> to vector<16x128xf32>
    %45 = vector.extract_strided_slice %10 {offsets = [0, 0], sizes = [128, 128], strides = [1, 1]} : vector<512x128xf32> to vector<128x128xf32>
    %cst_35 = arith.constant dense<0.000000e+00> : vector<16x128xf32>
    %46 = tpu.matmul %44, %45, %cst_35 {dimension_numbers = #tpu.dot_dimension_numbers<[1], [0], [0], [1], [0, 0, 1, 1], [], []>} : vector<16x128xf32>, vector<128x128xf32>, vector<16x128xf32> -> vector<16x128xf32>
    %47 = arith.addf %29, %46 : vector<16x128xf32>
    %48 = vector.extract_strided_slice %26 {offsets = [0, 0, 128], sizes = [2, 8, 128], strides = [1, 1, 1]} : vector<2x8x512xf32> to vector<2x8x128xf32>
    %49 = vector.extract_strided_slice %27 {offsets = [0, 0, 128], sizes = [2, 8, 128], strides = [1, 1, 1]} : vector<2x8x512xf32> to vector<2x8x128xf32>
    %50 = vector.extract_strided_slice %28 {offsets = [0, 0, 128], sizes = [2, 8, 128], strides = [1, 1, 1]} : vector<2x8x512xf32> to vector<2x8x128xf32>
    "tpu.trace_start"() <{level = 10 : i32, message = "bqd,bkd->bqk"}> : () -> ()
    %cst_36 = arith.constant dense<0.000000e+00> : vector<2x8x8xf32>
    %51 = tpu.matmul %48, %49, %cst_36 {dimension_numbers = #tpu.dot_dimension_numbers<[2], [2], [1], [1], [0, 0, 0, 1, 1, 1], [0], [0]>} : vector<2x8x128xf32>, vector<2x8x128xf32>, vector<2x8x8xf32> -> vector<2x8x8xf32>
    "tpu.trace_stop"() : () -> ()
    %cst_37 = arith.constant dense<0xFF800000> : vector<2x8xf32>
    %52 = vector.multi_reduction <maximumf>, %51, %cst_37 [2] : vector<2x8x8xf32> to vector<2x8xf32>
    %53 = vector.shape_cast %52 : vector<2x8xf32> to vector<2x8x1xf32>
    %54 = vector.broadcast %53 : vector<2x8x1xf32> to vector<2x8x8xf32>
    %55 = arith.subf %51, %54 : vector<2x8x8xf32>
    %56 = math.exp %55 : vector<2x8x8xf32>
    %cst_38 = arith.constant dense<0.000000e+00> : vector<2x8xf32>
    %57 = vector.multi_reduction <add>, %56, %cst_38 [2] : vector<2x8x8xf32> to vector<2x8xf32>
    %58 = vector.shape_cast %57 : vector<2x8xf32> to vector<2x8x1xf32>
    %59 = vector.broadcast %58 : vector<2x8x1xf32> to vector<2x8x8xf32>
    %60 = arith.divf %56, %59 : vector<2x8x8xf32>
    "tpu.trace_start"() <{level = 10 : i32, message = "bqk,bkd->bqd"}> : () -> ()
    %cst_39 = arith.constant dense<0.000000e+00> : vector<2x8x128xf32>
    %61 = tpu.matmul %60, %50, %cst_39 {dimension_numbers = #tpu.dot_dimension_numbers<[2], [1], [1], [2], [0, 0, 0, 1, 1, 2], [0], [0]>} : vector<2x8x8xf32>, vector<2x8x128xf32>, vector<2x8x128xf32> -> vector<2x8x128xf32>
    "tpu.trace_stop"() : () -> ()
    %62 = vector.shape_cast %61 : vector<2x8x128xf32> to vector<16x128xf32>
    %63 = vector.extract_strided_slice %10 {offsets = [128, 0], sizes = [128, 128], strides = [1, 1]} : vector<512x128xf32> to vector<128x128xf32>
    %cst_40 = arith.constant dense<0.000000e+00> : vector<16x128xf32>
    %64 = tpu.matmul %62, %63, %cst_40 {dimension_numbers = #tpu.dot_dimension_numbers<[1], [0], [0], [1], [0, 0, 1, 1], [], []>} : vector<16x128xf32>, vector<128x128xf32>, vector<16x128xf32> -> vector<16x128xf32>
    %65 = arith.addf %47, %64 : vector<16x128xf32>
    %66 = vector.extract_strided_slice %26 {offsets = [0, 0, 256], sizes = [2, 8, 128], strides = [1, 1, 1]} : vector<2x8x512xf32> to vector<2x8x128xf32>
    %67 = vector.extract_strided_slice %27 {offsets = [0, 0, 256], sizes = [2, 8, 128], strides = [1, 1, 1]} : vector<2x8x512xf32> to vector<2x8x128xf32>
    %68 = vector.extract_strided_slice %28 {offsets = [0, 0, 256], sizes = [2, 8, 128], strides = [1, 1, 1]} : vector<2x8x512xf32> to vector<2x8x128xf32>
    "tpu.trace_start"() <{level = 10 : i32, message = "bqd,bkd->bqk"}> : () -> ()
    %cst_41 = arith.constant dense<0.000000e+00> : vector<2x8x8xf32>
    %69 = tpu.matmul %66, %67, %cst_41 {dimension_numbers = #tpu.dot_dimension_numbers<[2], [2], [1], [1], [0, 0, 0, 1, 1, 1], [0], [0]>} : vector<2x8x128xf32>, vector<2x8x128xf32>, vector<2x8x8xf32> -> vector<2x8x8xf32>
    "tpu.trace_stop"() : () -> ()
    %cst_42 = arith.constant dense<0xFF800000> : vector<2x8xf32>
    %70 = vector.multi_reduction <maximumf>, %69, %cst_42 [2] : vector<2x8x8xf32> to vector<2x8xf32>
    %71 = vector.shape_cast %70 : vector<2x8xf32> to vector<2x8x1xf32>
    %72 = vector.broadcast %71 : vector<2x8x1xf32> to vector<2x8x8xf32>
    %73 = arith.subf %69, %72 : vector<2x8x8xf32>
    %74 = math.exp %73 : vector<2x8x8xf32>
    %cst_43 = arith.constant dense<0.000000e+00> : vector<2x8xf32>
    %75 = vector.multi_reduction <add>, %74, %cst_43 [2] : vector<2x8x8xf32> to vector<2x8xf32>
    %76 = vector.shape_cast %75 : vector<2x8xf32> to vector<2x8x1xf32>
    %77 = vector.broadcast %76 : vector<2x8x1xf32> to vector<2x8x8xf32>
    %78 = arith.divf %74, %77 : vector<2x8x8xf32>
    "tpu.trace_start"() <{level = 10 : i32, message = "bqk,bkd->bqd"}> : () -> ()
    %cst_44 = arith.constant dense<0.000000e+00> : vector<2x8x128xf32>
    %79 = tpu.matmul %78, %68, %cst_44 {dimension_numbers = #tpu.dot_dimension_numbers<[2], [1], [1], [2], [0, 0, 0, 1, 1, 2], [0], [0]>} : vector<2x8x8xf32>, vector<2x8x128xf32>, vector<2x8x128xf32> -> vector<2x8x128xf32>
    "tpu.trace_stop"() : () -> ()
    %80 = vector.shape_cast %79 : vector<2x8x128xf32> to vector<16x128xf32>
    %81 = vector.extract_strided_slice %10 {offsets = [256, 0], sizes = [128, 128], strides = [1, 1]} : vector<512x128xf32> to vector<128x128xf32>
    %cst_45 = arith.constant dense<0.000000e+00> : vector<16x128xf32>
    %82 = tpu.matmul %80, %81, %cst_45 {dimension_numbers = #tpu.dot_dimension_numbers<[1], [0], [0], [1], [0, 0, 1, 1], [], []>} : vector<16x128xf32>, vector<128x128xf32>, vector<16x128xf32> -> vector<16x128xf32>
    %83 = arith.addf %65, %82 : vector<16x128xf32>
    %84 = vector.extract_strided_slice %26 {offsets = [0, 0, 384], sizes = [2, 8, 128], strides = [1, 1, 1]} : vector<2x8x512xf32> to vector<2x8x128xf32>
    %85 = vector.extract_strided_slice %27 {offsets = [0, 0, 384], sizes = [2, 8, 128], strides = [1, 1, 1]} : vector<2x8x512xf32> to vector<2x8x128xf32>
    %86 = vector.extract_strided_slice %28 {offsets = [0, 0, 384], sizes = [2, 8, 128], strides = [1, 1, 1]} : vector<2x8x512xf32> to vector<2x8x128xf32>
    "tpu.trace_start"() <{level = 10 : i32, message = "bqd,bkd->bqk"}> : () -> ()
    %cst_46 = arith.constant dense<0.000000e+00> : vector<2x8x8xf32>
    %87 = tpu.matmul %84, %85, %cst_46 {dimension_numbers = #tpu.dot_dimension_numbers<[2], [2], [1], [1], [0, 0, 0, 1, 1, 1], [0], [0]>} : vector<2x8x128xf32>, vector<2x8x128xf32>, vector<2x8x8xf32> -> vector<2x8x8xf32>
    "tpu.trace_stop"() : () -> ()
    %cst_47 = arith.constant dense<0xFF800000> : vector<2x8xf32>
    %88 = vector.multi_reduction <maximumf>, %87, %cst_47 [2] : vector<2x8x8xf32> to vector<2x8xf32>
    %89 = vector.shape_cast %88 : vector<2x8xf32> to vector<2x8x1xf32>
    %90 = vector.broadcast %89 : vector<2x8x1xf32> to vector<2x8x8xf32>
    %91 = arith.subf %87, %90 : vector<2x8x8xf32>
    %92 = math.exp %91 : vector<2x8x8xf32>
    %cst_48 = arith.constant dense<0.000000e+00> : vector<2x8xf32>
    %93 = vector.multi_reduction <add>, %92, %cst_48 [2] : vector<2x8x8xf32> to vector<2x8xf32>
    %94 = vector.shape_cast %93 : vector<2x8xf32> to vector<2x8x1xf32>
    %95 = vector.broadcast %94 : vector<2x8x1xf32> to vector<2x8x8xf32>
    %96 = arith.divf %92, %95 : vector<2x8x8xf32>
    "tpu.trace_start"() <{level = 10 : i32, message = "bqk,bkd->bqd"}> : () -> ()
    %cst_49 = arith.constant dense<0.000000e+00> : vector<2x8x128xf32>
    %97 = tpu.matmul %96, %86, %cst_49 {dimension_numbers = #tpu.dot_dimension_numbers<[2], [1], [1], [2], [0, 0, 0, 1, 1, 2], [0], [0]>} : vector<2x8x8xf32>, vector<2x8x128xf32>, vector<2x8x128xf32> -> vector<2x8x128xf32>
    "tpu.trace_stop"() : () -> ()
    %98 = vector.shape_cast %97 : vector<2x8x128xf32> to vector<16x128xf32>
    %99 = vector.extract_strided_slice %10 {offsets = [384, 0], sizes = [128, 128], strides = [1, 1]} : vector<512x128xf32> to vector<128x128xf32>
    %cst_50 = arith.constant dense<0.000000e+00> : vector<16x128xf32>
    %100 = tpu.matmul %98, %99, %cst_50 {dimension_numbers = #tpu.dot_dimension_numbers<[1], [0], [0], [1], [0, 0, 1, 1], [], []>} : vector<16x128xf32>, vector<128x128xf32>, vector<16x128xf32> -> vector<16x128xf32>
    %101 = arith.addf %83, %100 : vector<16x128xf32>
    %102 = vector.broadcast %25 : vector<1x128xf32> to vector<16x128xf32>
    %103 = arith.addf %101, %102 : vector<16x128xf32>
    %104 = arith.addf %1, %103 : vector<16x128xf32>
    %c0_51 = arith.constant 0 : index
    %c0_52 = arith.constant 0 : index
    %105 = vector.load %arg19[%c0_51, %c0_52] : memref<3x128xf32, #tpu.memory_space<vmem>>, vector<1x128xf32>
    %c0_53 = arith.constant 0 : index
    %c0_54 = arith.constant 0 : index
    %106 = vector.load %arg20[%c0_53, %c0_54] : memref<3x128xf32, #tpu.memory_space<vmem>>, vector<1x128xf32>
    %cst_55 = arith.constant dense<0.000000e+00> : vector<16xf32>
    %107 = vector.multi_reduction <add>, %104, %cst_55 [1] : vector<16x128xf32> to vector<16xf32>
    %108 = vector.shape_cast %107 : vector<16xf32> to vector<16x1xf32>
    %cst_56 = arith.constant 3.125000e-02 : f32
    %109 = vector.broadcast %cst_56 : f32 to vector<16x1xf32>
    %110 = arith.mulf %108, %109 : vector<16x1xf32>
    %111 = arith.mulf %104, %104 : vector<16x128xf32>
    %cst_57 = arith.constant dense<0.000000e+00> : vector<16xf32>
    %112 = vector.multi_reduction <add>, %111, %cst_57 [1] : vector<16x128xf32> to vector<16xf32>
    %113 = vector.shape_cast %112 : vector<16xf32> to vector<16x1xf32>
    %cst_58 = arith.constant 3.125000e-02 : f32
    %114 = vector.broadcast %cst_58 : f32 to vector<16x1xf32>
    %115 = arith.mulf %113, %114 : vector<16x1xf32>
    %116 = arith.mulf %110, %110 : vector<16x1xf32>
    %117 = arith.subf %115, %116 : vector<16x1xf32>
    %118 = vector.broadcast %110 : vector<16x1xf32> to vector<16x128xf32>
    %119 = arith.subf %104, %118 : vector<16x128xf32>
    %cst_59 = arith.constant 9.99999974E-6 : f32
    %120 = vector.broadcast %cst_59 : f32 to vector<16x1xf32>
    %121 = arith.addf %117, %120 : vector<16x1xf32>
    %122 = math.rsqrt %121 : vector<16x1xf32>
    %123 = vector.broadcast %122 : vector<16x1xf32> to vector<16x128xf32>
    %124 = arith.mulf %119, %123 : vector<16x128xf32>
    %125 = vector.broadcast %105 : vector<1x128xf32> to vector<16x128xf32>
    %126 = arith.mulf %124, %125 : vector<16x128xf32>
    %127 = vector.broadcast %106 : vector<1x128xf32> to vector<16x128xf32>
    %128 = arith.addf %126, %127 : vector<16x128xf32>
    %129 = arith.addf %128, %5 : vector<16x128xf32>
    %130 = arith.addf %3, %7 : vector<32x128xf32>
    %c0_60 = arith.constant 0 : index
    %c0_61 = arith.constant 0 : index
    %c0_62 = arith.constant 0 : index
    %131 = vector.load %arg11[%c0_60, %c0_61, %c0_62] : memref<3x128x512xf32, #tpu.memory_space<vmem>>, vector<1x128x512xf32>
    %132 = vector.shape_cast %131 : vector<1x128x512xf32> to vector<128x512xf32>
    %cst_63 = arith.constant dense<0.000000e+00> : vector<16x512xf32>
    %133 = tpu.matmul %129, %132, %cst_63 {dimension_numbers = #tpu.dot_dimension_numbers<[1], [0], [0], [1], [0, 0, 1, 1], [], []>} : vector<16x128xf32>, vector<128x512xf32>, vector<16x512xf32> -> vector<16x512xf32>
    %c0_64 = arith.constant 0 : index
    %c0_65 = arith.constant 0 : index
    %134 = vector.load %arg12[%c0_64, %c0_65] : memref<3x512xf32, #tpu.memory_space<vmem>>, vector<1x512xf32>
    %135 = vector.broadcast %134 : vector<1x512xf32> to vector<16x512xf32>
    %136 = arith.addf %133, %135 : vector<16x512xf32>
    %c1 = arith.constant 1 : index
    %c0_66 = arith.constant 0 : index
    %c0_67 = arith.constant 0 : index
    %137 = vector.load %arg11[%c1, %c0_66, %c0_67] : memref<3x128x512xf32, #tpu.memory_space<vmem>>, vector<1x128x512xf32>
    %138 = vector.shape_cast %137 : vector<1x128x512xf32> to vector<128x512xf32>
    %cst_68 = arith.constant dense<0.000000e+00> : vector<32x512xf32>
    %139 = tpu.matmul %130, %138, %cst_68 {dimension_numbers = #tpu.dot_dimension_numbers<[1], [0], [0], [1], [0, 0, 1, 1], [], []>} : vector<32x128xf32>, vector<128x512xf32>, vector<32x512xf32> -> vector<32x512xf32>
    %c1_69 = arith.constant 1 : index
    %c0_70 = arith.constant 0 : index
    %140 = vector.load %arg12[%c1_69, %c0_70] : memref<3x512xf32, #tpu.memory_space<vmem>>, vector<1x512xf32>
    %141 = vector.broadcast %140 : vector<1x512xf32> to vector<32x512xf32>
    %142 = arith.addf %139, %141 : vector<32x512xf32>
    %c2 = arith.constant 2 : index
    %c0_71 = arith.constant 0 : index
    %c0_72 = arith.constant 0 : index
    %143 = vector.load %arg11[%c2, %c0_71, %c0_72] : memref<3x128x512xf32, #tpu.memory_space<vmem>>, vector<1x128x512xf32>
    %144 = vector.shape_cast %143 : vector<1x128x512xf32> to vector<128x512xf32>
    %cst_73 = arith.constant dense<0.000000e+00> : vector<32x512xf32>
    %145 = tpu.matmul %3, %144, %cst_73 {dimension_numbers = #tpu.dot_dimension_numbers<[1], [0], [0], [1], [0, 0, 1, 1], [], []>} : vector<32x128xf32>, vector<128x512xf32>, vector<32x512xf32> -> vector<32x512xf32>
    %c2_74 = arith.constant 2 : index
    %c0_75 = arith.constant 0 : index
    %146 = vector.load %arg12[%c2_74, %c0_75] : memref<3x512xf32, #tpu.memory_space<vmem>>, vector<1x512xf32>
    %147 = vector.broadcast %146 : vector<1x512xf32> to vector<32x512xf32>
    %148 = arith.addf %145, %147 : vector<32x512xf32>
    %c0_76 = arith.constant 0 : index
    %c0_77 = arith.constant 0 : index
    %149 = vector.load %arg14[%c0_76, %c0_77] : memref<1x128xf32, #tpu.memory_space<vmem>>, vector<1x128xf32>
    %150 = vector.shape_cast %136 : vector<16x512xf32> to vector<2x8x512xf32>
    %151 = vector.shape_cast %142 : vector<32x512xf32> to vector<2x16x512xf32>
    %152 = vector.shape_cast %148 : vector<32x512xf32> to vector<2x16x512xf32>
    %cst_78 = arith.constant 0.000000e+00 : f32
    %153 = vector.broadcast %cst_78 : f32 to vector<16x128xf32>
    %154 = vector.extract_strided_slice %150 {offsets = [0, 0, 0], sizes = [2, 8, 128], strides = [1, 1, 1]} : vector<2x8x512xf32> to vector<2x8x128xf32>
    %155 = vector.extract_strided_slice %151 {offsets = [0, 0, 0], sizes = [2, 16, 128], strides = [1, 1, 1]} : vector<2x16x512xf32> to vector<2x16x128xf32>
    %156 = vector.extract_strided_slice %152 {offsets = [0, 0, 0], sizes = [2, 16, 128], strides = [1, 1, 1]} : vector<2x16x512xf32> to vector<2x16x128xf32>
    "tpu.trace_start"() <{level = 10 : i32, message = "bqd,bkd->bqk"}> : () -> ()
    %cst_79 = arith.constant dense<0.000000e+00> : vector<2x8x16xf32>
    %157 = tpu.matmul %154, %155, %cst_79 {dimension_numbers = #tpu.dot_dimension_numbers<[2], [2], [1], [1], [0, 0, 0, 1, 1, 1], [0], [0]>} : vector<2x8x128xf32>, vector<2x16x128xf32>, vector<2x8x16xf32> -> vector<2x8x16xf32>
    "tpu.trace_stop"() : () -> ()
    %cst_80 = arith.constant dense<0xFF800000> : vector<2x8xf32>
    %158 = vector.multi_reduction <maximumf>, %157, %cst_80 [2] : vector<2x8x16xf32> to vector<2x8xf32>
    %159 = vector.shape_cast %158 : vector<2x8xf32> to vector<2x8x1xf32>
    %160 = vector.broadcast %159 : vector<2x8x1xf32> to vector<2x8x16xf32>
    %161 = arith.subf %157, %160 : vector<2x8x16xf32>
    %162 = math.exp %161 : vector<2x8x16xf32>
    %cst_81 = arith.constant dense<0.000000e+00> : vector<2x8xf32>
    %163 = vector.multi_reduction <add>, %162, %cst_81 [2] : vector<2x8x16xf32> to vector<2x8xf32>
    %164 = vector.shape_cast %163 : vector<2x8xf32> to vector<2x8x1xf32>
    %165 = vector.broadcast %164 : vector<2x8x1xf32> to vector<2x8x16xf32>
    %166 = arith.divf %162, %165 : vector<2x8x16xf32>
    "tpu.trace_start"() <{level = 10 : i32, message = "bqk,bkd->bqd"}> : () -> ()
    %cst_82 = arith.constant dense<0.000000e+00> : vector<2x8x128xf32>
    %167 = tpu.matmul %166, %156, %cst_82 {dimension_numbers = #tpu.dot_dimension_numbers<[2], [1], [1], [2], [0, 0, 0, 1, 1, 2], [0], [0]>} : vector<2x8x16xf32>, vector<2x16x128xf32>, vector<2x8x128xf32> -> vector<2x8x128xf32>
    "tpu.trace_stop"() : () -> ()
    %168 = vector.shape_cast %167 : vector<2x8x128xf32> to vector<16x128xf32>
    %169 = vector.extract_strided_slice %11 {offsets = [0, 0], sizes = [128, 128], strides = [1, 1]} : vector<512x128xf32> to vector<128x128xf32>
    %cst_83 = arith.constant dense<0.000000e+00> : vector<16x128xf32>
    %170 = tpu.matmul %168, %169, %cst_83 {dimension_numbers = #tpu.dot_dimension_numbers<[1], [0], [0], [1], [0, 0, 1, 1], [], []>} : vector<16x128xf32>, vector<128x128xf32>, vector<16x128xf32> -> vector<16x128xf32>
    %171 = arith.addf %153, %170 : vector<16x128xf32>
    %172 = vector.extract_strided_slice %150 {offsets = [0, 0, 128], sizes = [2, 8, 128], strides = [1, 1, 1]} : vector<2x8x512xf32> to vector<2x8x128xf32>
    %173 = vector.extract_strided_slice %151 {offsets = [0, 0, 128], sizes = [2, 16, 128], strides = [1, 1, 1]} : vector<2x16x512xf32> to vector<2x16x128xf32>
    %174 = vector.extract_strided_slice %152 {offsets = [0, 0, 128], sizes = [2, 16, 128], strides = [1, 1, 1]} : vector<2x16x512xf32> to vector<2x16x128xf32>
    "tpu.trace_start"() <{level = 10 : i32, message = "bqd,bkd->bqk"}> : () -> ()
    %cst_84 = arith.constant dense<0.000000e+00> : vector<2x8x16xf32>
    %175 = tpu.matmul %172, %173, %cst_84 {dimension_numbers = #tpu.dot_dimension_numbers<[2], [2], [1], [1], [0, 0, 0, 1, 1, 1], [0], [0]>} : vector<2x8x128xf32>, vector<2x16x128xf32>, vector<2x8x16xf32> -> vector<2x8x16xf32>
    "tpu.trace_stop"() : () -> ()
    %cst_85 = arith.constant dense<0xFF800000> : vector<2x8xf32>
    %176 = vector.multi_reduction <maximumf>, %175, %cst_85 [2] : vector<2x8x16xf32> to vector<2x8xf32>
    %177 = vector.shape_cast %176 : vector<2x8xf32> to vector<2x8x1xf32>
    %178 = vector.broadcast %177 : vector<2x8x1xf32> to vector<2x8x16xf32>
    %179 = arith.subf %175, %178 : vector<2x8x16xf32>
    %180 = math.exp %179 : vector<2x8x16xf32>
    %cst_86 = arith.constant dense<0.000000e+00> : vector<2x8xf32>
    %181 = vector.multi_reduction <add>, %180, %cst_86 [2] : vector<2x8x16xf32> to vector<2x8xf32>
    %182 = vector.shape_cast %181 : vector<2x8xf32> to vector<2x8x1xf32>
    %183 = vector.broadcast %182 : vector<2x8x1xf32> to vector<2x8x16xf32>
    %184 = arith.divf %180, %183 : vector<2x8x16xf32>
    "tpu.trace_start"() <{level = 10 : i32, message = "bqk,bkd->bqd"}> : () -> ()
    %cst_87 = arith.constant dense<0.000000e+00> : vector<2x8x128xf32>
    %185 = tpu.matmul %184, %174, %cst_87 {dimension_numbers = #tpu.dot_dimension_numbers<[2], [1], [1], [2], [0, 0, 0, 1, 1, 2], [0], [0]>} : vector<2x8x16xf32>, vector<2x16x128xf32>, vector<2x8x128xf32> -> vector<2x8x128xf32>
    "tpu.trace_stop"() : () -> ()
    %186 = vector.shape_cast %185 : vector<2x8x128xf32> to vector<16x128xf32>
    %187 = vector.extract_strided_slice %11 {offsets = [128, 0], sizes = [128, 128], strides = [1, 1]} : vector<512x128xf32> to vector<128x128xf32>
    %cst_88 = arith.constant dense<0.000000e+00> : vector<16x128xf32>
    %188 = tpu.matmul %186, %187, %cst_88 {dimension_numbers = #tpu.dot_dimension_numbers<[1], [0], [0], [1], [0, 0, 1, 1], [], []>} : vector<16x128xf32>, vector<128x128xf32>, vector<16x128xf32> -> vector<16x128xf32>
    %189 = arith.addf %171, %188 : vector<16x128xf32>
    %190 = vector.extract_strided_slice %150 {offsets = [0, 0, 256], sizes = [2, 8, 128], strides = [1, 1, 1]} : vector<2x8x512xf32> to vector<2x8x128xf32>
    %191 = vector.extract_strided_slice %151 {offsets = [0, 0, 256], sizes = [2, 16, 128], strides = [1, 1, 1]} : vector<2x16x512xf32> to vector<2x16x128xf32>
    %192 = vector.extract_strided_slice %152 {offsets = [0, 0, 256], sizes = [2, 16, 128], strides = [1, 1, 1]} : vector<2x16x512xf32> to vector<2x16x128xf32>
    "tpu.trace_start"() <{level = 10 : i32, message = "bqd,bkd->bqk"}> : () -> ()
    %cst_89 = arith.constant dense<0.000000e+00> : vector<2x8x16xf32>
    %193 = tpu.matmul %190, %191, %cst_89 {dimension_numbers = #tpu.dot_dimension_numbers<[2], [2], [1], [1], [0, 0, 0, 1, 1, 1], [0], [0]>} : vector<2x8x128xf32>, vector<2x16x128xf32>, vector<2x8x16xf32> -> vector<2x8x16xf32>
    "tpu.trace_stop"() : () -> ()
    %cst_90 = arith.constant dense<0xFF800000> : vector<2x8xf32>
    %194 = vector.multi_reduction <maximumf>, %193, %cst_90 [2] : vector<2x8x16xf32> to vector<2x8xf32>
    %195 = vector.shape_cast %194 : vector<2x8xf32> to vector<2x8x1xf32>
    %196 = vector.broadcast %195 : vector<2x8x1xf32> to vector<2x8x16xf32>
    %197 = arith.subf %193, %196 : vector<2x8x16xf32>
    %198 = math.exp %197 : vector<2x8x16xf32>
    %cst_91 = arith.constant dense<0.000000e+00> : vector<2x8xf32>
    %199 = vector.multi_reduction <add>, %198, %cst_91 [2] : vector<2x8x16xf32> to vector<2x8xf32>
    %200 = vector.shape_cast %199 : vector<2x8xf32> to vector<2x8x1xf32>
    %201 = vector.broadcast %200 : vector<2x8x1xf32> to vector<2x8x16xf32>
    %202 = arith.divf %198, %201 : vector<2x8x16xf32>
    "tpu.trace_start"() <{level = 10 : i32, message = "bqk,bkd->bqd"}> : () -> ()
    %cst_92 = arith.constant dense<0.000000e+00> : vector<2x8x128xf32>
    %203 = tpu.matmul %202, %192, %cst_92 {dimension_numbers = #tpu.dot_dimension_numbers<[2], [1], [1], [2], [0, 0, 0, 1, 1, 2], [0], [0]>} : vector<2x8x16xf32>, vector<2x16x128xf32>, vector<2x8x128xf32> -> vector<2x8x128xf32>
    "tpu.trace_stop"() : () -> ()
    %204 = vector.shape_cast %203 : vector<2x8x128xf32> to vector<16x128xf32>
    %205 = vector.extract_strided_slice %11 {offsets = [256, 0], sizes = [128, 128], strides = [1, 1]} : vector<512x128xf32> to vector<128x128xf32>
    %cst_93 = arith.constant dense<0.000000e+00> : vector<16x128xf32>
    %206 = tpu.matmul %204, %205, %cst_93 {dimension_numbers = #tpu.dot_dimension_numbers<[1], [0], [0], [1], [0, 0, 1, 1], [], []>} : vector<16x128xf32>, vector<128x128xf32>, vector<16x128xf32> -> vector<16x128xf32>
    %207 = arith.addf %189, %206 : vector<16x128xf32>
    %208 = vector.extract_strided_slice %150 {offsets = [0, 0, 384], sizes = [2, 8, 128], strides = [1, 1, 1]} : vector<2x8x512xf32> to vector<2x8x128xf32>
    %209 = vector.extract_strided_slice %151 {offsets = [0, 0, 384], sizes = [2, 16, 128], strides = [1, 1, 1]} : vector<2x16x512xf32> to vector<2x16x128xf32>
    %210 = vector.extract_strided_slice %152 {offsets = [0, 0, 384], sizes = [2, 16, 128], strides = [1, 1, 1]} : vector<2x16x512xf32> to vector<2x16x128xf32>
    "tpu.trace_start"() <{level = 10 : i32, message = "bqd,bkd->bqk"}> : () -> ()
    %cst_94 = arith.constant dense<0.000000e+00> : vector<2x8x16xf32>
    %211 = tpu.matmul %208, %209, %cst_94 {dimension_numbers = #tpu.dot_dimension_numbers<[2], [2], [1], [1], [0, 0, 0, 1, 1, 1], [0], [0]>} : vector<2x8x128xf32>, vector<2x16x128xf32>, vector<2x8x16xf32> -> vector<2x8x16xf32>
    "tpu.trace_stop"() : () -> ()
    %cst_95 = arith.constant dense<0xFF800000> : vector<2x8xf32>
    %212 = vector.multi_reduction <maximumf>, %211, %cst_95 [2] : vector<2x8x16xf32> to vector<2x8xf32>
    %213 = vector.shape_cast %212 : vector<2x8xf32> to vector<2x8x1xf32>
    %214 = vector.broadcast %213 : vector<2x8x1xf32> to vector<2x8x16xf32>
    %215 = arith.subf %211, %214 : vector<2x8x16xf32>
    %216 = math.exp %215 : vector<2x8x16xf32>
    %cst_96 = arith.constant dense<0.000000e+00> : vector<2x8xf32>
    %217 = vector.multi_reduction <add>, %216, %cst_96 [2] : vector<2x8x16xf32> to vector<2x8xf32>
    %218 = vector.shape_cast %217 : vector<2x8xf32> to vector<2x8x1xf32>
    %219 = vector.broadcast %218 : vector<2x8x1xf32> to vector<2x8x16xf32>
    %220 = arith.divf %216, %219 : vector<2x8x16xf32>
    "tpu.trace_start"() <{level = 10 : i32, message = "bqk,bkd->bqd"}> : () -> ()
    %cst_97 = arith.constant dense<0.000000e+00> : vector<2x8x128xf32>
    %221 = tpu.matmul %220, %210, %cst_97 {dimension_numbers = #tpu.dot_dimension_numbers<[2], [1], [1], [2], [0, 0, 0, 1, 1, 2], [0], [0]>} : vector<2x8x16xf32>, vector<2x16x128xf32>, vector<2x8x128xf32> -> vector<2x8x128xf32>
    "tpu.trace_stop"() : () -> ()
    %222 = vector.shape_cast %221 : vector<2x8x128xf32> to vector<16x128xf32>
    %223 = vector.extract_strided_slice %11 {offsets = [384, 0], sizes = [128, 128], strides = [1, 1]} : vector<512x128xf32> to vector<128x128xf32>
    %cst_98 = arith.constant dense<0.000000e+00> : vector<16x128xf32>
    %224 = tpu.matmul %222, %223, %cst_98 {dimension_numbers = #tpu.dot_dimension_numbers<[1], [0], [0], [1], [0, 0, 1, 1], [], []>} : vector<16x128xf32>, vector<128x128xf32>, vector<16x128xf32> -> vector<16x128xf32>
    %225 = arith.addf %207, %224 : vector<16x128xf32>
    %226 = vector.broadcast %149 : vector<1x128xf32> to vector<16x128xf32>
    %227 = arith.addf %225, %226 : vector<16x128xf32>
    %228 = arith.addf %128, %227 : vector<16x128xf32>
    %c1_99 = arith.constant 1 : index
    %c0_100 = arith.constant 0 : index
    %229 = vector.load %arg19[%c1_99, %c0_100] : memref<3x128xf32, #tpu.memory_space<vmem>>, vector<1x128xf32>
    %c1_101 = arith.constant 1 : index
    %c0_102 = arith.constant 0 : index
    %230 = vector.load %arg20[%c1_101, %c0_102] : memref<3x128xf32, #tpu.memory_space<vmem>>, vector<1x128xf32>
    %cst_103 = arith.constant dense<0.000000e+00> : vector<16xf32>
    %231 = vector.multi_reduction <add>, %228, %cst_103 [1] : vector<16x128xf32> to vector<16xf32>
    %232 = vector.shape_cast %231 : vector<16xf32> to vector<16x1xf32>
    %cst_104 = arith.constant 3.125000e-02 : f32
    %233 = vector.broadcast %cst_104 : f32 to vector<16x1xf32>
    %234 = arith.mulf %232, %233 : vector<16x1xf32>
    %235 = arith.mulf %228, %228 : vector<16x128xf32>
    %cst_105 = arith.constant dense<0.000000e+00> : vector<16xf32>
    %236 = vector.multi_reduction <add>, %235, %cst_105 [1] : vector<16x128xf32> to vector<16xf32>
    %237 = vector.shape_cast %236 : vector<16xf32> to vector<16x1xf32>
    %cst_106 = arith.constant 3.125000e-02 : f32
    %238 = vector.broadcast %cst_106 : f32 to vector<16x1xf32>
    %239 = arith.mulf %237, %238 : vector<16x1xf32>
    %240 = arith.mulf %234, %234 : vector<16x1xf32>
    %241 = arith.subf %239, %240 : vector<16x1xf32>
    %242 = vector.broadcast %234 : vector<16x1xf32> to vector<16x128xf32>
    %243 = arith.subf %228, %242 : vector<16x128xf32>
    %cst_107 = arith.constant 9.99999974E-6 : f32
    %244 = vector.broadcast %cst_107 : f32 to vector<16x1xf32>
    %245 = arith.addf %241, %244 : vector<16x1xf32>
    %246 = math.rsqrt %245 : vector<16x1xf32>
    %247 = vector.broadcast %246 : vector<16x1xf32> to vector<16x128xf32>
    %248 = arith.mulf %243, %247 : vector<16x128xf32>
    %249 = vector.broadcast %229 : vector<1x128xf32> to vector<16x128xf32>
    %250 = arith.mulf %248, %249 : vector<16x128xf32>
    %251 = vector.broadcast %230 : vector<1x128xf32> to vector<16x128xf32>
    %252 = arith.addf %250, %251 : vector<16x128xf32>
    %cst_108 = arith.constant dense<0.000000e+00> : vector<16x128xf32>
    %253 = tpu.matmul %252, %12, %cst_108 {dimension_numbers = #tpu.dot_dimension_numbers<[1], [0], [0], [1], [0, 0, 1, 1], [], []>} : vector<16x128xf32>, vector<128x128xf32>, vector<16x128xf32> -> vector<16x128xf32>
    %c0_109 = arith.constant 0 : index
    %c0_110 = arith.constant 0 : index
    %254 = vector.load %arg16[%c0_109, %c0_110] : memref<1x128xf32, #tpu.memory_space<vmem>>, vector<1x128xf32>
    %255 = vector.broadcast %254 : vector<1x128xf32> to vector<16x128xf32>
    %256 = arith.addf %253, %255 : vector<16x128xf32>
    %cst_111 = arith.constant 0.000000e+00 : f32
    %257 = vector.broadcast %cst_111 : f32 to vector<16x128xf32>
    %258 = arith.maximumf %256, %257 : vector<16x128xf32>
    %cst_112 = arith.constant dense<0.000000e+00> : vector<16x128xf32>
    %259 = tpu.matmul %258, %13, %cst_112 {dimension_numbers = #tpu.dot_dimension_numbers<[1], [0], [0], [1], [0, 0, 1, 1], [], []>} : vector<16x128xf32>, vector<128x128xf32>, vector<16x128xf32> -> vector<16x128xf32>
    %c0_113 = arith.constant 0 : index
    %c0_114 = arith.constant 0 : index
    %260 = vector.load %arg18[%c0_113, %c0_114] : memref<1x128xf32, #tpu.memory_space<vmem>>, vector<1x128xf32>
    %261 = vector.broadcast %260 : vector<1x128xf32> to vector<16x128xf32>
    %262 = arith.addf %259, %261 : vector<16x128xf32>
    %263 = arith.addf %252, %262 : vector<16x128xf32>
    %c2_115 = arith.constant 2 : index
    %c0_116 = arith.constant 0 : index
    %264 = vector.load %arg19[%c2_115, %c0_116] : memref<3x128xf32, #tpu.memory_space<vmem>>, vector<1x128xf32>
    %c2_117 = arith.constant 2 : index
    %c0_118 = arith.constant 0 : index
    %265 = vector.load %arg20[%c2_117, %c0_118] : memref<3x128xf32, #tpu.memory_space<vmem>>, vector<1x128xf32>
    %cst_119 = arith.constant dense<0.000000e+00> : vector<16xf32>
    %266 = vector.multi_reduction <add>, %263, %cst_119 [1] : vector<16x128xf32> to vector<16xf32>
    %267 = vector.shape_cast %266 : vector<16xf32> to vector<16x1xf32>
    %cst_120 = arith.constant 3.125000e-02 : f32
    %268 = vector.broadcast %cst_120 : f32 to vector<16x1xf32>
    %269 = arith.mulf %267, %268 : vector<16x1xf32>
    %270 = arith.mulf %263, %263 : vector<16x128xf32>
    %cst_121 = arith.constant dense<0.000000e+00> : vector<16xf32>
    %271 = vector.multi_reduction <add>, %270, %cst_121 [1] : vector<16x128xf32> to vector<16xf32>
    %272 = vector.shape_cast %271 : vector<16xf32> to vector<16x1xf32>
    %cst_122 = arith.constant 3.125000e-02 : f32
    %273 = vector.broadcast %cst_122 : f32 to vector<16x1xf32>
    %274 = arith.mulf %272, %273 : vector<16x1xf32>
    %275 = arith.mulf %269, %269 : vector<16x1xf32>
    %276 = arith.subf %274, %275 : vector<16x1xf32>
    %277 = vector.broadcast %269 : vector<16x1xf32> to vector<16x128xf32>
    %278 = arith.subf %263, %277 : vector<16x128xf32>
    %cst_123 = arith.constant 9.99999974E-6 : f32
    %279 = vector.broadcast %cst_123 : f32 to vector<16x1xf32>
    %280 = arith.addf %276, %279 : vector<16x1xf32>
    %281 = math.rsqrt %280 : vector<16x1xf32>
    %282 = vector.broadcast %281 : vector<16x1xf32> to vector<16x128xf32>
    %283 = arith.mulf %278, %282 : vector<16x128xf32>
    %284 = vector.broadcast %264 : vector<1x128xf32> to vector<16x128xf32>
    %285 = arith.mulf %283, %284 : vector<16x128xf32>
    %286 = vector.broadcast %265 : vector<1x128xf32> to vector<16x128xf32>
    %287 = arith.addf %285, %286 : vector<16x128xf32>
    %288 = vector.shape_cast %287 : vector<16x128xf32> to vector<2x8x128xf32>
    %c0_124 = arith.constant 0 : index
    %c0_125 = arith.constant 0 : index
    %c0_126 = arith.constant 0 : index
    %289 = vector.load %arg21[%c0_124, %c0_125, %c0_126] : memref<2x8x128xf32, #tpu.memory_space<vmem>>, vector<2x8x128xf32>
    tpu.vector_store %arg21[%c0_124, %c0_125, %c0_126], %288 {strides = array<i32>} : memref<2x8x128xf32, #tpu.memory_space<vmem>>, vector<2x8x128xf32>,
    return
  }
  func.func @transform_0(%arg0: i32) -> (i32, i32, i32) {
    %c0_i32 = arith.constant 0 : i32
    %c0_i32_0 = arith.constant 0 : i32
    %c0_i32_1 = arith.constant 0 : i32
    return %arg0, %c0_i32, %c0_i32_0 : i32, i32, i32
  }
  func.func @transform_1(%arg0: i32) -> (i32, i32, i32) {
    %c0_i32 = arith.constant 0 : i32
    %c0_i32_0 = arith.constant 0 : i32
    %c0_i32_1 = arith.constant 0 : i32
    return %arg0, %c0_i32, %c0_i32_0 : i32, i32, i32
  }
  func.func @transform_2(%arg0: i32) -> (i32, i32, i32) {
    %c0_i32 = arith.constant 0 : i32
    %c0_i32_0 = arith.constant 0 : i32
    %c0_i32_1 = arith.constant 0 : i32
    return %arg0, %c0_i32, %c0_i32_0 : i32, i32, i32
  }
  func.func @transform_3(%arg0: i32) -> (i32, i32, i32) {
    %c0_i32 = arith.constant 0 : i32
    %c0_i32_0 = arith.constant 0 : i32
    %c0_i32_1 = arith.constant 0 : i32
    return %arg0, %c0_i32, %c0_i32_0 : i32, i32, i32
  }
  func.func @transform_4(%arg0: i32) -> (i32, i32) {
    %c0_i32 = arith.constant 0 : i32
    %c0_i32_0 = arith.constant 0 : i32
    %c0_i32_1 = arith.constant 0 : i32
    return %c0_i32, %c0_i32_0 : i32, i32
  }
  func.func @transform_5(%arg0: i32) -> (i32, i32) {
    %c0_i32 = arith.constant 0 : i32
    %c0_i32_0 = arith.constant 0 : i32
    %c0_i32_1 = arith.constant 0 : i32
    return %c0_i32, %c0_i32_0 : i32, i32
  }
  func.func @transform_6(%arg0: i32) -> (i32, i32) {
    %c0_i32 = arith.constant 0 : i32
    %c0_i32_0 = arith.constant 0 : i32
    %c0_i32_1 = arith.constant 0 : i32
    return %c0_i32, %c0_i32_0 : i32, i32
  }
  func.func @transform_7(%arg0: i32) -> (i32, i32) {
    %c0_i32 = arith.constant 0 : i32
    %c0_i32_0 = arith.constant 0 : i32
    %c0_i32_1 = arith.constant 0 : i32
    return %c0_i32, %c0_i32_0 : i32, i32
  }
  func.func @transform_8(%arg0: i32) -> (i32, i32) {
    %c0_i32 = arith.constant 0 : i32
    %c0_i32_0 = arith.constant 0 : i32
    %c0_i32_1 = arith.constant 0 : i32
    return %c0_i32, %c0_i32_0 : i32, i32
  }
  func.func @transform_9(%arg0: i32) -> (i32, i32) {
    %c0_i32 = arith.constant 0 : i32
    %c0_i32_0 = arith.constant 0 : i32
    %c0_i32_1 = arith.constant 0 : i32
    return %c0_i32, %c0_i32_0 : i32, i32
  }
  func.func @transform_10(%arg0: i32) -> (i32, i32, i32) {
    %c0_i32 = arith.constant 0 : i32
    %c0_i32_0 = arith.constant 0 : i32
    %c0_i32_1 = arith.constant 0 : i32
    %c0_i32_2 = arith.constant 0 : i32
    return %c0_i32, %c0_i32_0, %c0_i32_1 : i32, i32, i32
  }
  func.func @transform_11(%arg0: i32) -> (i32, i32) {
    %c0_i32 = arith.constant 0 : i32
    %c0_i32_0 = arith.constant 0 : i32
    %c0_i32_1 = arith.constant 0 : i32
    return %c0_i32, %c0_i32_0 : i32, i32
  }
  func.func @transform_12(%arg0: i32) -> (i32, i32) {
    %c0_i32 = arith.constant 0 : i32
    %c0_i32_0 = arith.constant 0 : i32
    %c0_i32_1 = arith.constant 0 : i32
    return %c0_i32, %c0_i32_0 : i32, i32
  }
  func.func @transform_13(%arg0: i32) -> (i32, i32) {
    %c0_i32 = arith.constant 0 : i32
    %c0_i32_0 = arith.constant 0 : i32
    %c0_i32_1 = arith.constant 0 : i32
    return %c0_i32, %c0_i32_0 : i32, i32
  }
  func.func @transform_14(%arg0: i32) -> (i32, i32) {
    %c0_i32 = arith.constant 0 : i32
    %c0_i32_0 = arith.constant 0 : i32
    %c0_i32_1 = arith.constant 0 : i32
    return %c0_i32, %c0_i32_0 : i32, i32
  }
  func.func @transform_15(%arg0: i32) -> (i32, i32) {
    %c0_i32 = arith.constant 0 : i32
    %c0_i32_0 = arith.constant 0 : i32
    %c0_i32_1 = arith.constant 0 : i32
    return %c0_i32, %c0_i32_0 : i32, i32
  }
  func.func @transform_16(%arg0: i32) -> (i32, i32) {
    %c0_i32 = arith.constant 0 : i32
    %c0_i32_0 = arith.constant 0 : i32
    %c0_i32_1 = arith.constant 0 : i32
    return %c0_i32, %c0_i32_0 : i32, i32
  }
  func.func @transform_17(%arg0: i32) -> (i32, i32) {
    %c0_i32 = arith.constant 0 : i32
    %c0_i32_0 = arith.constant 0 : i32
    %c0_i32_1 = arith.constant 0 : i32
    return %c0_i32, %c0_i32_0 : i32, i32
  }
  func.func @transform_18(%arg0: i32) -> (i32, i32) {
    %c0_i32 = arith.constant 0 : i32
    %c0_i32_0 = arith.constant 0 : i32
    %c0_i32_1 = arith.constant 0 : i32
    return %c0_i32, %c0_i32_0 : i32, i32
  }
  func.func @transform_19(%arg0: i32) -> (i32, i32) {
    %c0_i32 = arith.constant 0 : i32
    %c0_i32_0 = arith.constant 0 : i32
    %c0_i32_1 = arith.constant 0 : i32
    return %c0_i32, %c0_i32_0 : i32, i32
  }
  func.func @transform_20(%arg0: i32) -> (i32, i32, i32) {
    %c0_i32 = arith.constant 0 : i32
    %c0_i32_0 = arith.constant 0 : i32
    %c0_i32_1 = arith.constant 0 : i32
    return %arg0, %c0_i32, %c0_i32_0 : i32, i32, i32
  }
}

</mosaic_0001>

<bundles_post_ra>
// kernel: tpu_custom_call.1
= control target key start
LH: loop header
LB: loop body
LE: loop exit
PB: predicated region body
PF: predicated region fallthrough
CT: control target
= control target key end

     0   :  { %s8568_s0 = inlined_call_operand.hbm [shape: f32[2,8,128], index: 0, kind: input, shape index: {}]   ;;  %s8569_s1 = inlined_call_operand.hbm [shape: f32[2,16,128], index: 1, kind: input, shape index: {}]   ;;  %s8570_s2 = inlined_call_operand.hbm [shape: f32[2,8,128], index: 2, kind: input, shape index: {}]   ;;  %s8571_s3 = inlined_call_operand.hbm [shape: f32[2,16,128], index: 3, kind: input, shape index: {}]   ;;  %s8572_s4 = inlined_call_operand.hbm [shape: f32[128,1024], index: 4, kind: input, shape index: {}]   ;;  %s8573_s5 = inlined_call_operand.hbm [shape: f32[1,1024], index: 5, kind: input, shape index: {}]   ;;  %s8574_s6 = inlined_call_operand.hbm [shape: f32[128,512], index: 6, kind: input, shape index: {}]   ;;  %s8575_s7 = inlined_call_operand.hbm [shape: f32[1,512], index: 7, kind: input, shape index: {}]   ;;  %s8576_s8 = inlined_call_operand.hbm [shape: f32[512,128], index: 8, kind: input, shape index: {}]   ;;  %s8577_s9 = inlined_call_operand.hbm [shape: f32[1,128], index: 9, kind: input, shape index: {}]   ;;  %s8578_s10 = inlined_call_operand.hbm [shape: f32[3,128,512], index: 10, kind: input, shape index: {}]   ;;  %s8579_s11 = inlined_call_operand.hbm [shape: f32[3,512], index: 11, kind: input, shape index: {}]   ;;  %s8580_s12 = inlined_call_operand.hbm [shape: f32[512,128], index: 12, kind: input, shape index: {}]   ;;  %s8581_s13 = inlined_call_operand.hbm [shape: f32[1,128], index: 13, kind: input, shape index: {}]   ;;  %s8582_s14 = inlined_call_operand.hbm [shape: f32[128,128], index: 14, kind: input, shape index: {}]   ;;  %s8583_s15 = inlined_call_operand.hbm [shape: f32[1,128], index: 15, kind: input, shape index: {}]   ;;  %s8584_s16 = inlined_call_operand.hbm [shape: f32[128,128], index: 16, kind: input, shape index: {}]   ;;  %s8585_s17 = inlined_call_operand.hbm [shape: f32[1,128], index: 17, kind: input, shape index: {}]   ;;  %s8586_s18 = inlined_call_operand.hbm [shape: f32[3,128], index: 18, kind: input, shape index: {}]   ;;  %s8587_s19 = inlined_call_operand.hbm [shape: f32[3,128], index: 19, kind: input, shape index: {}]   ;;  %s8588_s20 = inlined_call_operand.hbm [shape: f32[2,8,128], index: 20, kind: output, shape index: {}]  }
   0x1   :  { %8596 = sst [smem:[#allocation47_spill]] %s8568_s0 }
   0x2   :  { %8597 = sst [smem:[#allocation48_spill]] %s8569_s1 }
   0x3   :  { %8598 = sst [smem:[#allocation49_spill]] %s8570_s2 }
   0x4   :  { %8599 = sst [smem:[#allocation50_spill]] %s8571_s3 }
   0x5   :  { %8600 = sst [smem:[#allocation51_spill]] %s8572_s4 }
   0x6   :  { %8601 = sst [smem:[#allocation52_spill]] %s8587_s19 }
   0x7   :  { %8602 = sst [smem:[#allocation53_spill]] %s8588_s20 }
   0x8   :  { %25 = vsyncpa [#allocation3], 0 }
   0x9   :  { %26 = vsyncpa [#allocation6], 0 }
   0xa   :  { %27 = vsyncpa [#allocation9], 0 }
   0xb   :  { %28 = vsyncpa [#allocation12], 0 }
   0xc   :  { %29 = vsyncpa [#allocation15], 0 }
   0xd   :  { %30 = vsyncpa [#allocation18], 0 }
   0xe   :  { %31 = vsyncpa [#allocation21], 0 }
   0xf   :  { %32 = vsyncpa [#allocation24], 0 }
  0x10   :  { %33 = vsyncpa [#allocation27], 0 }
  0x11   :  { %34 = vsyncpa [#allocation30], 0 }
  0x12   :  { %35 = vsyncpa [#allocation33], 0 }
  0x13   :  { %36 = vsyncpa [#allocation4], 0  ;;  %s7590_s1 = smov [#allocation5]   ;;  %s7591_s23 = smov [#allocation8]  }
  0x14   :  { %s54_s22 = sshll.u32 %s7590_s1, 4  ;;  %s78_s24 = sshll.u32 %s7591_s23, 4  ;;  %s55_s22 = int_to_ptr.vmem [resolvable:$true] %s54_s22  ;;  %s7725_s24 = int_to_ptr.vmem [resolvable:$true] %s78_s24 }
  0x15   :  { %s8603_s3 = sld [smem:[#allocation48_spill]] }
  0x1b   :  { %s7104_s26 = scalar_lea.hbm %s8603_s3, 512 }
  0x1c   :  { %p7105_p0 = scmp.ne.s32.totalorder %s8603_s3, %s7104_s26  ;;  %p7108_p1 = scmp.lt.u32.totalorder %s7104_s26, %s8603_s3 }
  0x1e   :  { %p7110_p2 = pnand %p7108_p1, %p7105_p0 }
  0x20   :  { %7113 = shalt.err (!%p7110_p2)
}
  0x21   :  { %s7114_s30 = scalar_lea.vmem %s55_s22, 512  ;;  %p7119_p4 = scmp.lt.s32.totalorder %s55_s22, %s55_s22 }
  0x22   :  { %p7115_p3 = scmp.ne.s32.totalorder %s55_s22, %s7114_s30  ;;  %p7120_p5 = scmp.lt.s32.totalorder %s7114_s30, %s7114_s30 }
  0x24   :  { %p7121_p6 = por %p7120_p5, %p7119_p4 }
  0x26   :  { %p7122_p7 = pnand %p7121_p6, %p7115_p3 }
  0x28   :  { %7125 = shalt.err (!%p7122_p7)
}
  0x29   :  { %s7592_s0 = smov 128   ;;  %s7593_s21 = smov 8  }
  0x2a   :  { %60 = dma.hbm_to_vmem [thread:$0]  %s8603_s3, 512, %s55_s22, [#allocation6], %s7592_s0, %s7592_s0, %s7593_s21  }
  0x2b   :  { %s8604_s26 = sld [smem:[#allocation50_spill]] }
  0x31   :  { %s7126_s27 = scalar_lea.hbm %s8604_s26, 512 }
  0x32   :  { %p7127_p8 = scmp.ne.s32.totalorder %s8604_s26, %s7126_s27  ;;  %p7130_p9 = scmp.lt.u32.totalorder %s7126_s27, %s8604_s26 }
  0x34   :  { %p7132_p10 = pnand %p7130_p9, %p7127_p8 }
  0x36   :  { %7135 = shalt.err (!%p7132_p10)
}
  0x37   :  { %s7136_s20 = scalar_lea.vmem %s7725_s24, 512  ;;  %p7141_p12 = scmp.lt.s32.totalorder %s7725_s24, %s7725_s24 }
  0x38   :  { %p7137_p11 = scmp.ne.s32.totalorder %s7725_s24, %s7136_s20  ;;  %p7142_p13 = scmp.lt.s32.totalorder %s7136_s20, %s7136_s20 }
  0x3a   :  { %p7143_p0 = por %p7142_p13, %p7141_p12 }
  0x3c   :  { %p7144_p1 = pnand %p7143_p0, %p7137_p11 }
  0x3e   :  { %7147 = shalt.err (!%p7144_p1)
}
  0x3f   :  { %84 = dma.hbm_to_vmem [thread:$0]  %s8604_s26, 512, %s7725_s24, [#allocation9], %s7592_s0, %s7592_s0, %s7593_s21  }
  0x40   :  { %s7594_s1 = smov [#allocation11]   ;;  %s7595_s2 = smov [#allocation14]  }
  0x41   :  { %s103_s23 = sshll.u32 %s7594_s1, 4  ;;  %s125_s25 = sshll.u32 %s7595_s2, 4  ;;  %s104_s23 = int_to_ptr.vmem [resolvable:$true] %s103_s23  ;;  %s126_s25 = int_to_ptr.vmem [resolvable:$true] %s125_s25 }
  0x42   :  { %s7148_s20 = scalar_lea.hbm %s8573_s5, 128 }
  0x43   :  { %p7149_p2 = scmp.ne.s32.totalorder %s8573_s5, %s7148_s20  ;;  %p7152_p3 = scmp.lt.u32.totalorder %s7148_s20, %s8573_s5 }
  0x45   :  { %p7154_p4 = pnand %p7152_p3, %p7149_p2 }
  0x47   :  { %7157 = shalt.err (!%p7154_p4)
}
  0x48   :  { %s7158_s24 = scalar_lea.vmem %s104_s23, 128  ;;  %p7163_p6 = scmp.lt.s32.totalorder %s104_s23, %s104_s23 }
  0x49   :  { %p7159_p5 = scmp.ne.s32.totalorder %s104_s23, %s7158_s24  ;;  %p7164_p7 = scmp.lt.s32.totalorder %s7158_s24, %s7158_s24 }
  0x4b   :  { %p7165_p8 = por %p7164_p7, %p7163_p6 }
  0x4d   :  { %p7166_p9 = pnand %p7165_p8, %p7159_p5 }
  0x4f   :  { %7169 = shalt.err (!%p7166_p9)
}
  0x50   :  { %106 = dma.hbm_to_vmem [thread:$0]  %s8573_s5, 128, %s104_s23, [#allocation12]  }
  0x51   :  { %s7170_s2 = scalar_lea.hbm %s8575_s7, 64 }
  0x52   :  { %p7171_p10 = scmp.ne.s32.totalorder %s8575_s7, %s7170_s2  ;;  %p7174_p11 = scmp.lt.u32.totalorder %s7170_s2, %s8575_s7 }
  0x54   :  { %p7176_p12 = pnand %p7174_p11, %p7171_p10 }
  0x56   :  { %7179 = shalt.err (!%p7176_p12)
}
  0x57   :  { %s7180_s4 = scalar_lea.vmem %s126_s25, 64  ;;  %p7185_p0 = scmp.lt.s32.totalorder %s126_s25, %s126_s25 }
  0x58   :  { %p7181_p13 = scmp.ne.s32.totalorder %s126_s25, %s7180_s4  ;;  %p7186_p1 = scmp.lt.s32.totalorder %s7180_s4, %s7180_s4 }
  0x5a   :  { %p7187_p2 = por %p7186_p1, %p7185_p0 }
  0x5c   :  { %p7188_p3 = pnand %p7187_p2, %p7181_p13 }
  0x5e   :  { %7191 = shalt.err (!%p7188_p3)
}
  0x5f   :  { %128 = dma.hbm_to_vmem [thread:$0]  %s8575_s7, 64, %s126_s25, [#allocation15]  }
  0x60   :  { %s7596_s29 = smov [#allocation17]   ;;  %s7597_s24 = smov [#allocation20]  }
  0x61   :  { %s147_s30 = sshll.u32 %s7596_s29, 4  ;;  %s169_s26 = sshll.u32 %s7597_s24, 4  ;;  %s148_s30 = int_to_ptr.vmem [resolvable:$true] %s147_s30  ;;  %s170_s26 = int_to_ptr.vmem [resolvable:$true] %s169_s26 }
  0x62   :  { %s7192_s1 = scalar_lea.hbm %s8577_s9, 16 }
  0x63   :  { %p7193_p4 = scmp.ne.s32.totalorder %s8577_s9, %s7192_s1  ;;  %p7196_p5 = scmp.lt.u32.totalorder %s7192_s1, %s8577_s9 }
  0x65   :  { %p7198_p6 = pnand %p7196_p5, %p7193_p4 }
  0x67   :  { %7201 = shalt.err (!%p7198_p6)
}
  0x68   :  { %s7202_s7 = scalar_lea.vmem %s148_s30, 16  ;;  %s7206_s25 = scalar_lea.vmem %s148_s30, 32 }
  0x69   :  { %p7203_p7 = scmp.ne.s32.totalorder %s148_s30, %s7202_s7  ;;  %p7207_p8 = scmp.lt.s32.totalorder %s148_s30, %s148_s30 }
  0x6a   :  { %p7208_p9 = scmp.lt.s32.totalorder %s7206_s25, %s7202_s7 }
  0x6c   :  { %p7209_p10 = por %p7208_p9, %p7207_p8 }
  0x6e   :  { %p7210_p11 = pnand %p7209_p10, %p7203_p7 }
  0x70   :  { %7213 = shalt.err (!%p7210_p11)
}
  0x71   :  { %150 = dma.hbm_to_vmem [thread:$0]  %s8577_s9, 16, %s148_s30, [#allocation18]  }
  0x72   :  { %s7214_s29 = scalar_lea.hbm %s8579_s11, 256 }
  0x73   :  { %p7215_p12 = scmp.ne.s32.totalorder %s8579_s11, %s7214_s29  ;;  %p7218_p13 = scmp.lt.u32.totalorder %s7214_s29, %s8579_s11 }
  0x75   :  { %p7220_p0 = pnand %p7218_p13, %p7215_p12 }
  0x77   :  { %7223 = shalt.err (!%p7220_p0)
}
  0x78   :  { %s7224_s2 = scalar_lea.vmem %s170_s26, 256  ;;  %p7229_p2 = scmp.lt.s32.totalorder %s170_s26, %s170_s26 }
  0x79   :  { %p7225_p1 = scmp.ne.s32.totalorder %s170_s26, %s7224_s2  ;;  %p7230_p3 = scmp.lt.s32.totalorder %s7224_s2, %s7224_s2 }
  0x7b   :  { %p7231_p4 = por %p7230_p3, %p7229_p2 }
  0x7d   :  { %p7232_p5 = pnand %p7231_p4, %p7225_p1 }
  0x7f   :  { %7235 = shalt.err (!%p7232_p5)
}
  0x80   :  { %172 = dma.hbm_to_vmem [thread:$0]  %s8579_s11, 256, %s170_s26, [#allocation21]  }
  0x81   :  { %s7598_s27 = smov [#allocation23]   ;;  %s7599_s28 = smov [#allocation26]  }
  0x82   :  { %s191_s19 = sshll.u32 %s7598_s27, 4  ;;  %s213_s7 = sshll.u32 %s7599_s28, 4  ;;  %s192_s19 = int_to_ptr.vmem [resolvable:$true] %s191_s19  ;;  %s214_s7 = int_to_ptr.vmem [resolvable:$true] %s213_s7 }
  0x83   :  { %s7236_s4 = scalar_lea.hbm %s8581_s13, 16 }
  0x84   :  { %p7237_p6 = scmp.ne.s32.totalorder %s8581_s13, %s7236_s4  ;;  %p7240_p7 = scmp.lt.u32.totalorder %s7236_s4, %s8581_s13 }
  0x86   :  { %p7242_p8 = pnand %p7240_p7, %p7237_p6 }
  0x88   :  { %7245 = shalt.err (!%p7242_p8)
}
  0x89   :  { %s7246_s11 = scalar_lea.vmem %s192_s19, 16  ;;  %s7250_s26 = scalar_lea.vmem %s192_s19, 32 }
  0x8a   :  { %p7247_p9 = scmp.ne.s32.totalorder %s192_s19, %s7246_s11  ;;  %p7251_p10 = scmp.lt.s32.totalorder %s192_s19, %s192_s19 }
  0x8b   :  { %p7252_p11 = scmp.lt.s32.totalorder %s7250_s26, %s7246_s11 }
  0x8d   :  { %p7253_p12 = por %p7252_p11, %p7251_p10 }
  0x8f   :  { %p7254_p13 = pnand %p7253_p12, %p7247_p9 }
  0x91   :  { %7257 = shalt.err (!%p7254_p13)
}
  0x92   :  { %194 = dma.hbm_to_vmem [thread:$0]  %s8581_s13, 16, %s192_s19, [#allocation24]  }
  0x93   :  { %s7258_s9 = scalar_lea.hbm %s8583_s15, 16 }
  0x94   :  { %p7259_p0 = scmp.ne.s32.totalorder %s8583_s15, %s7258_s9  ;;  %p7262_p1 = scmp.lt.u32.totalorder %s7258_s9, %s8583_s15 }
  0x96   :  { %p7264_p2 = pnand %p7262_p1, %p7259_p0 }
  0x98   :  { %7267 = shalt.err (!%p7264_p2)
}
  0x99   :  { %s7268_s20 = scalar_lea.vmem %s214_s7, 16  ;;  %s7272_s4 = scalar_lea.vmem %s214_s7, 32 }
  0x9a   :  { %p7269_p3 = scmp.ne.s32.totalorder %s214_s7, %s7268_s20  ;;  %p7273_p4 = scmp.lt.s32.totalorder %s214_s7, %s214_s7 }
  0x9b   :  { %p7274_p5 = scmp.lt.s32.totalorder %s7272_s4, %s7268_s20 }
  0x9d   :  { %p7275_p6 = por %p7274_p5, %p7273_p4 }
  0x9f   :  { %p7276_p7 = pnand %p7275_p6, %p7269_p3 }
  0xa1   :  { %7279 = shalt.err (!%p7276_p7)
}
  0xa2   :  { %216 = dma.hbm_to_vmem [thread:$0]  %s8583_s15, 16, %s214_s7, [#allocation27]  }
  0xa3   :  { %s7600_s5 = smov [#allocation29]   ;;  %s7601_s29 = smov [#allocation2]  }
  0xa4   :  { %s235_s23 = sshll.u32 %s7600_s5, 4  ;;  %s42_s24 = sshll.u32 %s7601_s29, 4  ;;  %s236_s23 = int_to_ptr.vmem [resolvable:$true] %s235_s23  ;;  %s7834_s24 = int_to_ptr.vmem [resolvable:$true] %s42_s24 }
  0xa5   :  { %s7280_s22 = scalar_lea.hbm %s8585_s17, 16 }
  0xa6   :  { %p7281_p8 = scmp.ne.s32.totalorder %s8585_s17, %s7280_s22  ;;  %p7284_p9 = scmp.lt.u32.totalorder %s7280_s22, %s8585_s17 }
  0xa8   :  { %p7286_p10 = pnand %p7284_p9, %p7281_p8 }
  0xaa   :  { %7289 = shalt.err (!%p7286_p10)
}
  0xab   :  { %s7290_s15 = scalar_lea.vmem %s236_s23, 16  ;;  %s7294_s7 = scalar_lea.vmem %s236_s23, 32 }
  0xac   :  { %p7291_p11 = scmp.ne.s32.totalorder %s236_s23, %s7290_s15  ;;  %p7295_p12 = scmp.lt.s32.totalorder %s236_s23, %s236_s23 }
  0xad   :  { %p7296_p13 = scmp.lt.s32.totalorder %s7294_s7, %s7290_s15 }
  0xaf   :  { %p7297_p0 = por %p7296_p13, %p7295_p12 }
  0xb1   :  { %p7298_p1 = pnand %p7297_p0, %p7291_p11 }
  0xb3   :  { %7301 = shalt.err (!%p7298_p1)
}
  0xb4   :  { %238 = dma.hbm_to_vmem [thread:$0]  %s8585_s17, 16, %s236_s23, [#allocation30]  }
  0xb5   :  { %s8605_s20 = sld [smem:[#allocation47_spill]] }
  0xbb   :  { %s7302_s4 = scalar_lea.hbm %s8605_s20, 256 }
  0xbc   :  { %p7303_p2 = scmp.ne.s32.totalorder %s8605_s20, %s7302_s4  ;;  %p7306_p3 = scmp.lt.u32.totalorder %s7302_s4, %s8605_s20 }
  0xbe   :  { %p7308_p4 = pnand %p7306_p3, %p7303_p2 }
  0xc0   :  { %7311 = shalt.err (!%p7308_p4)
}
  0xc1   :  { %s7312_s11 = scalar_lea.vmem %s7834_s24, 256  ;;  %p7317_p6 = scmp.lt.s32.totalorder %s7834_s24, %s7834_s24 }
  0xc2   :  { %p7313_p5 = scmp.ne.s32.totalorder %s7834_s24, %s7312_s11  ;;  %p7318_p7 = scmp.lt.s32.totalorder %s7312_s11, %s7312_s11 }
  0xc4   :  { %p7319_p8 = por %p7318_p7, %p7317_p6 }
  0xc6   :  { %p7320_p9 = pnand %p7319_p8, %p7313_p5 }
  0xc8   :  { %7323 = shalt.err (!%p7320_p9)
}
  0xc9   :  { %48 = dma.hbm_to_vmem [thread:$0]  %s8605_s20, 256, %s7834_s24, [#allocation3], %s7592_s0, %s7592_s0, %s7593_s21  }
  0xca   :  { %s7602_s26 = smov [#allocation7]   ;;  %s7603_s3 = smov [#allocation10]  }
  0xcb   :  { %s66_s22 = sshll.u32 %s7602_s26, 4  ;;  %s90_s1 = sshll.u32 %s7603_s3, 4  ;;  %s67_s22 = int_to_ptr.vmem [resolvable:$true] %s66_s22  ;;  %s7868_s1 = int_to_ptr.vmem [resolvable:$true] %s90_s1 }
  0xcc   :  { %s8606_s15 = sld [smem:[#allocation49_spill]] }
  0xd2   :  { %s7324_s7 = scalar_lea.hbm %s8606_s15, 256 }
  0xd3   :  { %p7325_p10 = scmp.ne.s32.totalorder %s8606_s15, %s7324_s7  ;;  %p7328_p11 = scmp.lt.u32.totalorder %s7324_s7, %s8606_s15 }
  0xd5   :  { %p7330_p12 = pnand %p7328_p11, %p7325_p10 }
  0xd7   :  { %7333 = shalt.err (!%p7330_p12)
}
  0xd8   :  { %s7334_s24 = scalar_lea.vmem %s67_s22, 256  ;;  %p7339_p0 = scmp.lt.s32.totalorder %s67_s22, %s67_s22 }
  0xd9   :  { %p7335_p13 = scmp.ne.s32.totalorder %s67_s22, %s7334_s24  ;;  %p7340_p1 = scmp.lt.s32.totalorder %s7334_s24, %s7334_s24 }
  0xdb   :  { %p7341_p2 = por %p7340_p1, %p7339_p0 }
  0xdd   :  { %p7342_p3 = pnand %p7341_p2, %p7335_p13 }
  0xdf   :  { %7345 = shalt.err (!%p7342_p3)
}
  0xe0   :  { %72 = dma.hbm_to_vmem [thread:$0]  %s8606_s15, 256, %s67_s22, [#allocation6], %s7592_s0, %s7592_s0, %s7593_s21  }
  0xe1   :  { %s8607_s5 = sld [smem:[#allocation51_spill]] }
  0xe7   :  { %s7346_s29 = scalar_lea.hbm %s8607_s5, 16384 }
  0xe8   :  { %p7347_p4 = scmp.ne.s32.totalorder %s8607_s5, %s7346_s29  ;;  %p7350_p5 = scmp.lt.u32.totalorder %s7346_s29, %s8607_s5 }
  0xea   :  { %p7352_p6 = pnand %p7350_p5, %p7347_p4 }
  0xec   :  { %7355 = shalt.err (!%p7352_p6)
}
  0xed   :  { %s7356_s3 = scalar_lea.vmem %s7868_s1, 16384  ;;  %p7361_p8 = scmp.lt.s32.totalorder %s7868_s1, %s7868_s1 }
  0xee   :  { %p7357_p7 = scmp.ne.s32.totalorder %s7868_s1, %s7356_s3  ;;  %p7362_p9 = scmp.lt.s32.totalorder %s7356_s3, %s7356_s3 }
  0xf0   :  { %p7363_p10 = por %p7362_p9, %p7361_p8 }
  0xf2   :  { %p7364_p11 = pnand %p7363_p10, %p7357_p7 }
  0xf4   :  { %7367 = shalt.err (!%p7364_p11)
}
  0xf5   :  { %s7604_s22 = smov 1024   ;;  %s7605_s2 = smov 64  }
  0xf6   :  { %96 = dma.hbm_to_vmem [thread:$0]  %s8607_s5, 16384, %s7868_s1, [#allocation9], %s7604_s22, %s7604_s22, %s7605_s2  }
  0xf7   :  { %s7606_s7 = smov [#allocation13]   ;;  %s7368_s25 = scalar_lea.hbm %s8574_s6, 8192 }
  0xf8   :  { %s112_s30 = sshll.u32 %s7606_s7, 4  ;;  %p7369_p12 = scmp.ne.s32.totalorder %s8574_s6, %s7368_s25  ;;  %s113_s30 = int_to_ptr.vmem [resolvable:$true] %s112_s30 }
  0xf9   :  { %p7372_p13 = scmp.lt.u32.totalorder %s7368_s25, %s8574_s6 }
  0xfb   :  { %p7374_p0 = pnand %p7372_p13, %p7369_p12 }
  0xfd   :  { %7377 = shalt.err (!%p7374_p0)
}
  0xfe   :  { %s7378_s19 = scalar_lea.vmem %s113_s30, 8192  ;;  %p7383_p2 = scmp.lt.s32.totalorder %s113_s30, %s113_s30 }
  0xff   :  { %p7379_p1 = scmp.ne.s32.totalorder %s113_s30, %s7378_s19  ;;  %p7384_p3 = scmp.lt.s32.totalorder %s7378_s19, %s7378_s19 }
 0x101   :  { %p7385_p4 = por %p7384_p3, %p7383_p2 }
 0x103   :  { %p7386_p5 = pnand %p7385_p4, %p7379_p1 }
 0x105   :  { %7389 = shalt.err (!%p7386_p5)
}
 0x106   :  { %s7607_s1 = smov 512   ;;  %s7608_s5 = smov 32  }
 0x107   :  { %118 = dma.hbm_to_vmem [thread:$0]  %s8574_s6, 8192, %s113_s30, [#allocation12], %s7607_s1, %s7607_s1, %s7608_s5  }
 0x108   :  { %s7609_s17 = smov [#allocation16]   ;;  %s7610_s26 = smov [#allocation19]  }
 0x109   :  { %s134_s23 = sshll.u32 %s7609_s17, 4  ;;  %s156_s3 = sshll.u32 %s7610_s26, 4  ;;  %s135_s23 = int_to_ptr.vmem [resolvable:$true] %s134_s23  ;;  %s157_s3 = int_to_ptr.vmem [resolvable:$true] %s156_s3 }
 0x10a   :  { %s7390_s9 = scalar_lea.hbm %s8576_s8, 8192 }
 0x10b   :  { %p7391_p6 = scmp.ne.s32.totalorder %s8576_s8, %s7390_s9  ;;  %p7394_p7 = scmp.lt.u32.totalorder %s7390_s9, %s8576_s8 }
 0x10d   :  { %p7396_p8 = pnand %p7394_p7, %p7391_p6 }
 0x10f   :  { %7399 = shalt.err (!%p7396_p8)
}
 0x110   :  { %s7400_s6 = scalar_lea.vmem %s135_s23, 8192  ;;  %p7405_p10 = scmp.lt.s32.totalorder %s135_s23, %s135_s23 }
 0x111   :  { %p7401_p9 = scmp.ne.s32.totalorder %s135_s23, %s7400_s6  ;;  %p7406_p11 = scmp.lt.s32.totalorder %s7400_s6, %s7400_s6 }
 0x113   :  { %p7407_p12 = por %p7406_p11, %p7405_p10 }
 0x115   :  { %p7408_p13 = pnand %p7407_p12, %p7401_p9 }
 0x117   :  { %7411 = shalt.err (!%p7408_p13)
}
 0x118   :  { %140 = dma.hbm_to_vmem [thread:$0]  %s8576_s8, 8192, %s135_s23, [#allocation15], %s7592_s0, %s7592_s0, %s7593_s21  }
 0x119   :  { %s7412_s4 = scalar_lea.hbm %s8578_s10, 24576 }
 0x11a   :  { %p7413_p0 = scmp.ne.s32.totalorder %s8578_s10, %s7412_s4  ;;  %p7416_p1 = scmp.lt.u32.totalorder %s7412_s4, %s8578_s10 }
 0x11c   :  { %p7418_p2 = pnand %p7416_p1, %p7413_p0 }
 0x11e   :  { %7421 = shalt.err (!%p7418_p2)
}
 0x11f   :  { %s7422_s17 = scalar_lea.vmem %s157_s3, 24576  ;;  %p7427_p4 = scmp.lt.s32.totalorder %s157_s3, %s157_s3 }
 0x120   :  { %p7423_p3 = scmp.ne.s32.totalorder %s157_s3, %s7422_s17  ;;  %p7428_p5 = scmp.lt.s32.totalorder %s7422_s17, %s7422_s17 }
 0x122   :  { %p7429_p6 = por %p7428_p5, %p7427_p4 }
 0x124   :  { %p7430_p7 = pnand %p7429_p6, %p7423_p3 }
 0x126   :  { %7433 = shalt.err (!%p7430_p7)
}
 0x127   :  { %162 = dma.hbm_to_vmem [thread:$0]  %s8578_s10, 24576, %s157_s3, [#allocation18], %s7607_s1, %s7607_s1, %s7608_s5  }
 0x128   :  { %s7611_s26 = smov [#allocation22]   ;;  %s7612_s2 = smov [#allocation25]  }
 0x129   :  { %s178_s22 = sshll.u32 %s7611_s26, 4  ;;  %s200_s9 = sshll.u32 %s7612_s2, 4  ;;  %s179_s22 = int_to_ptr.vmem [resolvable:$true] %s178_s22  ;;  %s201_s9 = int_to_ptr.vmem [resolvable:$true] %s200_s9 }
 0x12a   :  { %s7434_s27 = scalar_lea.hbm %s8580_s12, 8192 }
 0x12b   :  { %p7435_p8 = scmp.ne.s32.totalorder %s8580_s12, %s7434_s27  ;;  %p7438_p9 = scmp.lt.u32.totalorder %s7434_s27, %s8580_s12 }
 0x12d   :  { %p7440_p10 = pnand %p7438_p9, %p7435_p8 }
 0x12f   :  { %7443 = shalt.err (!%p7440_p10)
}
 0x130   :  { %s7444_s10 = scalar_lea.vmem %s179_s22, 8192  ;;  %p7449_p12 = scmp.lt.s32.totalorder %s179_s22, %s179_s22 }
 0x131   :  { %p7445_p11 = scmp.ne.s32.totalorder %s179_s22, %s7444_s10  ;;  %p7450_p13 = scmp.lt.s32.totalorder %s7444_s10, %s7444_s10 }
 0x133   :  { %p7451_p0 = por %p7450_p13, %p7449_p12 }
 0x135   :  { %p7452_p1 = pnand %p7451_p0, %p7445_p11 }
 0x137   :  { %7455 = shalt.err (!%p7452_p1)
}
 0x138   :  { %184 = dma.hbm_to_vmem [thread:$0]  %s8580_s12, 8192, %s179_s22, [#allocation21], %s7592_s0, %s7592_s0, %s7593_s21  }
 0x139   :  { %s7456_s20 = scalar_lea.hbm %s8582_s14, 2048 }
 0x13a   :  { %p7457_p2 = scmp.ne.s32.totalorder %s8582_s14, %s7456_s20  ;;  %p7460_p3 = scmp.lt.u32.totalorder %s7456_s20, %s8582_s14 }
 0x13c   :  { %p7462_p4 = pnand %p7460_p3, %p7457_p2 }
 0x13e   :  { %7465 = shalt.err (!%p7462_p4)
}
 0x13f   :  { %s7466_s11 = scalar_lea.vmem %s201_s9, 2048  ;;  %p7471_p6 = scmp.lt.s32.totalorder %s201_s9, %s201_s9 }
 0x140   :  { %p7467_p5 = scmp.ne.s32.totalorder %s201_s9, %s7466_s11  ;;  %p7472_p7 = scmp.lt.s32.totalorder %s7466_s11, %s7466_s11 }
 0x142   :  { %p7473_p8 = por %p7472_p7, %p7471_p6 }
 0x144   :  { %p7474_p9 = pnand %p7473_p8, %p7467_p5 }
 0x146   :  { %7477 = shalt.err (!%p7474_p9)
}
 0x147   :  { %206 = dma.hbm_to_vmem [thread:$0]  %s8582_s14, 2048, %s201_s9, [#allocation24], %s7592_s0, %s7592_s0, %s7593_s21  }
 0x148   :  { %s7613_s8 = smov [#allocation28]   ;;  %s7614_s26 = smov [#allocation31]  }
 0x149   :  { %s222_s23 = sshll.u32 %s7613_s8, 4  ;;  %s245_s22 = sshll.u32 %s7614_s26, 4  ;;  %s223_s23 = int_to_ptr.vmem [resolvable:$true] %s222_s23  ;;  %s246_s22 = int_to_ptr.vmem [resolvable:$true] %s245_s22 }
 0x14a   :  { %s7478_s7 = scalar_lea.hbm %s8584_s16, 2048 }
 0x14b   :  { %p7479_p10 = scmp.ne.s32.totalorder %s8584_s16, %s7478_s7  ;;  %p7482_p11 = scmp.lt.u32.totalorder %s7478_s7, %s8584_s16 }
 0x14d   :  { %p7484_p12 = pnand %p7482_p11, %p7479_p10 }
 0x14f   :  { %7487 = shalt.err (!%p7484_p12)
}
 0x150   :  { %s7488_s14 = scalar_lea.vmem %s223_s23, 2048  ;;  %p7493_p0 = scmp.lt.s32.totalorder %s223_s23, %s223_s23 }
 0x151   :  { %p7489_p13 = scmp.ne.s32.totalorder %s223_s23, %s7488_s14  ;;  %p7494_p1 = scmp.lt.s32.totalorder %s7488_s14, %s7488_s14 }
 0x153   :  { %p7495_p2 = por %p7494_p1, %p7493_p0 }
 0x155   :  { %p7496_p3 = pnand %p7495_p2, %p7489_p13 }
 0x157   :  { %7499 = shalt.err (!%p7496_p3)
}
 0x158   :  { %228 = dma.hbm_to_vmem [thread:$0]  %s8584_s16, 2048, %s223_s23, [#allocation27], %s7592_s0, %s7592_s0, %s7593_s21  }
 0x159   :  { %s7500_s5 = scalar_lea.hbm %s8586_s18, 64 }
 0x15a   :  { %p7501_p4 = scmp.ne.s32.totalorder %s8586_s18, %s7500_s5  ;;  %p7504_p5 = scmp.lt.u32.totalorder %s7500_s5, %s8586_s18 }
 0x15c   :  { %p7506_p6 = pnand %p7504_p5, %p7501_p4 }
 0x15e   :  { %7509 = shalt.err (!%p7506_p6)
}
 0x15f   :  { %s7510_s13 = scalar_lea.vmem %s246_s22, 64  ;;  %p7515_p8 = scmp.lt.s32.totalorder %s246_s22, %s246_s22 }
 0x160   :  { %p7511_p7 = scmp.ne.s32.totalorder %s246_s22, %s7510_s13  ;;  %p7516_p9 = scmp.lt.s32.totalorder %s7510_s13, %s7510_s13 }
 0x162   :  { %p7517_p10 = por %p7516_p9, %p7515_p8 }
 0x164   :  { %p7518_p11 = pnand %p7517_p10, %p7511_p7 }
 0x166   :  { %7521 = shalt.err (!%p7518_p11)
}
 0x167   :  { %248 = dma.hbm_to_vmem [thread:$0]  %s8586_s18, 64, %s246_s22, [#allocation30]  }
 0x168   :  { %s7615_s29 = smov [#allocation32]   ;;  %s8608_s8 = sld [smem:[#allocation52_spill]] }
 0x169   :  { %s255_s11 = sshll.u32 %s7615_s29, 4  ;;  %s256_s11 = int_to_ptr.vmem [resolvable:$true] %s255_s11 }
 0x16e   :  { %s7522_s23 = scalar_lea.hbm %s8608_s8, 64 }
 0x16f   :  { %p7523_p12 = scmp.ne.s32.totalorder %s8608_s8, %s7522_s23  ;;  %p7526_p13 = scmp.lt.u32.totalorder %s7522_s23, %s8608_s8 }
 0x171   :  { %p7528_p0 = pnand %p7526_p13, %p7523_p12 }
 0x173   :  { %7531 = shalt.err (!%p7528_p0)
}
 0x174   :  { %s7532_s27 = scalar_lea.vmem %s256_s11, 64  ;;  %p7537_p2 = scmp.lt.s32.totalorder %s256_s11, %s256_s11 }
 0x175   :  { %p7533_p1 = scmp.ne.s32.totalorder %s256_s11, %s7532_s27  ;;  %p7538_p3 = scmp.lt.s32.totalorder %s7532_s27, %s7532_s27 }
 0x177   :  { %p7539_p4 = por %p7538_p3, %p7537_p2 }
 0x179   :  { %p7540_p5 = pnand %p7539_p4, %p7533_p1 }
 0x17b   :  { %7543 = shalt.err (!%p7540_p5)
}
 0x17c   :  { %258 = dma.hbm_to_vmem [thread:$0]  %s8608_s8, 64, %s256_s11, [#allocation33]  }
 0x17d   :  { %7566 = dma.done.wait [#allocation3], 256  }
 0x17e   :  { %7567 = vsyncadd [#allocation3], 4294967040 }
 0x17f   :  { %7568 = dma.done.wait [#allocation6], 768  }
 0x180   :  { %7569 = vsyncadd [#allocation6], 4294966528 }
 0x181   :  { %7570 = dma.done.wait [#allocation9], 16896  }
 0x182   :  { %7571 = vsyncadd [#allocation9], 4294950400 }
 0x183   :  { %7572 = dma.done.wait [#allocation12], 8320  }
 0x184   :  { %7573 = vsyncadd [#allocation12], 4294958976 }
 0x185   :  { %7574 = dma.done.wait [#allocation15], 8256  }
 0x186   :  { %7575 = vsyncadd [#allocation15], 4294959040 }
 0x187   :  { %7576 = dma.done.wait [#allocation18], 24592  }
 0x188   :  { %7577 = vsyncadd [#allocation18], 4294942704 }
 0x189   :  { %7578 = dma.done.wait [#allocation21], 8448  }
 0x18a   :  { %7579 = vsyncadd [#allocation21], 4294958848 }
 0x18b   :  { %7580 = dma.done.wait [#allocation24], 2064  }
 0x18c   :  { %7581 = vsyncadd [#allocation24], 4294965232 }
 0x18d   :  { %7582 = dma.done.wait [#allocation27], 2064  }
 0x18e   :  { %7583 = vsyncadd [#allocation27], 4294965232 }
 0x18f   :  { %7584 = dma.done.wait [#allocation30], 80  }
 0x190   :  { %7585 = vsyncadd [#allocation30], 4294967216 }
 0x191   :  { %7586 = dma.done.wait [#allocation33], 64  }
 0x192   :  { %7587 = vsyncadd [#allocation33], 4294967232  ;;  %v7616_v0 = vmov 0.0   ;;  %v332_v1 = vld [vmem:[#allocation10 + $0x8] sm:$0xff]  ;;  %v331_v3 = vld [vmem:[#allocation10] sm:$0xff]  ;;  %vm7617_vm0 = vmmov 0  }
 0x193   :  { %791 = vmatprep.mubr.f32.mxu0 %v7616_v0  ;;  %868 = vmatprep.mubr.f32.mxu1 %v7616_v0  ;;  %v340_v2 = vld [vmem:[#allocation10 + $0x48] sm:$0xff]  ;;  %v339_v5 = vld [vmem:[#allocation10 + $0x40] sm:$0xff]  ;;  %v325_v52 = vld [vmem:[#allocation7] sm:$0xff]  ;;  %vm1352_vm1 = vcmask 64512   ;;  %vm3718_vm2 = vcmask 130048   ;;  %s7619_s28 = smov [#allocation34]  }
 0x194   :  { %v6230_v4 = vpack.c.bf16 %v340_v2, %v332_v1  ;;  %v348_v6 = vld [vmem:[#allocation10 + $0x88] sm:$0xff]  ;;  %v6232_v8 = vpack.c.bf16 %v339_v5, %v331_v3  ;;  %v347_v10 = vld [vmem:[#allocation10 + $0x80] sm:$0xff]  ;;  %v326_v61 = vld [vmem:[#allocation7 + $0x8] sm:$0xff]  ;;  %s5380_s6 = sshll.u32 %s7619_s28, 4  ;;  %s5381_s6 = int_to_ptr.vmem [resolvable:$true] %s5380_s6 }
 0x195   :  { %v356_v7 = vld [vmem:[#allocation10 + $0xc8] sm:$0xff]  ;;  %v355_v11 = vld [vmem:[#allocation10 + $0xc0] sm:$0xff]  ;;  %s7544_s30 = scalar_lea.vmem %s5381_s6, 256  ;;  %p7549_p7 = scmp.lt.s32.totalorder %s5381_s6, %s5381_s6 }
 0x196   :  { %v6234_v9 = vpack.c.bf16 %v356_v7, %v348_v6  ;;  %v364_v12 = vld [vmem:[#allocation10 + $0x108] sm:$0xff]  ;;  %6231 = vmatprep.subr.bf16.mxu0 %v6230_v4  ;;  %v6236_v14 = vpack.c.bf16 %v355_v11, %v347_v10  ;;  %v363_v16 = vld [vmem:[#allocation10 + $0x100] sm:$0xff]  ;;  %p7545_p6 = scmp.ne.s32.totalorder %s5381_s6, %s7544_s30  ;;  %p7550_p8 = scmp.lt.s32.totalorder %s7544_s30, %s7544_s30 }
 0x197   :  { %v372_v13 = vld [vmem:[#allocation10 + $0x148] sm:$0xff]  ;;  %6233 = vmatpush1.bf16.msra.mxu0 %v6232_v8  ;;  %v371_v17 = vld [vmem:[#allocation10 + $0x140] sm:$0xff] }
 0x198   :  { %6235 = vmatprep.subr.bf16.mxu0 %v6234_v9  ;;  %v6238_v15 = vpack.c.bf16 %v372_v13, %v364_v12  ;;  %v380_v18 = vld [vmem:[#allocation10 + $0x188] sm:$0xff]  ;;  %v6240_v20 = vpack.c.bf16 %v371_v17, %v363_v16  ;;  %v379_v22 = vld [vmem:[#allocation10 + $0x180] sm:$0xff]  ;;  %p7551_p9 = por %p7550_p8, %p7549_p7 }
 0x199   :  { %v388_v19 = vld [vmem:[#allocation10 + $0x1c8] sm:$0xff]  ;;  %v387_v23 = vld [vmem:[#allocation10 + $0x1c0] sm:$0xff] }
 0x19a   :  { %v6242_v21 = vpack.c.bf16 %v388_v19, %v380_v18  ;;  %v396_v24 = vld [vmem:[#allocation10 + $0x208] sm:$0xff]  ;;  %v6244_v26 = vpack.c.bf16 %v387_v23, %v379_v22  ;;  %v395_v28 = vld [vmem:[#allocation10 + $0x200] sm:$0xff]  ;;  %p7552_p10 = pnand %p7551_p9, %p7545_p6 }
 0x19b   :  { %6237 = vmatpush1.bf16.msra.mxu0 %v6236_v14  ;;  %v404_v25 = vld [vmem:[#allocation10 + $0x248] sm:$0xff]  ;;  %v403_v29 = vld [vmem:[#allocation10 + $0x240] sm:$0xff] }
 0x19c   :  { %6239 = vmatprep.subr.bf16.mxu0 %v6238_v15  ;;  %v6246_v27 = vpack.c.bf16 %v404_v25, %v396_v24  ;;  %v412_v30 = vld [vmem:[#allocation10 + $0x288] sm:$0xff]  ;;  %v6248_v32 = vpack.c.bf16 %v403_v29, %v395_v28  ;;  %v411_v34 = vld [vmem:[#allocation10 + $0x280] sm:$0xff] }
 0x19d   :  { %v420_v31 = vld [vmem:[#allocation10 + $0x2c8] sm:$0xff]  ;;  %v419_v35 = vld [vmem:[#allocation10 + $0x2c0] sm:$0xff] }
 0x19e   :  { %v6250_v33 = vpack.c.bf16 %v420_v31, %v412_v30  ;;  %v428_v36 = vld [vmem:[#allocation10 + $0x308] sm:$0xff]  ;;  %v6252_v38 = vpack.c.bf16 %v419_v35, %v411_v34  ;;  %v427_v40 = vld [vmem:[#allocation10 + $0x300] sm:$0xff] }
 0x19f   :  { %6241 = vmatpush1.bf16.msra.mxu0 %v6240_v20  ;;  %v436_v37 = vld [vmem:[#allocation10 + $0x348] sm:$0xff]  ;;  %v435_v41 = vld [vmem:[#allocation10 + $0x340] sm:$0xff] }
 0x1a0   :  { %6243 = vmatprep.subr.bf16.mxu0 %v6242_v21  ;;  %v6254_v39 = vpack.c.bf16 %v436_v37, %v428_v36  ;;  %v444_v42 = vld [vmem:[#allocation10 + $0x388] sm:$0xff]  ;;  %v6256_v44 = vpack.c.bf16 %v435_v41, %v427_v40  ;;  %v443_v46 = vld [vmem:[#allocation10 + $0x380] sm:$0xff]  ;;  %v464_v40 = vld [vmem:[#allocation13 + $0x28] sm:$0xff] }
 0x1a1   :  { %v452_v43 = vld [vmem:[#allocation10 + $0x3c8] sm:$0xff]  ;;  %v451_v47 = vld [vmem:[#allocation10 + $0x3c0] sm:$0xff] }
 0x1a2   :  { %v6258_v45 = vpack.c.bf16 %v452_v43, %v444_v42  ;;  %v336_v48 = vld [vmem:[#allocation10 + $0x28] sm:$0xff]  ;;  %v6260_v50 = vpack.c.bf16 %v451_v47, %v443_v46  ;;  %v8018_v51 = vld [vmem:[#allocation2] sm:$0xff]  ;;  %v468_v46 = vld [vmem:[#allocation13 + $0x48] sm:$0xff] }
 0x1a3   :  { %6245 = vmatpush1.bf16.msra.mxu0 %v6244_v26  ;;  %v344_v49 = vld [vmem:[#allocation10 + $0x68] sm:$0xff]  ;;  %v335_v54 = vld [vmem:[#allocation10 + $0x20] sm:$0xff]  ;;  %v8021_v58 = vadd.f32 %v325_v52, %v8018_v51  ;;  %v472_v47 = vld [vmem:[#allocation13 + $0x68] sm:$0xff] }
 0x1a4   :  { %6247 = vmatprep.subr.bf16.mxu0 %v6246_v27  ;;  %v6294_v53 = vpack.c.bf16 %v344_v49, %v336_v48  ;;  %v343_v55 = vld [vmem:[#allocation10 + $0x60] sm:$0xff]  ;;  %v352_v56 = vld [vmem:[#allocation10 + $0xa8] sm:$0xff]  ;;  %v6362_v48 = vpack.c.bf16 %v472_v47, %v468_v46  ;;  %v382_v46 = vld [vmem:[#allocation10 + $0x198] sm:$0xff] }
 0x1a5   :  { %v360_v57 = vld [vmem:[#allocation10 + $0xe8] sm:$0xff]  ;;  %v6296_v59 = vpack.c.bf16 %v343_v55, %v335_v54  ;;  %v351_v63 = vld [vmem:[#allocation10 + $0xa0] sm:$0xff]  ;;  %v480_v54 = vld [vmem:[#allocation13 + $0xa8] sm:$0xff] }
 0x1a6   :  { %v8023_v60 = vld [vmem:[#allocation2 + $0x8] sm:$0xff]  ;;  %v6298_v62 = vpack.c.bf16 %v360_v57, %v352_v56  ;;  %v359_v1 = vld [vmem:[#allocation10 + $0xe0] sm:$0xff]  ;;  %v390_v47 = vld [vmem:[#allocation10 + $0x1d8] sm:$0xff] }
 0x1a7   :  { %6249 = vmatpush1.bf16.msra.mxu0 %v6248_v32  ;;  %v368_v2 = vld [vmem:[#allocation10 + $0x128] sm:$0xff]  ;;  %v8027_v4 = vadd.f32 %v326_v61, %v8023_v60  ;;  %v6300_v5 = vpack.c.bf16 %v359_v1, %v351_v63  ;;  %v367_v7 = vld [vmem:[#allocation10 + $0x120] sm:$0xff]  ;;  %v488_v61 = vld [vmem:[#allocation13 + $0xe8] sm:$0xff] }
 0x1a8   :  { %6251 = vmatprep.subr.bf16.mxu0 %v6250_v33  ;;  %v376_v3 = vld [vmem:[#allocation10 + $0x168] sm:$0xff]  ;;  %v375_v8 = vld [vmem:[#allocation10 + $0x160] sm:$0xff] }
 0x1a9   :  { %v6302_v6 = vpack.c.bf16 %v376_v3, %v368_v2  ;;  %v384_v9 = vld [vmem:[#allocation10 + $0x1a8] sm:$0xff]  ;;  %v6304_v11 = vpack.c.bf16 %v375_v8, %v367_v7  ;;  %v383_v13 = vld [vmem:[#allocation10 + $0x1a0] sm:$0xff]  ;;  %v492_v3 = vld [vmem:[#allocation13 + $0x108] sm:$0xff] }
 0x1aa   :  { %v392_v10 = vld [vmem:[#allocation10 + $0x1e8] sm:$0xff]  ;;  %v391_v14 = vld [vmem:[#allocation10 + $0x1e0] sm:$0xff] }
 0x1ab   :  { %6253 = vmatpush1.bf16.msra.mxu0 %v6252_v38  ;;  %v6306_v12 = vpack.c.bf16 %v392_v10, %v384_v9  ;;  %v400_v15 = vld [vmem:[#allocation10 + $0x228] sm:$0xff]  ;;  %v6308_v17 = vpack.c.bf16 %v391_v14, %v383_v13  ;;  %v399_v19 = vld [vmem:[#allocation10 + $0x220] sm:$0xff]  ;;  %v500_v10 = vld [vmem:[#allocation13 + $0x148] sm:$0xff] }
 0x1ac   :  { %6255 = vmatprep.subr.bf16.mxu0 %v6254_v39  ;;  %v408_v16 = vld [vmem:[#allocation10 + $0x268] sm:$0xff]  ;;  %v407_v20 = vld [vmem:[#allocation10 + $0x260] sm:$0xff]  ;;  %v460_v39 = vld [vmem:[#allocation13 + $0x8] sm:$0xff] }
 0x1ad   :  { %v6310_v18 = vpack.c.bf16 %v408_v16, %v400_v15  ;;  %v416_v21 = vld [vmem:[#allocation10 + $0x2a8] sm:$0xff]  ;;  %v6312_v23 = vpack.c.bf16 %v407_v20, %v399_v19  ;;  %v415_v25 = vld [vmem:[#allocation10 + $0x2a0] sm:$0xff]  ;;  %v6358_v42 = vpack.c.bf16 %v464_v40, %v460_v39  ;;  %v508_v16 = vld [vmem:[#allocation13 + $0x188] sm:$0xff] }
 0x1ae   :  { %v424_v22 = vld [vmem:[#allocation10 + $0x2e8] sm:$0xff]  ;;  %v423_v26 = vld [vmem:[#allocation10 + $0x2e0] sm:$0xff]  ;;  %v357_v39 = vld [vmem:[#allocation10 + $0xd0] sm:$0xff] }
 0x1af   :  { %6257 = vmatpush1.bf16.msra.mxu0 %v6256_v44  ;;  %v6314_v24 = vpack.c.bf16 %v424_v22, %v416_v21  ;;  %v432_v27 = vld [vmem:[#allocation10 + $0x328] sm:$0xff]  ;;  %v6316_v29 = vpack.c.bf16 %v423_v26, %v415_v25  ;;  %v431_v31 = vld [vmem:[#allocation10 + $0x320] sm:$0xff]  ;;  %v516_v22 = vld [vmem:[#allocation13 + $0x1c8] sm:$0xff] }
 0x1b0   :  { %6259 = vmatprep.subr.bf16.mxu0 %v6258_v45  ;;  %v440_v28 = vld [vmem:[#allocation10 + $0x368] sm:$0xff]  ;;  %v439_v32 = vld [vmem:[#allocation10 + $0x360] sm:$0xff]  ;;  %v366_v40 = vld [vmem:[#allocation10 + $0x118] sm:$0xff] }
 0x1b1   :  { %v6318_v30 = vpack.c.bf16 %v440_v28, %v432_v27  ;;  %v448_v33 = vld [vmem:[#allocation10 + $0x3a8] sm:$0xff]  ;;  %v6320_v35 = vpack.c.bf16 %v439_v32, %v431_v31  ;;  %v447_v37 = vld [vmem:[#allocation10 + $0x3a0] sm:$0xff]  ;;  %v333_v31 = vld [vmem:[#allocation10 + $0x10] sm:$0xff] }
 0x1b2   :  { %v456_v34 = vld [vmem:[#allocation10 + $0x3e8] sm:$0xff]  ;;  %v455_v38 = vld [vmem:[#allocation10 + $0x3e0] sm:$0xff] }
 0x1b3   :  { %6261 = vmatpush1.bf16.msra.mxu0 %v6260_v50  ;;  %v6322_v36 = vpack.c.bf16 %v456_v34, %v448_v33  ;;  %v6324_v41 = vpack.c.bf16 %v455_v38, %v447_v37  ;;  %v459_v43 = vld [vmem:[#allocation13] sm:$0xff]  ;;  %v341_v33 = vld [vmem:[#allocation10 + $0x50] sm:$0xff]  ;;  %v350_v34 = vld [vmem:[#allocation10 + $0x98] sm:$0xff] }
 0x1b4   :  { %6295 = vmatprep.subr.bf16.mxu0 %v6294_v53  ;;  %v463_v44 = vld [vmem:[#allocation13 + $0x20] sm:$0xff]  ;;  %v476_v53 = vld [vmem:[#allocation13 + $0x88] sm:$0xff] }
 0x1b5   :  { %v6360_v45 = vpack.c.bf16 %v463_v44, %v459_v43  ;;  %v467_v49 = vld [vmem:[#allocation13 + $0x40] sm:$0xff]  ;;  %v6366_v56 = vpack.c.bf16 %v480_v54, %v476_v53  ;;  %v349_v38 = vld [vmem:[#allocation10 + $0x90] sm:$0xff]  ;;  %v398_v53 = vld [vmem:[#allocation10 + $0x218] sm:$0xff] }
 0x1b6   :  { %792 = vmatmul.mubr.f32.vlgmr.msra.gmra.mrb[0].mxu0 %v8021_v58  ;;  %v471_v50 = vld [vmem:[#allocation13 + $0x60] sm:$0xff]  ;;  %v365_v44 = vld [vmem:[#allocation10 + $0x110] sm:$0xff]  ;;  %v406_v54 = vld [vmem:[#allocation10 + $0x258] sm:$0xff] }
 0x1b7   :  { %6297 = vmatpush1.bf16.msra.mxu0 %v6296_v59  ;;  %797 = vmatprep.mubr.f32.mxu0 %v7616_v0  ;;  %v6364_v52 = vpack.c.bf16 %v471_v50, %v467_v49  ;;  %v475_v55 = vld [vmem:[#allocation13 + $0x80] sm:$0xff]  ;;  %v484_v59 = vld [vmem:[#allocation13 + $0xc8] sm:$0xff]  ;;  %v6274_v49 = vpack.c.bf16 %v390_v47, %v382_v46  ;;  %v418_v47 = vld [vmem:[#allocation10 + $0x2b8] sm:$0xff] }
 0x1b8   :  { %6299 = vmatprep.subr.bf16.mxu0 %v6298_v62  ;;  %v479_v57 = vld [vmem:[#allocation13 + $0xa0] sm:$0xff]  ;;  %v6370_v63 = vpack.c.bf16 %v488_v61, %v484_v59  ;;  %v381_v50 = vld [vmem:[#allocation10 + $0x190] sm:$0xff]  ;;  %v414_v61 = vld [vmem:[#allocation10 + $0x298] sm:$0xff] }
 0x1b9   :  { %v6368_v62 = vpack.c.bf16 %v479_v57, %v475_v55  ;;  %v483_v1 = vld [vmem:[#allocation13 + $0xc0] sm:$0xff]  ;;  %v397_v57 = vld [vmem:[#allocation10 + $0x210] sm:$0xff] }
 0x1ba   :  { %798 = vmatmul.mubr.f32.gmra.mrb[2].mxu0 %v8027_v4  ;;  %v487_v2 = vld [vmem:[#allocation13 + $0xe0] sm:$0xff]  ;;  %v405_v59 = vld [vmem:[#allocation10 + $0x250] sm:$0xff] }
 0x1bb   :  { %6301 = vmatpush1.bf16.msra.mxu0 %v6300_v5  ;;  %945 = vmatprep.mubr.f32.mxu0 %v7616_v0  ;;  %v496_v5 = vld [vmem:[#allocation13 + $0x128] sm:$0xff]  ;;  %v491_v8 = vld [vmem:[#allocation13 + $0x100] sm:$0xff] }
 0x1bc   :  { %6303 = vmatprep.subr.bf16.mxu0 %v6302_v6  ;;  %v6372_v6 = vpack.c.bf16 %v487_v2, %v483_v1  ;;  %v6374_v7 = vpack.c.bf16 %v496_v5, %v492_v3  ;;  %v495_v9 = vld [vmem:[#allocation13 + $0x120] sm:$0xff]  ;;  %v413_v2 = vld [vmem:[#allocation10 + $0x290] sm:$0xff]  ;;  %v430_v5 = vld [vmem:[#allocation10 + $0x318] sm:$0xff] }
 0x1bd   :  { %v499_v14 = vld [vmem:[#allocation13 + $0x140] sm:$0xff]  ;;  %v421_v3 = vld [vmem:[#allocation10 + $0x2d0] sm:$0xff] }
 0x1be   :  { %v503_v15 = vld [vmem:[#allocation13 + $0x160] sm:$0xff]  ;;  %v409_v46 = vld [vmem:[#allocation10 + $0x270] sm:$0xff] }
 0x1bf   :  { %6305 = vmatpush1.bf16.msra.mxu0 %v6304_v11  ;;  %v504_v11 = vld [vmem:[#allocation13 + $0x168] sm:$0xff]  ;;  %v507_v20 = vld [vmem:[#allocation13 + $0x180] sm:$0xff] }
 0x1c0   :  { %6307 = vmatprep.subr.bf16.mxu0 %v6306_v12  ;;  %v6376_v12 = vpack.c.bf16 %v495_v9, %v491_v8  ;;  %v6378_v13 = vpack.c.bf16 %v504_v11, %v500_v10  ;;  %v511_v21 = vld [vmem:[#allocation13 + $0x1a0] sm:$0xff]  ;;  %v429_v9 = vld [vmem:[#allocation10 + $0x310] sm:$0xff]  ;;  %v446_v11 = vld [vmem:[#allocation10 + $0x398] sm:$0xff] }
 0x1c1   :  { %v515_v26 = vld [vmem:[#allocation13 + $0x1c0] sm:$0xff]  ;;  %v437_v10 = vld [vmem:[#allocation10 + $0x350] sm:$0xff] }
 0x1c2   :  { %v519_v27 = vld [vmem:[#allocation13 + $0x1e0] sm:$0xff] }
 0x1c3   :  { %6309 = vmatpush1.bf16.msra.mxu0 %v6308_v17  ;;  %v512_v17 = vld [vmem:[#allocation13 + $0x1a8] sm:$0xff]  ;;  %v6388_v28 = vpack.c.bf16 %v519_v27, %v515_v26 }
 0x1c4   :  { %6311 = vmatprep.subr.bf16.mxu0 %v6310_v18  ;;  %v6380_v18 = vpack.c.bf16 %v503_v15, %v499_v14  ;;  %v6382_v19 = vpack.c.bf16 %v512_v17, %v508_v16  ;;  %v445_v15 = vld [vmem:[#allocation10 + $0x390] sm:$0xff]  ;;  %v338_v17 = vld [vmem:[#allocation10 + $0x38] sm:$0xff] }
 0x1c5   :  { %v453_v16 = vld [vmem:[#allocation10 + $0x3d0] sm:$0xff] }
 0x1c6   :  { %v353_v27 = vld [vmem:[#allocation10 + $0xb0] sm:$0xff] }
 0x1c7   :  { %6313 = vmatpush1.bf16.msra.mxu0 %v6312_v23  ;;  %v520_v23 = vld [vmem:[#allocation13 + $0x1e8] sm:$0xff] }
 0x1c8   :  { %6315 = vmatprep.subr.bf16.mxu0 %v6314_v24  ;;  %v6384_v24 = vpack.c.bf16 %v511_v21, %v507_v20  ;;  %v6386_v25 = vpack.c.bf16 %v520_v23, %v516_v22  ;;  %v337_v21 = vld [vmem:[#allocation10 + $0x30] sm:$0xff]  ;;  %v354_v23 = vld [vmem:[#allocation10 + $0xb8] sm:$0xff] }
 0x1c9   :  { %v345_v22 = vld [vmem:[#allocation10 + $0x70] sm:$0xff] }
 0x1cb   :  { %6317 = vmatpush1.bf16.msra.mxu0 %v6316_v29  ;;  %v334_v29 = vld [vmem:[#allocation10 + $0x18] sm:$0xff] }
 0x1cc   :  { %6319 = vmatprep.subr.bf16.mxu0 %v6318_v30  ;;  %v342_v30 = vld [vmem:[#allocation10 + $0x58] sm:$0xff] }
 0x1cd   :  { %v6262_v32 = vpack.c.bf16 %v342_v30, %v334_v29  ;;  %v370_v29 = vld [vmem:[#allocation10 + $0x138] sm:$0xff] }
 0x1ce   :  { %v378_v30 = vld [vmem:[#allocation10 + $0x178] sm:$0xff] }
 0x1cf   :  { %6321 = vmatpush1.bf16.msra.mxu0 %v6320_v35  ;;  %v358_v35 = vld [vmem:[#allocation10 + $0xd8] sm:$0xff]  ;;  %6263 = vmatprep.subr.bf16.mxu1 %v6262_v32  ;;  %v6334_v32 = vpack.c.bf16 %v378_v30, %v370_v29  ;;  %v494_v30 = vld [vmem:[#allocation13 + $0x118] sm:$0xff] }
 0x1d0   :  { %6323 = vmatprep.subr.bf16.mxu0 %v6322_v36  ;;  %v6264_v36 = vpack.c.bf16 %v341_v33, %v333_v31  ;;  %v6266_v37 = vpack.c.bf16 %v358_v35, %v350_v34  ;;  %v369_v33 = vld [vmem:[#allocation10 + $0x130] sm:$0xff]  ;;  %v386_v35 = vld [vmem:[#allocation10 + $0x1b8] sm:$0xff] }
 0x1d1   :  { %v377_v34 = vld [vmem:[#allocation10 + $0x170] sm:$0xff]  ;;  %v489_v29 = vld [vmem:[#allocation13 + $0xf0] sm:$0xff] }
 0x1d2   :  { %6265 = vmatpush1.bf16.msra.mxu1 %v6264_v36  ;;  %v394_v36 = vld [vmem:[#allocation10 + $0x1f8] sm:$0xff] }
 0x1d3   :  { %6325 = vmatpush1.bf16.msra.mxu0 %v6324_v41  ;;  %v374_v41 = vld [vmem:[#allocation10 + $0x158] sm:$0xff]  ;;  %6267 = vmatprep.subr.bf16.mxu1 %v6266_v37  ;;  %v6336_v37 = vpack.c.bf16 %v377_v34, %v369_v33 }
 0x1d4   :  { %6359 = vmatprep.subr.bf16.mxu0 %v6358_v42  ;;  %v6268_v42 = vpack.c.bf16 %v357_v39, %v349_v38  ;;  %v6270_v43 = vpack.c.bf16 %v374_v41, %v366_v40  ;;  %v6338_v38 = vpack.c.bf16 %v394_v36, %v386_v35  ;;  %v385_v39 = vld [vmem:[#allocation10 + $0x1b0] sm:$0xff]  ;;  %v402_v41 = vld [vmem:[#allocation10 + $0x238] sm:$0xff] }
 0x1d5   :  { %v393_v40 = vld [vmem:[#allocation10 + $0x1f0] sm:$0xff]  ;;  %v493_v35 = vld [vmem:[#allocation13 + $0x110] sm:$0xff] }
 0x1d6   :  { %946 = vmatmul.mubr.f32.vlgmr.msra.gmra.mrb[4].mxu0 %v8021_v58  ;;  %6269 = vmatpush1.bf16.msra.mxu1 %v6268_v42  ;;  %v410_v42 = vld [vmem:[#allocation10 + $0x278] sm:$0xff] }
 0x1d7   :  { %951 = vmatprep.mubr.f32.mxu0 %v7616_v0  ;;  %6361 = vmatpush1.bf16.msra.mxu0 %v6360_v45  ;;  %v373_v45 = vld [vmem:[#allocation10 + $0x150] sm:$0xff]  ;;  %v497_v36 = vld [vmem:[#allocation13 + $0x130] sm:$0xff] }
 0x1d8   :  { %6363 = vmatprep.subr.bf16.mxu0 %v6362_v48  ;;  %v6272_v48 = vpack.c.bf16 %v373_v45, %v365_v44  ;;  %6271 = vmatprep.subr.bf16.mxu1 %v6270_v43  ;;  %v6340_v43 = vpack.c.bf16 %v393_v40, %v385_v39  ;;  %v6342_v44 = vpack.c.bf16 %v410_v42, %v402_v41  ;;  %v401_v45 = vld [vmem:[#allocation10 + $0x230] sm:$0xff]  ;;  %v8055_v40 = vld [vmem:[#allocation11] sm:$0xff]  ;;  %v501_v42 = vld [vmem:[#allocation13 + $0x150] sm:$0xff] }
 0x1d9   :  { %v6408_v39 = vpack.c.bf16 %v497_v36, %v493_v35 }
 0x1da   :  { %952 = vmatmul.mubr.f32.gmra.mrb[6].mxu0 %v8027_v4  ;;  %6273 = vmatpush1.bf16.msra.mxu1 %v6272_v48  ;;  %v426_v48 = vld [vmem:[#allocation10 + $0x2f8] sm:$0xff] }
 0x1db   :  { %1121 = vmatprep.mubr.f32.mxu0 %v7616_v0  ;;  %6365 = vmatpush1.bf16.msra.mxu0 %v6364_v52  ;;  %v389_v52 = vld [vmem:[#allocation10 + $0x1d0] sm:$0xff] }
 0x1dc   :  { %6367 = vmatprep.subr.bf16.mxu0 %v6366_v56  ;;  %v6276_v55 = vpack.c.bf16 %v389_v52, %v381_v50  ;;  %6275 = vmatprep.subr.bf16.mxu1 %v6274_v49  ;;  %v6278_v56 = vpack.c.bf16 %v406_v54, %v398_v53  ;;  %v6344_v49 = vpack.c.bf16 %v409_v46, %v401_v45  ;;  %v417_v52 = vld [vmem:[#allocation10 + $0x2b0] sm:$0xff]  ;;  %v434_v54 = vld [vmem:[#allocation10 + $0x338] sm:$0xff]  ;;  %v514_v45 = vld [vmem:[#allocation13 + $0x1b8] sm:$0xff] }
 0x1dd   :  { %v6346_v50 = vpack.c.bf16 %v426_v48, %v418_v47  ;;  %v425_v53 = vld [vmem:[#allocation10 + $0x2f0] sm:$0xff] }
 0x1de   :  { %6277 = vmatpush1.bf16.msra.mxu1 %v6276_v55  ;;  %v442_v55 = vld [vmem:[#allocation10 + $0x378] sm:$0xff] }
 0x1df   :  { %6369 = vmatpush1.bf16.msra.mxu0 %v6368_v62  ;;  %v422_v62 = vld [vmem:[#allocation10 + $0x2d8] sm:$0xff]  ;;  %6279 = vmatprep.subr.bf16.mxu1 %v6278_v56  ;;  %v6348_v56 = vpack.c.bf16 %v425_v53, %v417_v52  ;;  %v518_v53 = vld [vmem:[#allocation13 + $0x1d8] sm:$0xff] }
 0x1e0   :  { %6371 = vmatprep.subr.bf16.mxu0 %v6370_v63  ;;  %v6280_v63 = vpack.c.bf16 %v405_v59, %v397_v57  ;;  %v6282_v1 = vpack.c.bf16 %v422_v62, %v414_v61  ;;  %v6350_v57 = vpack.c.bf16 %v442_v55, %v434_v54  ;;  %v433_v59 = vld [vmem:[#allocation10 + $0x330] sm:$0xff]  ;;  %v450_v62 = vld [vmem:[#allocation10 + $0x3b8] sm:$0xff]  ;;  %v522_v54 = vld [vmem:[#allocation13 + $0x1f8] sm:$0xff] }
 0x1e1   :  { %v441_v61 = vld [vmem:[#allocation10 + $0x370] sm:$0xff] }
 0x1e2   :  { %6281 = vmatpush1.bf16.msra.mxu1 %v6280_v63  ;;  %v458_v63 = vld [vmem:[#allocation10 + $0x3f8] sm:$0xff] }
 0x1e3   :  { %6373 = vmatpush1.bf16.msra.mxu0 %v6372_v6  ;;  %v438_v6 = vld [vmem:[#allocation10 + $0x358] sm:$0xff]  ;;  %6283 = vmatprep.subr.bf16.mxu1 %v6282_v1  ;;  %v6352_v1 = vpack.c.bf16 %v441_v61, %v433_v59  ;;  %v6418_v59 = vpack.c.bf16 %v522_v54, %v518_v53 }
 0x1e4   :  { %6375 = vmatprep.subr.bf16.mxu0 %v6374_v7  ;;  %v6284_v7 = vpack.c.bf16 %v421_v3, %v413_v2  ;;  %v6286_v8 = vpack.c.bf16 %v438_v6, %v430_v5  ;;  %v6354_v2 = vpack.c.bf16 %v458_v63, %v450_v62  ;;  %v449_v3 = vld [vmem:[#allocation10 + $0x3b0] sm:$0xff]  ;;  %v462_v6 = vld [vmem:[#allocation13 + $0x18] sm:$0xff]  ;;  %v517_v61 = vld [vmem:[#allocation13 + $0x1d0] sm:$0xff] }
 0x1e5   :  { %v457_v5 = vld [vmem:[#allocation10 + $0x3f0] sm:$0xff]  ;;  %v521_v62 = vld [vmem:[#allocation13 + $0x1f0] sm:$0xff] }
 0x1e6   :  { %6285 = vmatpush1.bf16.msra.mxu1 %v6284_v7  ;;  %v466_v7 = vld [vmem:[#allocation13 + $0x38] sm:$0xff] }
 0x1e7   :  { %6377 = vmatpush1.bf16.msra.mxu0 %v6376_v12  ;;  %v454_v12 = vld [vmem:[#allocation10 + $0x3d8] sm:$0xff]  ;;  %6287 = vmatprep.subr.bf16.mxu1 %v6286_v8  ;;  %v6356_v8 = vpack.c.bf16 %v457_v5, %v449_v3 }
 0x1e8   :  { %6379 = vmatprep.subr.bf16.mxu0 %v6378_v13  ;;  %v6288_v13 = vpack.c.bf16 %v437_v10, %v429_v9  ;;  %v6290_v14 = vpack.c.bf16 %v454_v12, %v446_v11  ;;  %v6390_v9 = vpack.c.bf16 %v466_v7, %v462_v6  ;;  %v461_v10 = vld [vmem:[#allocation13 + $0x10] sm:$0xff]  ;;  %v470_v12 = vld [vmem:[#allocation13 + $0x58] sm:$0xff] }
 0x1e9   :  { %v465_v11 = vld [vmem:[#allocation13 + $0x30] sm:$0xff] }
 0x1ea   :  { %6289 = vmatpush1.bf16.msra.mxu1 %v6288_v13  ;;  %v474_v13 = vld [vmem:[#allocation13 + $0x78] sm:$0xff] }
 0x1eb   :  { %6381 = vmatpush1.bf16.msra.mxu0 %v6380_v18  ;;  %v346_v18 = vld [vmem:[#allocation10 + $0x78] sm:$0xff]  ;;  %6291 = vmatprep.subr.bf16.mxu1 %v6290_v14  ;;  %v6392_v14 = vpack.c.bf16 %v465_v11, %v461_v10 }
 0x1ec   :  { %6383 = vmatprep.subr.bf16.mxu0 %v6382_v19  ;;  %v6292_v19 = vpack.c.bf16 %v453_v16, %v445_v15  ;;  %v6326_v20 = vpack.c.bf16 %v346_v18, %v338_v17  ;;  %v6394_v15 = vpack.c.bf16 %v474_v13, %v470_v12  ;;  %v469_v16 = vld [vmem:[#allocation13 + $0x50] sm:$0xff]  ;;  %v478_v18 = vld [vmem:[#allocation13 + $0x98] sm:$0xff] }
 0x1ed   :  { %v473_v17 = vld [vmem:[#allocation13 + $0x70] sm:$0xff] }
 0x1ee   :  { %6293 = vmatpush1.bf16.msra.mxu1 %v6292_v19  ;;  %v482_v19 = vld [vmem:[#allocation13 + $0xb8] sm:$0xff] }
 0x1ef   :  { %6385 = vmatpush1.bf16.msra.mxu0 %v6384_v24  ;;  %v362_v24 = vld [vmem:[#allocation10 + $0xf8] sm:$0xff]  ;;  %6327 = vmatprep.subr.bf16.mxu1 %v6326_v20  ;;  %v6396_v20 = vpack.c.bf16 %v473_v17, %v469_v16  ;;  %v8089_v17 = vld [vmem:[#allocation14] sm:$0xf] }
 0x1f0   :  { %6387 = vmatprep.subr.bf16.mxu0 %v6386_v25  ;;  %v6328_v25 = vpack.c.bf16 %v345_v22, %v337_v21  ;;  %v6330_v26 = vpack.c.bf16 %v362_v24, %v354_v23  ;;  %v6398_v21 = vpack.c.bf16 %v482_v19, %v478_v18  ;;  %v477_v22 = vld [vmem:[#allocation13 + $0x90] sm:$0xff]  ;;  %v486_v24 = vld [vmem:[#allocation13 + $0xd8] sm:$0xff] }
 0x1f1   :  { %869 = vmatmul.mubr.f32.vlgmr.msra.gmra.mrb[0].mxu1 %v8021_v58  ;;  %v481_v23 = vld [vmem:[#allocation13 + $0xb0] sm:$0xff] }
 0x1f2   :  { %6329 = vmatpush1.bf16.msra.mxu1 %v6328_v25  ;;  %874 = vmatprep.mubr.f32.mxu1 %v7616_v0  ;;  %v490_v25 = vld [vmem:[#allocation13 + $0xf8] sm:$0xff] }
 0x1f3   :  { %6389 = vmatpush1.bf16.msra.mxu0 %v6388_v28  ;;  %v361_v28 = vld [vmem:[#allocation10 + $0xf0] sm:$0xff]  ;;  %6331 = vmatprep.subr.bf16.mxu1 %v6330_v26  ;;  %v687_v26 = vlaneseq }
 0x1f4   :  { %5688 = vmatprep.subr.mxu0 %v7616_v0  ;;  %v6332_v31 = vpack.c.bf16 %v361_v28, %v353_v27  ;;  %v6400_v27 = vpack.c.bf16 %v481_v23, %v477_v22  ;;  %v6402_v28 = vpack.c.bf16 %v490_v25, %v486_v24 }
 0x1f5   :  { %875 = vmatmul.mubr.f32.gmra.mrb[2].mxu1 %v8027_v4 }
 0x1f6   :  { %1122 = vmatmul.mubr.f32.vlgmr.msra.gmra.mrb[8].mxu0 %v8018_v51  ;;  %6333 = vmatpush1.bf16.msra.mxu1 %v6332_v31  ;;  %v498_v31 = vld [vmem:[#allocation13 + $0x138] sm:$0xff] }
 0x1f7   :  { %1127 = vmatprep.mubr.f32.mxu0 %v7616_v0  ;;  %1022 = vmatprep.mubr.f32.mxu1 %v7616_v0  ;;  %v6406_v34 = vpack.c.bf16 %v498_v31, %v494_v30 }
 0x1f8   :  { %6335 = vmatprep.subr.bf16.mxu1 %v6334_v32  ;;  %v8050_v32 = vshrl.u32 %v687_v26, 7 }
 0x1fa   :  { %1128 = vmatmul.mubr.f32.gmra.mrb[10].mxu0 %v8023_v60  ;;  %6337 = vmatpush1.bf16.msra.mxu1 %v6336_v37  ;;  %v506_v37 = vld [vmem:[#allocation13 + $0x178] sm:$0xff]  ;;  %v705_v3 = vsub.s32 4, %v8050_v32  ;;  %v709_v5 = vsub.s32 5, %v8050_v32  ;;  %v8075_v6 = vsub.s32 0, %v8050_v32 }
 0x1fb   :  { %5690 = vmatprep.mubr.msk.f32.mxu0 %vm7617_vm0, %v7616_v0  ;;  %6339 = vmatprep.subr.bf16.mxu1 %v6338_v38  ;;  %v8053_v38 = vsub.s32 1, %v8050_v32 }
 0x1fc   :  { %v706_v7 = vrot.slane %v8055_v40, %v705_v3  ;;  %v1040_v18 = vrot.slane %v8089_v17, %v8075_v6 }
 0x1fd   :  { %v8059_v46 = vrot.slane %v8055_v40, %v8053_v38  ;;  %v1044_v19 = vrot.slane %v8089_v17, %v8053_v38 }
 0x1fe   :  { %6341 = vmatpush1.bf16.msra.mxu1 %v6340_v43  ;;  %v505_v43 = vld [vmem:[#allocation13 + $0x170] sm:$0xff] }
 0x1ff   :  { %6343 = vmatprep.subr.bf16.mxu1 %v6342_v44  ;;  %v510_v44 = vld [vmem:[#allocation13 + $0x198] sm:$0xff]  ;;  %v6412_v47 = vpack.c.bf16 %v505_v43, %v501_v42 }
 0x200   :  { %v6414_v48 = vpack.c.bf16 %v514_v45, %v510_v44 }
 0x202   :  { %6345 = vmatpush1.bf16.msra.mxu1 %v6344_v49  ;;  %v509_v49 = vld [vmem:[#allocation13 + $0x190] sm:$0xff] }
 0x203   :  { %6347 = vmatprep.subr.bf16.mxu1 %v6346_v50  ;;  %v513_v50 = vld [vmem:[#allocation13 + $0x1b0] sm:$0xff] }
 0x206   :  { %6349 = vmatpush1.bf16.msra.mxu1 %v6348_v56 }
 0x207   :  { %6351 = vmatprep.subr.bf16.mxu1 %v6350_v57  ;;  %v6416_v57 = vpack.c.bf16 %v513_v50, %v509_v49 }
 0x20a   :  { %6353 = vmatpush1.bf16.msra.mxu1 %v6352_v1 }
 0x20b   :  { %6355 = vmatprep.subr.bf16.mxu1 %v6354_v2  ;;  %v6420_v2 = vpack.c.bf16 %v521_v62, %v517_v61  ;;  %v8121_v61 = vsub.s32 2, %v8050_v32 }
 0x20e   :  { %6357 = vmatpush1.bf16.msra.mxu1 %v6356_v8  ;;  %v710_v8 = vrot.slane %v8055_v40, %v709_v5 }
 0x20f   :  { %6391 = vmatprep.subr.bf16.mxu1 %v6390_v9 }
 0x211   :  { %1023 = vmatmul.mubr.f32.vlgmr.msra.gmra.mrb[4].mxu1 %v8021_v58  ;;  %v485_v58 = vld [vmem:[#allocation13 + $0xd0] sm:$0xff] }
 0x212   :  { %6393 = vmatpush1.bf16.msra.mxu1 %v6392_v14  ;;  %1028 = vmatprep.mubr.f32.mxu1 %v7616_v0  ;;  %v6404_v33 = vpack.c.bf16 %v489_v29, %v485_v58 }
 0x213   :  { %6395 = vmatprep.subr.bf16.mxu1 %v6394_v15 }
 0x215   :  { %1029 = vmatmul.mubr.f32.gmra.mrb[6].mxu1 %v8027_v4  ;;  %v502_v4 = vld [vmem:[#allocation13 + $0x158] sm:$0xff] }
 0x216   :  { %6397 = vmatpush1.bf16.msra.mxu1 %v6396_v20  ;;  %1198 = vmatprep.mubr.f32.mxu1 %v7616_v0  ;;  %v6410_v41 = vpack.c.bf16 %v506_v37, %v502_v4 }
 0x217   :  { %6399 = vmatprep.subr.bf16.mxu1 %v6398_v21 }
 0x21a   :  { %6401 = vmatpush1.bf16.msra.mxu1 %v6400_v27 }
 0x21b   :  { %6403 = vmatprep.subr.bf16.mxu1 %v6402_v28 }
 0x21e   :  { %6405 = vmatpush1.bf16.msra.mxu1 %v6404_v33 }
 0x21f   :  { %6407 = vmatprep.subr.bf16.mxu1 %v6406_v34 }
 0x222   :  { %6409 = vmatpush1.bf16.msra.mxu1 %v6408_v39 }
 0x223   :  { %6411 = vmatprep.subr.bf16.mxu1 %v6410_v41 }
 0x226   :  { %6413 = vmatpush1.bf16.msra.mxu1 %v6412_v47 }
 0x227   :  { %6415 = vmatprep.subr.bf16.mxu1 %v6414_v48 }
 0x22a   :  { %6417 = vmatpush1.bf16.msra.mxu1 %v6416_v57 }
 0x22b   :  { %6419 = vmatprep.subr.bf16.mxu1 %v6418_v59 }
 0x22e   :  { %6421 = vmatpush1.bf16.msra.mxu1 %v6420_v2  ;;  %v1048_v2 = vrot.slane %v8089_v17, %v8121_v61 }
 0x22f   :  { %5703 = vmatprep.subr.mxu1 %v7616_v0 }
 0x231   :  { %1199 = vmatmul.mubr.f32.vlgmr.msra.gmra.mrb[8].mxu1 %v8018_v51  ;;  %v690_v51 = vrot.slane %v8055_v40, %v8075_v6 }
 0x232   :  { %1204 = vmatprep.mubr.f32.mxu1 %v7616_v0 }
 0x235   :  { %1205 = vmatmul.mubr.f32.gmra.mrb[10].mxu1 %v8023_v60 }
 0x236   :  { %5705 = vmatprep.mubr.msk.f32.mxu1 %vm7617_vm0, %v7616_v0 }
 0x289   :  { %v793_v52 = vpop.f32.mrb[0].mxu0 }
 0x28a   :  { %v795_v55 = vpop.f32.mrb[1].mxu0  ;;  %v794_v12 = vadd.f32 %v793_v52, %v690_v51 }
 0x28b   :  { %v8062_v56 = vadd.f32 %v795_v55, %v8059_v46 }
 0x28d   :  { %v799_v63 = vpop.f32.mrb[2].mxu0 }
 0x28e   :  { %v8064_v1 = vpop.f32.mrb[3].mxu0  ;;  %v800_v16 = vadd.f32 %v799_v63, %v690_v51  ;;  %v8126_v63 = vsub.s32 3, %v8050_v32 }
 0x28f   :  { %v802_v49 = vadd.f32 %v8064_v1, %v8059_v46 }
 0x290   :  { %v8134_v5 = vrot.slane %v8089_v17, %v8126_v63 }
 0x2a9   :  { %v947_v9 = vpop.f32.mrb[4].mxu0 }
 0x2aa   :  { %v948_v10 = vadd.f32 %v947_v9, %v706_v7  ;;  %v949_v60 = vpop.f32.mrb[5].mxu0 }
 0x2ab   :  { %v8081_v11 = vadd.f32 %v949_v60, %v710_v8 }
 0x2ac   :  { %5689 = vmatpush3.xpose.msra.mxu0 %v948_v10 }
 0x2ad   :  { %v953_v13 = vpop.f32.mrb[6].mxu0  ;;  %5693 = vmatprep.subr.mxu0 %v7616_v0 }
 0x2ae   :  { %v954_v14 = vadd.f32 %v953_v13, %v706_v7  ;;  %v955_v15 = vpop.f32.mrb[7].mxu0 }
 0x2af   :  { %5691 = vmatmul.mubr.f32.vlgmr.msra.gmra.mrb[12].mxu0 %v794_v12  ;;  %v956_v48 = vadd.f32 %v955_v15, %v710_v8 }
 0x2b0   :  { %5694 = vmatpush3.xpose.msra.mxu0 %v954_v14  ;;  %5695 = vmatprep.mubr.msk.f32.mxu0 %vm7617_vm0, %v7616_v0 }
 0x2b1   :  { %5698 = vmatprep.subr.mxu0 %v7616_v0 }
 0x2b3   :  { %5696 = vmatmul.mubr.f32.vlgmr.msra.gmra.mrb[14].mxu0 %v800_v16 }
 0x2b4   :  { %5700 = vmatprep.mubr.msk.f32.mxu0 %vm7617_vm0, %v7616_v0 }
 0x2c4   :  { %v8102_v37 = vpop.f32.mrb[0].mxu1 }
 0x2c5   :  { %v8104_v39 = vpop.f32.mrb[1].mxu1 }
 0x2c8   :  { %v876_v54 = vpop.f32.mrb[2].mxu1 }
 0x2c9   :  { %v1123_v20 = vpop.f32.mrb[8].mxu0  ;;  %v8116_v55 = vpop.f32.mrb[3].mxu1 }
 0x2ca   :  { %v1124_v21 = vadd.f32 %v1123_v20, %v1040_v18  ;;  %v1125_v22 = vpop.f32.mrb[9].mxu0 }
 0x2cb   :  { %v8095_v23 = vadd.f32 %v1125_v22, %v1044_v19 }
 0x2cc   :  { %5699 = vmatpush3.msra.mxu0 %v1124_v21 }
 0x2cd   :  { %v1129_v24 = vpop.f32.mrb[10].mxu0  ;;  %5708 = vmatprep.subr.mxu0 %v7616_v0 }
 0x2ce   :  { %v1130_v25 = vadd.f32 %v1129_v24, %v1040_v18  ;;  %v1131_v26 = vpop.f32.mrb[11].mxu0 }
 0x2cf   :  { %v1132_v50 = vadd.f32 %v1131_v26, %v1044_v19  ;;  %v713_v26 = vsub.s32 6, %v8050_v32 }
 0x2d0   :  { %5704 = vmatpush3.msra.mxu1 %v1130_v25 }
 0x2d1   :  { %5713 = vmatprep.subr.mxu1 %v7616_v0 }
 0x2e4   :  { %v1024_v57 = vpop.f32.mrb[4].mxu1 }
 0x2e5   :  { %v8118_v59 = vpop.f32.mrb[5].mxu1 }
 0x2e8   :  { %v1030_v46 = vpop.f32.mrb[6].mxu1 }
 0x2e9   :  { %v8123_v62 = vpop.f32.mrb[7].mxu1 }
 0x304   :  { %v1200_v1 = vpop.f32.mrb[8].mxu1 }
 0x305   :  { %v8130_v3 = vpop.f32.mrb[9].mxu1 }
 0x308   :  { %v1206_v7 = vpop.f32.mrb[10].mxu1 }
 0x309   :  { %v8136_v8 = vadd.f32 %v1206_v7, %v1048_v2  ;;  %v1208_v51 = vpop.f32.mrb[11].mxu1 }
 0x30a   :  { %v8139_v9 = vadd.f32 %v1208_v51, %v8134_v5 }
 0x382   :  { %v1278_v27 = vpop.f32.mrb[12].mxu0 }
 0x383   :  { %v5692_v28 = vpop.f32.mrb[13].mxu0  ;;  %v1353_v4 = vsel %vm1352_vm1, %v1278_v27, -inf }
 0x386   :  { %v1348_v58 = vpop.f32.mrb[14].mxu0 }
 0x387   :  { %v5697_v29 = vpop.f32.mrb[15].mxu0  ;;  %v1356_v30 = vsel %vm1352_vm1, %v1348_v58, -inf }
 0x388   :  { %1357 = vmax.xlane.f32.xlu0 %v1356_v30 }
 0x415   :  { %v1358_v31 = vpop.xlane.xlu0 %1357 }
 0x416   :  { %v1360_v33 = vsub.f32 %v1348_v58, %v1358_v31  ;;  %v698_v58 = vrot.slane %v8055_v40, %v8121_v61 }
 0x418   :  { %v1363_v34 = vmul.f32 1.442695, %v1360_v33  ;;  %v871_v31 = vadd.f32 %v8102_v37, %v698_v58 }
 0x41a   :  { %7024 = vpow2.f32 %v1363_v34  ;;  %v877_v34 = vadd.f32 %v876_v54, %v698_v58  ;;  %v543_v58 = vld [vmem:[#allocation16 + $0xa0] sm:$0xff] }
 0x424   :  { %v7025_v35 = vpop.eup %7024 }
 0x425   :  { %v1368_v36 = vsel %vm1352_vm1, %v7025_v35, 0.0 }
 0x426   :  { %1369 = vadd.xlane.f32.xlu0 %v1368_v36 }
 0x42a   :  { %1354 = vmax.xlane.f32.xlu0 %v1353_v4 }
 0x4b3   :  { %v1370_v41 = vpop.xlane.xlu0 %1369 }
 0x4b4   :  { %7026 = vrcp.f32 %v1370_v41 }
 0x4b7   :  { %v1355_v42 = vpop.xlane.xlu0 %1354 }
 0x4b8   :  { %v1359_v43 = vsub.f32 %v1278_v27, %v1355_v42  ;;  %v714_v27 = vrot.slane %v8055_v40, %v713_v26 }
 0x4ba   :  { %v1361_v44 = vmul.f32 1.442695, %v1359_v43  ;;  %v1025_v30 = vadd.f32 %v1024_v57, %v714_v27  ;;  %v1031_v33 = vadd.f32 %v1030_v46, %v714_v27 }
 0x4bc   :  { %7028 = vpow2.f32 %v1361_v44 }
 0x4be   :  { %v7027_v45 = vpop.eup %7026 }
 0x4bf   :  { %v1374_v47 = vmul.f32 %v7027_v45, %v7025_v35  ;;  %v1201_v35 = vadd.f32 %v1200_v1, %v1048_v2 }
 0x4c1   :  { %5706 = vmatmul.mubr.msk.f32.vlgmr.msra.gmra.mrb[12].mxu1 %vm1352_vm1, %v1374_v47 }
 0x4c2   :  { %5714 = vmatpush3.xpose.msra.mxu1 %v956_v48  ;;  %5715 = vmatprep.mubr.msk.f32.mxu1 %vm7617_vm0, %v7616_v0 }
 0x4c3   :  { %5723 = vmatprep.subr.mxu1 %v7616_v0 }
 0x4c5   :  { %5716 = vmatmul.mubr.f32.vlgmr.msra.gmra.mrb[14].mxu1 %v802_v49 }
 0x4c6   :  { %v7029_v52 = vpop.eup %7028  ;;  %5724 = vmatpush3.msra.mxu1 %v1132_v50  ;;  %5725 = vmatprep.mubr.msk.f32.mxu1 %vm7617_vm0, %v7616_v0 }
 0x4c7   :  { %v1365_v53 = vsel %vm1352_vm1, %v7029_v52, 0.0  ;;  %5798 = vmatprep.subr.mxu1 %v7616_v0 }
 0x4c8   :  { %1366 = vadd.xlane.f32.xlu0 %v1365_v53 }
 0x555   :  { %v1367_v10 = vpop.xlane.xlu0 %1366 }
 0x556   :  { %7030 = vrcp.f32 %v1367_v10 }
 0x560   :  { %v7031_v60 = vpop.eup %7030 }
 0x561   :  { %v1372_v12 = vmul.f32 %v7031_v60, %v7029_v52 }
 0x563   :  { %5701 = vmatmul.mubr.msk.f32.vlgmr.msra.gmra.mrb[16].mxu0 %vm1352_vm1, %v1372_v12 }
 0x564   :  { %5709 = vmatpush3.xpose.msra.mxu0 %v8081_v11  ;;  %5710 = vmatprep.mubr.msk.f32.mxu0 %vm7617_vm0, %v7616_v0 }
 0x565   :  { %5718 = vmatprep.subr.mxu0 %v7616_v0 }
 0x567   :  { %5711 = vmatmul.mubr.f32.vlgmr.msra.gmra.mrb[18].mxu0 %v8062_v56 }
 0x568   :  { %5719 = vmatpush3.msra.mxu0 %v8095_v23  ;;  %5720 = vmatprep.mubr.msk.f32.mxu0 %vm7617_vm0, %v7616_v0 }
 0x594   :  { %v8150_v13 = vpop.f32.mrb[12].mxu1 }
 0x595   :  { %v5707_v14 = vpop.f32.mrb[13].mxu1 }
 0x598   :  { %v1657_v15 = vpop.f32.mrb[14].mxu1 }
 0x599   :  { %v5717_v16 = vpop.f32.mrb[15].mxu1  ;;  %v1664_v17 = vsel %vm1352_vm1, %v1657_v15, -inf }
 0x59a   :  { %1665 = vmax.xlane.f32.xlu1 %v1664_v17 }
 0x627   :  { %v1666_v11 = vpop.xlane.xlu1 %1665 }
 0x628   :  { %v1668_v18 = vsub.f32 %v1657_v15, %v1666_v11  ;;  %v717_v15 = vsub.s32 7, %v8050_v32  ;;  %v702_v32 = vrot.slane %v8055_v40, %v8126_v63 }
 0x62a   :  { %v1671_v19 = vmul.f32 1.442695, %v1668_v18  ;;  %v718_v11 = vrot.slane %v8055_v40, %v717_v15  ;;  %v879_v40 = vadd.f32 %v8116_v55, %v702_v32  ;;  %v542_v55 = vld [vmem:[#allocation16 + $0x98] sm:$0xff] }
 0x62c   :  { %7032 = vpow2.f32 %v1671_v19 }
 0x636   :  { %v7033_v20 = vpop.eup %7032  ;;  %v8153_v21 = vpop.f32.mrb[16].mxu0 }
 0x637   :  { %v5702_v56 = vpop.f32.mrb[17].mxu0  ;;  %v1676_v22 = vsel %vm1352_vm1, %v7033_v20, 0.0 }
 0x638   :  { %1677 = vadd.xlane.f32.xlu1 %v1676_v22  ;;  %v873_v56 = vadd.f32 %v8104_v39, %v702_v32  ;;  %v1033_v22 = vadd.f32 %v8123_v62, %v718_v11  ;;  %v539_v39 = vld [vmem:[#allocation16 + $0x80] sm:$0xff]  ;;  %v540_v62 = vld [vmem:[#allocation16 + $0x88] sm:$0xff] }
 0x63a   :  { %v1587_v23 = vpop.f32.mrb[18].mxu0 }
 0x63b   :  { %v5712_v24 = vpop.f32.mrb[19].mxu0  ;;  %v1661_v2 = vsel %vm1352_vm1, %v1587_v23, -inf }
 0x6c5   :  { %v1678_v25 = vpop.xlane.xlu1 %1677 }
 0x6c6   :  { %7034 = vrcp.f32 %v1678_v25  ;;  %v541_v25 = vld [vmem:[#allocation16 + $0x90] sm:$0xff] }
 0x6d0   :  { %v7035_v28 = vpop.eup %7034 }
 0x6d1   :  { %v1682_v29 = vmul.f32 %v7035_v28, %v7033_v20  ;;  %v1027_v20 = vadd.f32 %v8118_v59, %v718_v11  ;;  %v1203_v59 = vadd.f32 %v8130_v3, %v8134_v5  ;;  %v6426_v28 = vpack.c.bf16 %v542_v55, %v541_v25  ;;  %v544_v3 = vld [vmem:[#allocation16 + $0xa8] sm:$0xff]  ;;  %v525_v11 = vld [vmem:[#allocation16 + $0x10] sm:$0xff]  ;;  %v531_v25 = vld [vmem:[#allocation16 + $0x40] sm:$0xff] }
 0x6d2   :  { %v6430_v5 = vpack.c.bf16 %v544_v3, %v543_v58  ;;  %v532_v55 = vld [vmem:[#allocation16 + $0x48] sm:$0xff]  ;;  %v535_v3 = vld [vmem:[#allocation16 + $0x60] sm:$0xff] }
 0x6d3   :  { %5726 = vmatmul.mubr.msk.f32.vlgmr.msra.gmra.mrb[16].mxu1 %vm1352_vm1, %v1682_v29  ;;  %v545_v29 = vld [vmem:[#allocation16 + $0xb0] sm:$0xff] }
 0x6d4   :  { %5799 = vmatpush3.xpose.msra.mxu1 %v1025_v30  ;;  %5800 = vmatprep.mubr.msk.f32.mxu1 %vm7617_vm0, %v7616_v0  ;;  %v546_v30 = vld [vmem:[#allocation16 + $0xb8] sm:$0xff] }
 0x6d5   :  { %5803 = vmatprep.subr.mxu1 %v7616_v0 }
 0x6d7   :  { %5801 = vmatmul.mubr.f32.vlgmr.msra.gmra.mrb[18].mxu1 %v871_v31  ;;  %v6434_v31 = vpack.c.bf16 %v546_v30, %v545_v29  ;;  %v537_v30 = vld [vmem:[#allocation16 + $0x70] sm:$0xff] }
 0x6d8   :  { %5804 = vmatpush3.xpose.msra.mxu1 %v1031_v33  ;;  %5805 = vmatprep.mubr.msk.f32.mxu1 %vm7617_vm0, %v7616_v0  ;;  %v547_v33 = vld [vmem:[#allocation16 + $0xc0] sm:$0xff] }
 0x6d9   :  { %5808 = vmatprep.subr.mxu1 %v7616_v0 }
 0x6db   :  { %5806 = vmatmul.mubr.f32.vlgmr.msra.gmra.mrb[20].mxu1 %v877_v34  ;;  %v548_v34 = vld [vmem:[#allocation16 + $0xc8] sm:$0xff] }
 0x6dc   :  { %5809 = vmatpush3.msra.mxu1 %v1201_v35  ;;  %5810 = vmatprep.mubr.msk.f32.mxu1 %vm7617_vm0, %v7616_v0  ;;  %v6438_v35 = vpack.c.bf16 %v548_v34, %v547_v33  ;;  %v555_v34 = vld [vmem:[#allocation16 + $0x100] sm:$0xff] }
 0x6dd   :  { %5813 = vmatprep.subr.mxu1 %v7616_v0 }
 0x7a6   :  { %v8171_v36 = vpop.f32.mrb[16].mxu1 }
 0x7a7   :  { %v5727_v4 = vpop.f32.mrb[17].mxu1 }
 0x7a8   :  { %v549_v4 = vld [vmem:[#allocation16 + $0xd0] sm:$0xff] }
 0x7aa   :  { %v2045_v37 = vpop.f32.mrb[18].mxu1 }
 0x7ab   :  { %v5802_v41 = vpop.f32.mrb[19].mxu1  ;;  %v2119_v42 = vsel %vm1352_vm1, %v2045_v37, -inf }
 0x7ac   :  { %2120 = vmax.xlane.f32.xlu1 %v2119_v42 }
 0x7ae   :  { %v2115_v43 = vpop.f32.mrb[20].mxu1 }
 0x7af   :  { %v5807_v44 = vpop.f32.mrb[21].mxu1  ;;  %v2122_v45 = vsel %vm1352_vm1, %v2115_v43, -inf }
 0x7b0   :  { %2123 = vmax.xlane.f32.xlu1 %v2122_v45 }
 0x839   :  { %v2121_v47 = vpop.xlane.xlu1 %2120 }
 0x83a   :  { %v2125_v48 = vsub.f32 %v2045_v37, %v2121_v47  ;;  %v550_v37 = vld [vmem:[#allocation16 + $0xd8] sm:$0xff] }
 0x83b   :  { %v6442_v41 = vpack.c.bf16 %v550_v37, %v549_v4  ;;  %v557_v37 = vld [vmem:[#allocation16 + $0x110] sm:$0xff] }
 0x83c   :  { %v2127_v49 = vmul.f32 1.442695, %v2125_v48 }
 0x83d   :  { %v2124_v50 = vpop.xlane.xlu1 %2123 }
 0x83e   :  { %7036 = vpow2.f32 %v2127_v49  ;;  %v2126_v52 = vsub.f32 %v2115_v43, %v2124_v50 }
 0x840   :  { %v2129_v53 = vmul.f32 1.442695, %v2126_v52 }
 0x842   :  { %7038 = vpow2.f32 %v2129_v53 }
 0x848   :  { %v7037_v54 = vpop.eup %7036 }
 0x849   :  { %v2131_v57 = vsel %vm1352_vm1, %v7037_v54, 0.0 }
 0x84a   :  { %2132 = vadd.xlane.f32.xlu0 %v2131_v57  ;;  %v552_v57 = vld [vmem:[#allocation16 + $0xe8] sm:$0xff] }
 0x84c   :  { %v7039_v46 = vpop.eup %7038 }
 0x84d   :  { %v2134_v1 = vsel %vm1352_vm1, %v7039_v46, 0.0 }
 0x84e   :  { %2135 = vadd.xlane.f32.xlu1 %v2134_v1  ;;  %1662 = vmax.xlane.f32.xlu0 %v1661_v2  ;;  %v553_v1 = vld [vmem:[#allocation16 + $0xf0] sm:$0xff]  ;;  %v554_v2 = vld [vmem:[#allocation16 + $0xf8] sm:$0xff] }
 0x8d7   :  { %v2133_v7 = vpop.xlane.xlu0 %2132 }
 0x8d8   :  { %7040 = vrcp.f32 %v2133_v7  ;;  %v6450_v7 = vpack.c.bf16 %v554_v2, %v553_v1  ;;  %v566_v1 = vld [vmem:[#allocation16 + $0x158] sm:$0xff]  ;;  %v567_v2 = vld [vmem:[#allocation16 + $0x160] sm:$0xff] }
 0x8db   :  { %v2136_v51 = vpop.xlane.xlu1 %2135  ;;  %v1663_v10 = vpop.xlane.xlu0 %1662 }
 0x8dc   :  { %7042 = vrcp.f32 %v2136_v51  ;;  %v1667_v60 = vsub.f32 %v1587_v23, %v1663_v10  ;;  %v6422_v23 = vpack.c.bf16 %v540_v62, %v539_v39  ;;  %v523_v51 = vld [vmem:[#allocation16] sm:$0xff]  ;;  %v524_v10 = vld [vmem:[#allocation16 + $0x8] sm:$0xff]  ;;  %v530_v39 = vld [vmem:[#allocation16 + $0x38] sm:$0xff] }
 0x8de   :  { %v1669_v12 = vmul.f32 1.442695, %v1667_v60  ;;  %6423 = vmatprep.subr.bf16.mxu0 %v6422_v23  ;;  %v6454_v60 = vpack.c.bf16 %v524_v10, %v523_v51  ;;  %v569_v51 = vld [vmem:[#allocation16 + $0x170] sm:$0xff]  ;;  %v570_v10 = vld [vmem:[#allocation16 + $0x178] sm:$0xff] }
 0x8e0   :  { %7044 = vpow2.f32 %v1669_v12 }
 0x8e2   :  { %v7041_v14 = vpop.eup %7040 }
 0x8e3   :  { %v2138_v16 = vmul.f32 %v7041_v14, %v7037_v54  ;;  %v551_v54 = vld [vmem:[#allocation16 + $0xe0] sm:$0xff] }
 0x8e5   :  { %5811 = vmatmul.mubr.msk.f32.vlgmr.msra.gmra.mrb[22].mxu1 %vm1352_vm1, %v2138_v16 }
 0x8e6   :  { %v7043_v17 = vpop.eup %7042  ;;  %5814 = vmatpush3.msra.mxu1 %v8136_v8  ;;  %5815 = vmatprep.mubr.msk.f32.mxu1 %vm7617_vm0, %v7616_v0 }
 0x8e7   :  { %v2140_v18 = vmul.f32 %v7043_v17, %v7039_v46  ;;  %5853 = vmatprep.subr.mxu1 %v7616_v0  ;;  %v6446_v46 = vpack.c.bf16 %v552_v57, %v551_v54  ;;  %v564_v54 = vld [vmem:[#allocation16 + $0x148] sm:$0xff] }
 0x8e9   :  { %5816 = vmatmul.mubr.msk.f32.vlgmr.msra.gmra.mrb[24].mxu1 %vm1352_vm1, %v2140_v18  ;;  %v526_v18 = vld [vmem:[#allocation16 + $0x18] sm:$0xff] }
 0x8ea   :  { %v7045_v19 = vpop.eup %7044  ;;  %5855 = vmatprep.mubr.msk.f32.mxu1 %vm7617_vm0, %v7616_v0 }
 0x8eb   :  { %v1673_v8 = vsel %vm1352_vm1, %v7045_v19, 0.0 }
 0x8ec   :  { %1674 = vadd.xlane.f32.xlu1 %v1673_v8 }
 0x8ed   :  { %5854 = vmatpush3.xpose.msra.mxu1 %v1027_v20  ;;  %v6458_v20 = vpack.c.bf16 %v526_v18, %v525_v11  ;;  %v575_v18 = vld [vmem:[#allocation16 + $0x1a0] sm:$0xff] }
 0x8ee   :  { %5858 = vmatprep.subr.mxu1 %v7616_v0 }
 0x8f0   :  { %5856 = vmatmul.mubr.f32.vlgmr.msra.gmra.mrb[26].mxu1 %v873_v56  ;;  %v527_v56 = vld [vmem:[#allocation16 + $0x20] sm:$0xff] }
 0x8f1   :  { %5859 = vmatpush3.xpose.msra.mxu1 %v1033_v22  ;;  %5860 = vmatprep.mubr.msk.f32.mxu1 %vm7617_vm0, %v7616_v0  ;;  %v528_v22 = vld [vmem:[#allocation16 + $0x28] sm:$0xff] }
 0x8f2   :  { %5863 = vmatprep.subr.mxu1 %v7616_v0 }
 0x8f4   :  { %5861 = vmatmul.mubr.f32.vlgmr.msra.gmra.mrb[28].mxu1 %v879_v40  ;;  %v6462_v40 = vpack.c.bf16 %v528_v22, %v527_v56  ;;  %v579_v22 = vld [vmem:[#allocation16 + $0x1c0] sm:$0xff] }
 0x8f5   :  { %5864 = vmatpush3.msra.mxu1 %v1203_v59  ;;  %5865 = vmatprep.mubr.msk.f32.mxu1 %vm7617_vm0, %v7616_v0  ;;  %v529_v59 = vld [vmem:[#allocation16 + $0x30] sm:$0xff] }
 0x8f6   :  { %5868 = vmatprep.subr.mxu1 %v7616_v0 }
 0x979   :  { %v1675_v24 = vpop.xlane.xlu1 %1674 }
 0x97a   :  { %7046 = vrcp.f32 %v1675_v24  ;;  %v6466_v24 = vpack.c.bf16 %v530_v39, %v529_v59  ;;  %v581_v39 = vld [vmem:[#allocation16 + $0x1d0] sm:$0xff] }
 0x984   :  { %v7047_v26 = vpop.eup %7046 }
 0x985   :  { %v1680_v27 = vmul.f32 %v7047_v26, %v7045_v19 }
 0x987   :  { %5721 = vmatmul.mubr.msk.f32.vlgmr.msra.gmra.mrb[20].mxu0 %vm1352_vm1, %v1680_v27  ;;  %v533_v27 = vld [vmem:[#allocation16 + $0x50] sm:$0xff] }
 0x988   :  { %6425 = vmatpush3.bf16.msra.mxu0 %v6422_v23 }
 0x989   :  { %6427 = vmatprep.subr.bf16.mxu0 %v6426_v28 }
 0x98c   :  { %6429 = vmatpush3.bf16.msra.mxu0 %v6426_v28  ;;  %v534_v28 = vld [vmem:[#allocation16 + $0x58] sm:$0xff] }
 0x98d   :  { %6431 = vmatprep.subr.bf16.mxu0 %v6430_v5  ;;  %v6474_v58 = vpack.c.bf16 %v534_v28, %v533_v27 }
 0x990   :  { %6433 = vmatpush3.bf16.msra.mxu0 %v6430_v5  ;;  %v536_v5 = vld [vmem:[#allocation16 + $0x68] sm:$0xff] }
 0x991   :  { %6435 = vmatprep.subr.bf16.mxu0 %v6434_v31  ;;  %v6478_v29 = vpack.c.bf16 %v536_v5, %v535_v3  ;;  %v585_v5 = vld [vmem:[#allocation16 + $0x1f0] sm:$0xff] }
 0x994   :  { %6437 = vmatpush3.bf16.msra.mxu0 %v6434_v31  ;;  %v538_v31 = vld [vmem:[#allocation16 + $0x78] sm:$0xff] }
 0x995   :  { %6439 = vmatprep.subr.bf16.mxu0 %v6438_v35  ;;  %v6482_v33 = vpack.c.bf16 %v538_v31, %v537_v30 }
 0x998   :  { %6441 = vmatpush3.bf16.msra.mxu0 %v6438_v35  ;;  %v556_v35 = vld [vmem:[#allocation16 + $0x108] sm:$0xff] }
 0x999   :  { %6443 = vmatprep.subr.bf16.mxu0 %v6442_v41  ;;  %v6486_v4 = vpack.c.bf16 %v556_v35, %v555_v34  ;;  %v2810_v35 = vld [vmem:[#allocation19 + $0x28] sm:$0xff] }
 0x99c   :  { %6445 = vmatpush3.bf16.msra.mxu0 %v6442_v41  ;;  %v558_v41 = vld [vmem:[#allocation16 + $0x118] sm:$0xff] }
 0x99d   :  { %6447 = vmatprep.subr.bf16.mxu0 %v6446_v46 }
 0x9a0   :  { %6449 = vmatpush3.bf16.msra.mxu0 %v6446_v46  ;;  %v565_v46 = vld [vmem:[#allocation16 + $0x150] sm:$0xff] }
 0x9a1   :  { %6451 = vmatprep.subr.bf16.mxu0 %v6450_v7 }
 0x9a4   :  { %6453 = vmatpush3.bf16.msra.mxu0 %v6450_v7  ;;  %v568_v7 = vld [vmem:[#allocation16 + $0x168] sm:$0xff] }
 0x9a5   :  { %6455 = vmatprep.subr.bf16.mxu0 %v6454_v60 }
 0x9b8   :  { %v8205_v42 = vpop.f32.mrb[22].mxu1 }
 0x9b9   :  { %v5812_v43 = vpop.f32.mrb[23].mxu1 }
 0x9ba   :  { %v6490_v43 = vpack.c.bf16 %v558_v41, %v557_v37  ;;  %v2809_v37 = vld [vmem:[#allocation19 + $0x20] sm:$0xff]  ;;  %v2814_v41 = vld [vmem:[#allocation19 + $0x48] sm:$0xff] }
 0x9bc   :  { %v8207_v44 = vpop.f32.mrb[24].mxu1 }
 0x9bd   :  { %v5817_v45 = vpop.f32.mrb[25].mxu1 }
 0x9be   :  { %v559_v45 = vld [vmem:[#allocation16 + $0x120] sm:$0xff] }
 0x9c3   :  { %v2430_v47 = vpop.f32.mrb[26].mxu1 }
 0x9c4   :  { %v5857_v48 = vpop.f32.mrb[27].mxu1  ;;  %v2504_v49 = vsel %vm1352_vm1, %v2430_v47, -inf }
 0x9c5   :  { %2505 = vmax.xlane.f32.xlu0 %v2504_v49  ;;  %v561_v49 = vld [vmem:[#allocation16 + $0x130] sm:$0xff] }
 0x9c7   :  { %v2500_v50 = vpop.f32.mrb[28].mxu1 }
 0x9c8   :  { %v5862_v52 = vpop.f32.mrb[29].mxu1  ;;  %v2507_v53 = vsel %vm1352_vm1, %v2500_v50, -inf }
 0x9c9   :  { %2508 = vmax.xlane.f32.xlu1 %v2507_v53  ;;  %v563_v53 = vld [vmem:[#allocation16 + $0x140] sm:$0xff] }
 0x9ca   :  { %v6502_v57 = vpack.c.bf16 %v564_v54, %v563_v53 }
 0xa52   :  { %v2506_v12 = vpop.xlane.xlu0 %2505 }
 0xa53   :  { %v2510_v14 = vsub.f32 %v2430_v47, %v2506_v12  ;;  %v560_v47 = vld [vmem:[#allocation16 + $0x128] sm:$0xff]  ;;  %v571_v12 = vld [vmem:[#allocation16 + $0x180] sm:$0xff] }
 0xa54   :  { %v6494_v48 = vpack.c.bf16 %v560_v47, %v559_v45 }
 0xa55   :  { %v2512_v15 = vmul.f32 1.442695, %v2510_v14  ;;  %v572_v14 = vld [vmem:[#allocation16 + $0x188] sm:$0xff] }
 0xa56   :  { %v2509_v16 = vpop.xlane.xlu1 %2508 }
 0xa57   :  { %7048 = vpow2.f32 %v2512_v15  ;;  %v2511_v17 = vsub.f32 %v2500_v50, %v2509_v16  ;;  %v562_v50 = vld [vmem:[#allocation16 + $0x138] sm:$0xff]  ;;  %v6518_v15 = vpack.c.bf16 %v572_v14, %v571_v12  ;;  %v573_v16 = vld [vmem:[#allocation16 + $0x190] sm:$0xff]  ;;  %v2821_v14 = vld [vmem:[#allocation19 + $0x80] sm:$0xff] }
 0xa58   :  { %v6498_v52 = vpack.c.bf16 %v562_v50, %v561_v49  ;;  %v2817_v49 = vld [vmem:[#allocation19 + $0x60] sm:$0xff] }
 0xa59   :  { %v2514_v19 = vmul.f32 1.442695, %v2511_v17  ;;  %v574_v17 = vld [vmem:[#allocation16 + $0x198] sm:$0xff] }
 0xa5a   :  { %v1752_v32 = vpop.f32.mrb[20].mxu0  ;;  %v6522_v11 = vpack.c.bf16 %v574_v17, %v573_v16  ;;  %v2830_v17 = vld [vmem:[#allocation19 + $0xc8] sm:$0xff] }
 0xa5b   :  { %7050 = vpow2.f32 %v2514_v19  ;;  %v5722_v8 = vpop.f32.mrb[21].mxu0  ;;  %5760 = vmatprep.mubr.f32.mxu0 %v1752_v32  ;;  %v576_v19 = vld [vmem:[#allocation16 + $0x1a8] sm:$0xff] }
 0xa5c   :  { %5761 = vmatmul.mubr.f32.vlgmr.msra.gmra.mrb[22].mxu0 %v8171_v36  ;;  %v6470_v36 = vpack.c.bf16 %v532_v55, %v531_v25  ;;  %v6526_v32 = vpack.c.bf16 %v576_v19, %v575_v18  ;;  %v578_v8 = vld [vmem:[#allocation16 + $0x1b8] sm:$0xff]  ;;  %v583_v25 = vld [vmem:[#allocation16 + $0x1e0] sm:$0xff] }
 0xa5d   :  { %6457 = vmatpush3.bf16.msra.mxu0 %v6454_v60  ;;  %5795 = vmatprep.mubr.f32.mxu0 %v8153_v21  ;;  %v6514_v60 = vpack.c.bf16 %v570_v10, %v569_v51  ;;  %v2822_v10 = vld [vmem:[#allocation19 + $0x88] sm:$0xff]  ;;  %v2829_v19 = vld [vmem:[#allocation19 + $0xc0] sm:$0xff] }
 0xa5e   :  { %6459 = vmatprep.subr.bf16.mxu0 %v6458_v20 }
 0xa61   :  { %v8213_v62 = vpop.eup %7048  ;;  %6461 = vmatpush3.bf16.msra.mxu0 %v6458_v20  ;;  %v577_v20 = vld [vmem:[#allocation16 + $0x1b0] sm:$0xff] }
 0xa62   :  { %v2516_v23 = vsel %vm1352_vm1, %v8213_v62, 0.0  ;;  %6463 = vmatprep.subr.bf16.mxu0 %v6462_v40  ;;  %v6530_v56 = vpack.c.bf16 %v578_v8, %v577_v20  ;;  %v2838_v8 = vld [vmem:[#allocation19 + $0x108] sm:$0xff] }
 0xa63   :  { %2517 = vadd.xlane.f32.xlu0 %v2516_v23  ;;  %v582_v23 = vld [vmem:[#allocation16 + $0x1d8] sm:$0xff] }
 0xa65   :  { %v8217_v26 = vpop.eup %7050  ;;  %6465 = vmatpush3.bf16.msra.mxu0 %v6462_v40  ;;  %v580_v40 = vld [vmem:[#allocation16 + $0x1c8] sm:$0xff] }
 0xa66   :  { %v2519_v21 = vsel %vm1352_vm1, %v8217_v26, 0.0  ;;  %6467 = vmatprep.subr.bf16.mxu0 %v6466_v24  ;;  %v6534_v59 = vpack.c.bf16 %v580_v40, %v579_v22  ;;  %v2837_v40 = vld [vmem:[#allocation19 + $0x100] sm:$0xff] }
 0xa67   :  { %2520 = vadd.xlane.f32.xlu1 %v2519_v21 }
 0xa69   :  { %6469 = vmatpush3.bf16.msra.mxu0 %v6466_v24  ;;  %v6538_v24 = vpack.c.bf16 %v582_v23, %v581_v39  ;;  %v2846_v23 = vld [vmem:[#allocation19 + $0x148] sm:$0xff] }
 0xa6a   :  { %6471 = vmatprep.subr.bf16.mxu0 %v6470_v36 }
 0xa6d   :  { %6473 = vmatpush3.bf16.msra.mxu0 %v6470_v36 }
 0xa6e   :  { %6475 = vmatprep.subr.bf16.mxu0 %v6474_v58 }
 0xa71   :  { %6477 = vmatpush3.bf16.msra.mxu0 %v6474_v58 }
 0xa72   :  { %6479 = vmatprep.subr.bf16.mxu0 %v6478_v29 }
 0xa75   :  { %6481 = vmatpush3.bf16.msra.mxu0 %v6478_v29  ;;  %v586_v29 = vld [vmem:[#allocation16 + $0x1f8] sm:$0xff] }
 0xa76   :  { %6483 = vmatprep.subr.bf16.mxu0 %v6482_v33  ;;  %v6546_v30 = vpack.c.bf16 %v586_v29, %v585_v5  ;;  %v2862_v5 = vld [vmem:[#allocation19 + $0x1c8] sm:$0xff] }
 0xa77   :  { %v2866_v29 = vld [vmem:[#allocation19 + $0x1e8] sm:$0xff] }
 0xa79   :  { %6485 = vmatpush3.bf16.msra.mxu0 %v6482_v33 }
 0xa7a   :  { %6487 = vmatprep.subr.bf16.mxu0 %v6486_v4 }
 0xa7c   :  { %5796 = vmatmul.mubr.f32.vlgmr.msra.gmra.mrb[22].mxu0 %v8150_v13  ;;  %v6506_v13 = vpack.c.bf16 %v566_v1, %v565_v46  ;;  %v7100_v1 = vld [vmem:[#allocation2] sm:$0xff] }
 0xa7d   :  { %6489 = vmatpush3.bf16.msra.mxu0 %v6486_v4  ;;  %5850 = vmatprep.mubr.f32.mxu0 %v8205_v42  ;;  %v6510_v42 = vpack.c.bf16 %v568_v7, %v567_v2  ;;  %v7101_v2 = vld [vmem:[#allocation2 + $0x8] sm:$0xff] }
 0xa7e   :  { %6491 = vmatprep.subr.bf16.mxu0 %v6490_v43 }
 0xa81   :  { %6493 = vmatpush3.bf16.msra.mxu0 %v6490_v43  ;;  %v2818_v43 = vld [vmem:[#allocation19 + $0x68] sm:$0xff] }
 0xa82   :  { %6495 = vmatprep.subr.bf16.mxu0 %v6494_v48  ;;  %v6554_v47 = vpack.c.bf16 %v2818_v43, %v2814_v41 }
 0xa85   :  { %6497 = vmatpush3.bf16.msra.mxu0 %v6494_v48  ;;  %v2813_v48 = vld [vmem:[#allocation19 + $0x40] sm:$0xff] }
 0xa86   :  { %6499 = vmatprep.subr.bf16.mxu0 %v6498_v52  ;;  %v6556_v50 = vpack.c.bf16 %v2817_v49, %v2813_v48 }
 0xa89   :  { %6501 = vmatpush3.bf16.msra.mxu0 %v6498_v52  ;;  %v5410_v52 = vld [vmem:[#allocation17] ss:$0 sm:$0xff] }
 0xa8a   :  { %6503 = vmatprep.subr.bf16.mxu0 %v6502_v57 }
 0xa8d   :  { %6505 = vmatpush3.bf16.msra.mxu0 %v6502_v57 }
 0xa8e   :  { %6507 = vmatprep.subr.bf16.mxu0 %v6506_v13 }
 0xa91   :  { %6509 = vmatpush3.bf16.msra.mxu0 %v6506_v13 }
 0xa92   :  { %6511 = vmatprep.subr.bf16.mxu0 %v6510_v42 }
 0xa95   :  { %6513 = vmatpush3.bf16.msra.mxu0 %v6510_v42 }
 0xa96   :  { %6515 = vmatprep.subr.bf16.mxu0 %v6514_v60 }
 0xa99   :  { %6517 = vmatpush3.bf16.msra.mxu0 %v6514_v60  ;;  %v2826_v60 = vld [vmem:[#allocation19 + $0xa8] sm:$0xff] }
 0xa9a   :  { %6519 = vmatprep.subr.bf16.mxu0 %v6518_v15  ;;  %v6558_v12 = vpack.c.bf16 %v2826_v60, %v2822_v10  ;;  %v5412_v10 = vld [vmem:[#allocation32] ss:$0 sm:$0xff] }
 0xa9c   :  { %5851 = vmatmul.mubr.f32.vlgmr.msra.gmra.mrb[22].mxu0 %v8207_v44  ;;  %v584_v44 = vld [vmem:[#allocation16 + $0x1e8] sm:$0xff] }
 0xa9d   :  { %6521 = vmatpush3.bf16.msra.mxu0 %v6518_v15  ;;  %v6542_v55 = vpack.c.bf16 %v584_v44, %v583_v25  ;;  %v2825_v15 = vld [vmem:[#allocation19 + $0xa0] sm:$0xff] }
 0xa9e   :  { %6523 = vmatprep.subr.bf16.mxu0 %v6522_v11  ;;  %v6560_v16 = vpack.c.bf16 %v2825_v15, %v2821_v14  ;;  %v2845_v25 = vld [vmem:[#allocation19 + $0x140] sm:$0xff]  ;;  %v2807_v14 = vld [vmem:[#allocation19 + $0x10] sm:$0xff] }
 0xa9f   :  { %v2811_v15 = vld [vmem:[#allocation19 + $0x30] sm:$0xff] }
 0xaa1   :  { %6525 = vmatpush3.bf16.msra.mxu0 %v6522_v11  ;;  %v2834_v11 = vld [vmem:[#allocation19 + $0xe8] sm:$0xff] }
 0xaa2   :  { %6527 = vmatprep.subr.bf16.mxu0 %v6526_v32  ;;  %v6562_v18 = vpack.c.bf16 %v2834_v11, %v2830_v17  ;;  %v2816_v17 = vld [vmem:[#allocation19 + $0x58] sm:$0xff] }
 0xaa3   :  { %v2820_v11 = vld [vmem:[#allocation19 + $0x78] sm:$0xff] }
 0xaa5   :  { %6529 = vmatpush3.bf16.msra.mxu0 %v6526_v32  ;;  %v2833_v32 = vld [vmem:[#allocation19 + $0xe0] sm:$0xff] }
 0xaa6   :  { %6531 = vmatprep.subr.bf16.mxu0 %v6530_v56  ;;  %v6564_v20 = vpack.c.bf16 %v2833_v32, %v2829_v19  ;;  %v6584_v32 = vpack.c.bf16 %v2811_v15, %v2807_v14  ;;  %v3055_v14 = vld [vmem:[#allocation19 + $0x248] sm:$0xff] }
 0xaa7   :  { %v3059_v15 = vld [vmem:[#allocation19 + $0x268] sm:$0xff] }
 0xaa9   :  { %6533 = vmatpush3.bf16.msra.mxu0 %v6530_v56  ;;  %v2842_v56 = vld [vmem:[#allocation19 + $0x128] sm:$0xff] }
 0xaaa   :  { %6535 = vmatprep.subr.bf16.mxu0 %v6534_v59  ;;  %v6566_v22 = vpack.c.bf16 %v2842_v56, %v2838_v8 }
 0xaad   :  { %6537 = vmatpush3.bf16.msra.mxu0 %v6534_v59  ;;  %v2841_v59 = vld [vmem:[#allocation19 + $0x120] sm:$0xff] }
 0xaae   :  { %6539 = vmatprep.subr.bf16.mxu0 %v6538_v24  ;;  %v6568_v39 = vpack.c.bf16 %v2841_v59, %v2837_v40  ;;  %v2819_v40 = vld [vmem:[#allocation19 + $0x70] sm:$0xff]  ;;  %v2824_v59 = vld [vmem:[#allocation19 + $0x98] sm:$0xff] }
 0xab1   :  { %6541 = vmatpush3.bf16.msra.mxu0 %v6538_v24  ;;  %v2850_v24 = vld [vmem:[#allocation19 + $0x168] sm:$0xff] }
 0xab2   :  { %6543 = vmatprep.subr.bf16.mxu0 %v6542_v55  ;;  %v6570_v44 = vpack.c.bf16 %v2850_v24, %v2846_v23  ;;  %v7103_v24 = vld [vmem:[#allocation7 + $0x8] sm:$0xff] }
 0xab5   :  { %6545 = vmatpush3.bf16.msra.mxu0 %v6542_v55  ;;  %v2849_v55 = vld [vmem:[#allocation19 + $0x160] sm:$0xff] }
 0xab6   :  { %6547 = vmatprep.subr.bf16.mxu0 %v6546_v30 }
 0xab9   :  { %6549 = vmatpush3.bf16.msra.mxu0 %v6546_v30 }
 0xaf0   :  { %v2518_v21 = vpop.xlane.xlu0 %2517 }
 0xaf1   :  { %7052 = vrcp.f32 %v2518_v21  ;;  %v2854_v21 = vld [vmem:[#allocation19 + $0x188] sm:$0xff] }
 0xaf4   :  { %v2521_v36 = vpop.xlane.xlu1 %2520 }
 0xaf5   :  { %7054 = vrcp.f32 %v2521_v36  ;;  %v2858_v36 = vld [vmem:[#allocation19 + $0x1a8] sm:$0xff] }
 0xafb   :  { %v7053_v27 = vpop.eup %7052 }
 0xafc   :  { %v2523_v28 = vmul.f32 %v7053_v27, %v8213_v62  ;;  %v6572_v27 = vpack.c.bf16 %v2849_v55, %v2845_v25  ;;  %v2823_v55 = vld [vmem:[#allocation19 + $0x90] sm:$0xff] }
 0xafe   :  { %5866 = vmatmul.mubr.msk.f32.vlgmr.msra.gmra.mrb[30].mxu1 %vm1352_vm1, %v2523_v28  ;;  %v6574_v28 = vpack.c.bf16 %v2858_v36, %v2854_v21  ;;  %v2827_v21 = vld [vmem:[#allocation19 + $0xb0] sm:$0xff]  ;;  %v2832_v36 = vld [vmem:[#allocation19 + $0xd8] sm:$0xff] }
 0xaff   :  { %v7055_v58 = vpop.eup %7054  ;;  %5869 = vmatpush3.msra.mxu1 %v8139_v9  ;;  %5870 = vmatprep.mubr.msk.f32.mxu1 %vm7617_vm0, %v7616_v0  ;;  %v2806_v9 = vld [vmem:[#allocation19 + $0x8] sm:$0xff] }
 0xb00   :  { %v2525_v3 = vmul.f32 %v7055_v58, %v8217_v26  ;;  %v2805_v26 = vld [vmem:[#allocation19] sm:$0xff]  ;;  %v6550_v4 = vpack.c.bf16 %v2810_v35, %v2806_v9  ;;  %v2812_v9 = vld [vmem:[#allocation19 + $0x38] sm:$0xff] }
 0xb01   :  { %v6552_v45 = vpack.c.bf16 %v2809_v37, %v2805_v26  ;;  %v2853_v58 = vld [vmem:[#allocation19 + $0x180] sm:$0xff] }
 0xb02   :  { %5871 = vmatmul.mubr.msk.f32.vlgmr.msra.gmra.mrb[32].mxu1 %vm1352_vm1, %v2525_v3  ;;  %6551 = vmatprep.subr.bf16.mxu1 %v6550_v4  ;;  %v2857_v3 = vld [vmem:[#allocation19 + $0x1a0] sm:$0xff] }
 0xb03   :  { %2955 = vmatprep.mubr.f32.mxu1 %v7616_v0  ;;  %6553 = vmatpush1.bf16.msra.mxu1 %v6552_v45  ;;  %v6576_v30 = vpack.c.bf16 %v2857_v3, %v2853_v58  ;;  %v2831_v3 = vld [vmem:[#allocation19 + $0xd0] sm:$0xff] }
 0xb04   :  { %6555 = vmatprep.subr.bf16.mxu1 %v6554_v47 }
 0xb07   :  { %6557 = vmatpush1.bf16.msra.mxu1 %v6556_v50 }
 0xb08   :  { %6559 = vmatprep.subr.bf16.mxu1 %v6558_v12 }
 0xb0b   :  { %6561 = vmatpush1.bf16.msra.mxu1 %v6560_v16 }
 0xb0c   :  { %6563 = vmatprep.subr.bf16.mxu1 %v6562_v18 }
 0xb0f   :  { %6565 = vmatpush1.bf16.msra.mxu1 %v6564_v20  ;;  %v7102_v20 = vld [vmem:[#allocation7] sm:$0xff] }
 0xb10   :  { %6567 = vmatprep.subr.bf16.mxu1 %v6566_v22  ;;  %v2815_v22 = vld [vmem:[#allocation19 + $0x50] sm:$0xff] }
 0xb11   :  { %v6588_v23 = vpack.c.bf16 %v2819_v40, %v2815_v22  ;;  %v3062_v22 = vld [vmem:[#allocation19 + $0x280] sm:$0xff] }
 0xb12   :  { %v3066_v40 = vld [vmem:[#allocation19 + $0x2a0] sm:$0xff] }
 0xb13   :  { %6569 = vmatpush1.bf16.msra.mxu1 %v6568_v39 }
 0xb14   :  { %6571 = vmatprep.subr.bf16.mxu1 %v6570_v44 }
 0xb17   :  { %6573 = vmatpush1.bf16.msra.mxu1 %v6572_v27  ;;  %v2836_v27 = vld [vmem:[#allocation19 + $0xf8] sm:$0xff] }
 0xb18   :  { %6575 = vmatprep.subr.bf16.mxu1 %v6574_v28  ;;  %v6592_v28 = vpack.c.bf16 %v2827_v21, %v2823_v55  ;;  %v6594_v58 = vpack.c.bf16 %v2836_v27, %v2832_v36  ;;  %v3079_v55 = vld [vmem:[#allocation19 + $0x308] sm:$0xff] }
 0xb19   :  { %v3083_v21 = vld [vmem:[#allocation19 + $0x328] sm:$0xff] }
 0xb1a   :  { %v6630_v27 = vpack.c.bf16 %v3083_v21, %v3079_v55  ;;  %v3336_v21 = vld [vmem:[#allocation19 + $0x4c0] sm:$0xff] }
 0xb1b   :  { %6577 = vmatpush1.bf16.msra.mxu1 %v6576_v30  ;;  %v2844_v30 = vld [vmem:[#allocation19 + $0x138] sm:$0xff] }
 0xbd1   :  { %v2595_v62 = vpop.f32.mrb[30].mxu1 }
 0xbd2   :  { %v5867_v31 = vpop.f32.mrb[31].mxu1  ;;  %5905 = vmatprep.mubr.f32.mxu0 %v2595_v62  ;;  %v6578_v62 = vpack.c.bf16 %v2866_v29, %v2862_v5  ;;  %v2835_v5 = vld [vmem:[#allocation19 + $0xf0] sm:$0xff]  ;;  %v2840_v29 = vld [vmem:[#allocation19 + $0x118] sm:$0xff] }
 0xbd3   :  { %v2861_v31 = vld [vmem:[#allocation19 + $0x1c0] sm:$0xff] }
 0xbd4   :  { %6579 = vmatprep.subr.bf16.mxu1 %v6578_v62  ;;  %v6596_v62 = vpack.c.bf16 %v2835_v5, %v2831_v3  ;;  %v3087_v3 = vld [vmem:[#allocation19 + $0x348] sm:$0xff] }
 0xbd5   :  { %v2668_v33 = vpop.f32.mrb[32].mxu1  ;;  %v3091_v5 = vld [vmem:[#allocation19 + $0x368] sm:$0xff] }
 0xbd6   :  { %v5872_v34 = vpop.f32.mrb[33].mxu1  ;;  %5906 = vmatmul.mubr.f32.vlgmr.msra.gmra.mrb[22].mxu0 %v2668_v33  ;;  %v2865_v33 = vld [vmem:[#allocation19 + $0x1e0] sm:$0xff] }
 0xbd7   :  { %3286 = vmatprep.mubr.f32.mxu0 %v7616_v0  ;;  %v2808_v34 = vld [vmem:[#allocation19 + $0x18] sm:$0xff]  ;;  %v6580_v35 = vpack.c.bf16 %v2865_v33, %v2861_v31  ;;  %v6598_v31 = vpack.c.bf16 %v2844_v30, %v2840_v29  ;;  %v2839_v33 = vld [vmem:[#allocation19 + $0x110] sm:$0xff]  ;;  %v6634_v29 = vpack.c.bf16 %v3091_v5, %v3087_v3  ;;  %v3086_v30 = vld [vmem:[#allocation19 + $0x340] sm:$0xff] }
 0xbd8   :  { %v6582_v26 = vpack.c.bf16 %v2812_v9, %v2808_v34  ;;  %v2843_v34 = vld [vmem:[#allocation19 + $0x130] sm:$0xff]  ;;  %v2848_v9 = vld [vmem:[#allocation19 + $0x158] sm:$0xff]  ;;  %v3344_v3 = vld [vmem:[#allocation19 + $0x500] sm:$0xff] }
 0xbd9   :  { %6581 = vmatpush1.bf16.msra.mxu1 %v6580_v35  ;;  %v2852_v35 = vld [vmem:[#allocation19 + $0x178] sm:$0xff] }
 0xbda   :  { %6583 = vmatprep.subr.bf16.mxu1 %v6582_v26  ;;  %v6600_v26 = vpack.c.bf16 %v2843_v34, %v2839_v33  ;;  %v3099_v33 = vld [vmem:[#allocation19 + $0x3a8] sm:$0xff] }
 0xca9   :  { %v5907_v53 = vpop.f32.mrb[22].mxu0 }
 0xcaa   :  { %v2738_v54 = vpop.f32.mrb[23].mxu0  ;;  %v2756_v57 = vadd.f32 %v5907_v53, %v5410_v52 }
 0xcab   :  { %v2755_v46 = vadd.f32 %v5410_v52, %v2738_v54 }
 0xcac   :  { %v8235_v7 = vadd.f32 %v7101_v2, %v2756_v57 }
 0xcad   :  { %v8233_v13 = vadd.f32 %v7100_v1, %v2755_v46 }
 0xcae   :  { %v2768_v51 = vmul.f32 %v8235_v7, %v8235_v7 }
 0xcaf   :  { %2761 = vadd.xlane.f32.xlu0 %v8233_v13  ;;  %v2767_v42 = vmul.f32 %v8233_v13, %v8233_v13 }
 0xcb1   :  { %2769 = vadd.xlane.f32.xlu1 %v2767_v42  ;;  %v5411_v42 = vld [vmem:[#allocation31] ss:$0 sm:$0xff] }
 0xcb3   :  { %2763 = vadd.xlane.f32.xlu0 %v8235_v7 }
 0xcb5   :  { %2771 = vadd.xlane.f32.xlu1 %v2768_v51 }
 0xd3c   :  { %v2762_v4 = vpop.xlane.xlu0 %2761 }
 0xd3d   :  { %v2765_v37 = vmul.f32 0.03125, %v2762_v4  ;;  %v6602_v4 = vpack.c.bf16 %v2852_v35, %v2848_v9  ;;  %v3094_v35 = vld [vmem:[#allocation19 + $0x380] sm:$0xff] }
 0xd3e   :  { %v2770_v41 = vpop.xlane.xlu1 %2769 }
 0xd3f   :  { %v2775_v43 = vmul.f32 %v2765_v37, %v2765_v37  ;;  %v2773_v45 = vmul.f32 0.03125, %v2770_v41  ;;  %v2779_v1 = vsub.f32 %v8233_v13, %v2765_v37  ;;  %v6586_v13 = vpack.c.bf16 %v2820_v11, %v2816_v17  ;;  %v2847_v37 = vld [vmem:[#allocation19 + $0x150] sm:$0xff]  ;;  %v3054_v11 = vld [vmem:[#allocation19 + $0x240] sm:$0xff] }
 0xd40   :  { %v2764_v47 = vpop.xlane.xlu0 %2763  ;;  %v2851_v41 = vld [vmem:[#allocation19 + $0x170] sm:$0xff]  ;;  %v6618_v17 = vpack.c.bf16 %v3059_v15, %v3055_v14  ;;  %v3312_v15 = vld [vmem:[#allocation19 + $0x400] sm:$0xff] }
 0xd41   :  { %v2777_v48 = vsub.f32 %v2773_v45, %v2775_v43  ;;  %v2766_v49 = vmul.f32 0.03125, %v2764_v47  ;;  %v2856_v43 = vld [vmem:[#allocation19 + $0x198] sm:$0xff]  ;;  %v6604_v47 = vpack.c.bf16 %v2851_v41, %v2847_v37  ;;  %v3107_v37 = vld [vmem:[#allocation19 + $0x3e8] sm:$0xff] }
 0xd42   :  { %v2772_v50 = vpop.xlane.xlu1 %2771  ;;  %v2860_v45 = vld [vmem:[#allocation19 + $0x1b8] sm:$0xff] }
 0xd43   :  { %v2781_v52 = vadd.f32 1e-05, %v2777_v48  ;;  %v2776_v53 = vmul.f32 %v2766_v49, %v2766_v49  ;;  %v2774_v54 = vmul.f32 0.03125, %v2772_v50  ;;  %v2780_v60 = vsub.f32 %v8235_v7, %v2766_v49  ;;  %v2828_v7 = vld [vmem:[#allocation19 + $0xb8] sm:$0xff]  ;;  %v2855_v49 = vld [vmem:[#allocation19 + $0x190] sm:$0xff] }
 0xd44   :  { %v6590_v44 = vpack.c.bf16 %v2828_v7, %v2824_v59  ;;  %v6606_v48 = vpack.c.bf16 %v2860_v45, %v2856_v43  ;;  %v2859_v50 = vld [vmem:[#allocation19 + $0x1b0] sm:$0xff]  ;;  %v3071_v59 = vld [vmem:[#allocation19 + $0x2c8] sm:$0xff]  ;;  %v3102_v45 = vld [vmem:[#allocation19 + $0x3c0] sm:$0xff] }
 0xd45   :  { %7056 = vrsqrt.f32 %v2781_v52  ;;  %v2778_v57 = vsub.f32 %v2774_v54, %v2776_v53  ;;  %v2864_v52 = vld [vmem:[#allocation19 + $0x1d8] sm:$0xff]  ;;  %v6608_v54 = vpack.c.bf16 %v2859_v50, %v2855_v49  ;;  %v3075_v7 = vld [vmem:[#allocation19 + $0x2e8] sm:$0xff] }
 0xd46   :  { %v2868_v53 = vld [vmem:[#allocation19 + $0x1f8] sm:$0xff]  ;;  %v8263_v49 = vld [vmem:[#allocation5] sm:$0xff] }
 0xd47   :  { %v2782_v46 = vadd.f32 1e-05, %v2778_v57  ;;  %v6610_v57 = vpack.c.bf16 %v2868_v53, %v2864_v52  ;;  %v327_v50 = vld [vmem:[#allocation8] sm:$0xff]  ;;  %v8268_v53 = vld [vmem:[#allocation5 + $0x8] sm:$0xff] }
 0xd48   :  { %v8266_v52 = vadd.f32 %v327_v50, %v8263_v49  ;;  %v3368_v50 = vld [vmem:[#allocation19 + $0x5c0] sm:$0xff] }
 0xd49   :  { %7058 = vrsqrt.f32 %v2782_v46  ;;  %v2863_v46 = vld [vmem:[#allocation19 + $0x1d0] sm:$0xff] }
 0xd4f   :  { %v7057_v2 = vpop.eup %7056 }
 0xd50   :  { %v2785_v51 = vmul.f32 %v7057_v2, %v2779_v1  ;;  %v2867_v1 = vld [vmem:[#allocation19 + $0x1f0] sm:$0xff]  ;;  %v3047_v2 = vld [vmem:[#allocation19 + $0x208] sm:$0xff] }
 0xd52   :  { %v2791_v12 = vmul.f32 %v5411_v42, %v2785_v51  ;;  %v6612_v51 = vpack.c.bf16 %v2867_v1, %v2863_v46  ;;  %v8275_v46 = vld [vmem:[#allocation5 + $0x10] sm:$0xff]  ;;  %v329_v1 = vld [vmem:[#allocation8 + $0x10] sm:$0xff] }
 0xd53   :  { %v7059_v16 = vpop.eup %7058 }
 0xd54   :  { %v8245_v18 = vadd.f32 %v5412_v10, %v2791_v12  ;;  %v2786_v19 = vmul.f32 %v7059_v16, %v2780_v60  ;;  %v3046_v60 = vld [vmem:[#allocation19 + $0x200] sm:$0xff] }
 0xd55   :  { %v3050_v12 = vld [vmem:[#allocation19 + $0x220] sm:$0xff] }
 0xd56   :  { %v8248_v8 = vadd.f32 %v7102_v20, %v8245_v18  ;;  %v2792_v56 = vmul.f32 %v5411_v42, %v2786_v19  ;;  %v3051_v42 = vld [vmem:[#allocation19 + $0x228] sm:$0xff]  ;;  %v6616_v16 = vpack.c.bf16 %v3050_v12, %v3046_v60  ;;  %v3058_v19 = vld [vmem:[#allocation19 + $0x260] sm:$0xff] }
 0xd57   :  { %v3067_v20 = vld [vmem:[#allocation19 + $0x2a8] sm:$0xff] }
 0xd58   :  { %2956 = vmatmul.mubr.f32.vlgmr.msra.gmra.mrb[34].mxu1 %v8248_v8  ;;  %v8251_v39 = vadd.f32 %v5412_v10, %v2792_v56  ;;  %v6614_v10 = vpack.c.bf16 %v3051_v42, %v3047_v2  ;;  %v8279_v2 = vadd.f32 %v329_v1, %v8275_v46  ;;  %v8282_v42 = vld [vmem:[#allocation5 + $0x18] sm:$0xff]  ;;  %v3313_v60 = vld [vmem:[#allocation19 + $0x408] sm:$0xff] }
 0xd59   :  { %6585 = vmatpush1.bf16.msra.mxu1 %v6584_v32  ;;  %2961 = vmatprep.mubr.f32.mxu1 %v7616_v0  ;;  %v3063_v32 = vld [vmem:[#allocation19 + $0x288] sm:$0xff] }
 0xd5a   :  { %6587 = vmatprep.subr.bf16.mxu1 %v6586_v13  ;;  %v8255_v25 = vadd.f32 %v7103_v24, %v8251_v39  ;;  %v6620_v13 = vpack.c.bf16 %v3058_v19, %v3054_v11  ;;  %v6622_v56 = vpack.c.bf16 %v3067_v20, %v3063_v32  ;;  %v6626_v24 = vpack.c.bf16 %v3075_v7, %v3071_v59  ;;  %v3317_v12 = vld [vmem:[#allocation19 + $0x428] sm:$0xff]  ;;  %v3320_v20 = vld [vmem:[#allocation19 + $0x440] sm:$0xff] }
 0xd5b   :  { %v6678_v14 = vpack.c.bf16 %v3317_v12, %v3313_v60  ;;  %v3321_v11 = vld [vmem:[#allocation19 + $0x448] sm:$0xff]  ;;  %v3328_v7 = vld [vmem:[#allocation19 + $0x480] sm:$0xff] }
 0xd5c   :  { %2962 = vmatmul.mubr.f32.gmra.mrb[36].mxu1 %v8255_v25  ;;  %v3325_v19 = vld [vmem:[#allocation19 + $0x468] sm:$0xff] }
 0xd5d   :  { %6589 = vmatpush1.bf16.msra.mxu1 %v6588_v23  ;;  %3032 = vmatprep.mubr.f32.mxu1 %v7616_v0  ;;  %v6624_v23 = vpack.c.bf16 %v3066_v40, %v3062_v22  ;;  %v6682_v32 = vpack.c.bf16 %v3325_v19, %v3321_v11  ;;  %v3329_v22 = vld [vmem:[#allocation19 + $0x488] sm:$0xff] }
 0xd5e   :  { %6591 = vmatprep.subr.bf16.mxu1 %v6590_v44  ;;  %v3070_v44 = vld [vmem:[#allocation19 + $0x2c0] sm:$0xff]  ;;  %v3333_v40 = vld [vmem:[#allocation19 + $0x4a8] sm:$0xff] }
 0xd5f   :  { %v6686_v59 = vpack.c.bf16 %v3333_v40, %v3329_v22 }
 0xd61   :  { %6593 = vmatpush1.bf16.msra.mxu1 %v6592_v28  ;;  %v3078_v28 = vld [vmem:[#allocation19 + $0x300] sm:$0xff] }
 0xd62   :  { %6595 = vmatprep.subr.bf16.mxu1 %v6594_v58  ;;  %v3082_v58 = vld [vmem:[#allocation19 + $0x320] sm:$0xff] }
 0xd65   :  { %6597 = vmatpush1.bf16.msra.mxu1 %v6596_v62  ;;  %v3090_v62 = vld [vmem:[#allocation19 + $0x360] sm:$0xff] }
 0xd66   :  { %6599 = vmatprep.subr.bf16.mxu1 %v6598_v31  ;;  %v3095_v31 = vld [vmem:[#allocation19 + $0x388] sm:$0xff]  ;;  %v6636_v34 = vpack.c.bf16 %v3090_v62, %v3086_v30 }
 0xd67   :  { %v6638_v9 = vpack.c.bf16 %v3099_v33, %v3095_v31  ;;  %v3357_v30 = vld [vmem:[#allocation19 + $0x568] sm:$0xff]  ;;  %v3352_v33 = vld [vmem:[#allocation19 + $0x540] sm:$0xff] }
 0xd69   :  { %6601 = vmatpush1.bf16.msra.mxu1 %v6600_v26  ;;  %v3098_v26 = vld [vmem:[#allocation19 + $0x3a0] sm:$0xff] }
 0xd6a   :  { %6603 = vmatprep.subr.bf16.mxu1 %v6602_v4  ;;  %v3103_v4 = vld [vmem:[#allocation19 + $0x3c8] sm:$0xff]  ;;  %v6640_v41 = vpack.c.bf16 %v3098_v26, %v3094_v35 }
 0xd6b   :  { %v6642_v43 = vpack.c.bf16 %v3107_v37, %v3103_v4  ;;  %v3365_v35 = vld [vmem:[#allocation19 + $0x5a8] sm:$0xff]  ;;  %v3360_v37 = vld [vmem:[#allocation19 + $0x580] sm:$0xff] }
 0xd6d   :  { %6605 = vmatpush1.bf16.msra.mxu1 %v6604_v47  ;;  %v3106_v47 = vld [vmem:[#allocation19 + $0x3e0] sm:$0xff] }
 0xd6e   :  { %6607 = vmatprep.subr.bf16.mxu1 %v6606_v48  ;;  %v6644_v48 = vpack.c.bf16 %v3106_v47, %v3102_v45  ;;  %v3373_v45 = vld [vmem:[#allocation19 + $0x5e8] sm:$0xff] }
 0xd71   :  { %6609 = vmatpush1.bf16.msra.mxu1 %v6608_v54  ;;  %v328_v54 = vld [vmem:[#allocation8 + $0x8] sm:$0xff] }
 0xd72   :  { %6611 = vmatprep.subr.bf16.mxu1 %v6610_v57  ;;  %v8272_v57 = vadd.f32 %v328_v54, %v8268_v53  ;;  %v3372_v54 = vld [vmem:[#allocation19 + $0x5e0] sm:$0xff] }
 0xd73   :  { %v6708_v1 = vpack.c.bf16 %v3372_v54, %v3368_v50 }
 0xd75   :  { %6613 = vmatpush1.bf16.msra.mxu1 %v6612_v51  ;;  %v330_v51 = vld [vmem:[#allocation8 + $0x18] sm:$0xff] }
 0xd76   :  { %6615 = vmatprep.subr.bf16.mxu1 %v6614_v10  ;;  %v8286_v10 = vadd.f32 %v330_v51, %v8282_v42  ;;  %v7618_v51 = vmov 0.0|0.0  }
 0xd78   :  { %3033 = vmatmul.mubr.f32.vlgmr.msra.gmra.mrb[38].mxu1 %v8248_v8  ;;  %v3074_v8 = vld [vmem:[#allocation19 + $0x2e0] sm:$0xff] }
 0xd79   :  { %6617 = vmatpush1.bf16.msra.mxu1 %v6616_v16  ;;  %3038 = vmatprep.mubr.f32.mxu1 %v7616_v0  ;;  %v6628_v36 = vpack.c.bf16 %v3074_v8, %v3070_v44  ;;  %v3316_v16 = vld [vmem:[#allocation19 + $0x420] sm:$0xff]  ;;  %v3337_v44 = vld [vmem:[#allocation19 + $0x4c8] sm:$0xff] }
 0xd7a   :  { %6619 = vmatprep.subr.bf16.mxu1 %v6618_v17  ;;  %v6680_v17 = vpack.c.bf16 %v3316_v16, %v3312_v15  ;;  %v3341_v8 = vld [vmem:[#allocation19 + $0x4e8] sm:$0xff] }
 0xd7b   :  { %v6690_v55 = vpack.c.bf16 %v3341_v8, %v3337_v44  ;;  %v8323_v8 = vld [vmem:[#allocation20] ss:$4 sm:$0xf] }
 0xd7c   :  { %3039 = vmatmul.mubr.f32.gmra.mrb[40].mxu1 %v8255_v25  ;;  %v6632_v25 = vpack.c.bf16 %v3082_v58, %v3078_v28  ;;  %v3345_v28 = vld [vmem:[#allocation19 + $0x508] sm:$0xff] }
 0xd7d   :  { %6621 = vmatpush1.bf16.msra.mxu1 %v6620_v13  ;;  %3197 = vmatprep.mubr.f32.mxu1 %v7616_v0  ;;  %v3324_v13 = vld [vmem:[#allocation19 + $0x460] sm:$0xff]  ;;  %v3349_v58 = vld [vmem:[#allocation19 + $0x528] sm:$0xff] }
 0xd7e   :  { %6623 = vmatprep.subr.bf16.mxu1 %v6622_v56  ;;  %v6684_v56 = vpack.c.bf16 %v3324_v13, %v3320_v20  ;;  %v6694_v5 = vpack.c.bf16 %v3349_v58, %v3345_v28  ;;  %v2874_v28 = vrot.slane %v8323_v8, %v8075_v6 }
 0xd81   :  { %6625 = vmatpush1.bf16.msra.mxu1 %v6624_v23  ;;  %v3332_v23 = vld [vmem:[#allocation19 + $0x4a0] sm:$0xff] }
 0xd82   :  { %6627 = vmatprep.subr.bf16.mxu1 %v6626_v24  ;;  %v6688_v24 = vpack.c.bf16 %v3332_v23, %v3328_v7 }
 0xd85   :  { %6629 = vmatpush1.bf16.msra.mxu1 %v6628_v36  ;;  %v3340_v36 = vld [vmem:[#allocation19 + $0x4e0] sm:$0xff] }
 0xd86   :  { %6631 = vmatprep.subr.bf16.mxu1 %v6630_v27  ;;  %v6692_v27 = vpack.c.bf16 %v3340_v36, %v3336_v21 }
 0xd89   :  { %6633 = vmatpush1.bf16.msra.mxu1 %v6632_v25  ;;  %v3348_v25 = vld [vmem:[#allocation19 + $0x520] sm:$0xff] }
 0xd8a   :  { %6635 = vmatprep.subr.bf16.mxu1 %v6634_v29  ;;  %v3353_v29 = vld [vmem:[#allocation19 + $0x548] sm:$0xff]  ;;  %v6696_v62 = vpack.c.bf16 %v3348_v25, %v3344_v3 }
 0xd8b   :  { %v6698_v31 = vpack.c.bf16 %v3357_v30, %v3353_v29 }
 0xd8d   :  { %6637 = vmatpush1.bf16.msra.mxu1 %v6636_v34  ;;  %v3356_v34 = vld [vmem:[#allocation19 + $0x560] sm:$0xff] }
 0xd8e   :  { %6639 = vmatprep.subr.bf16.mxu1 %v6638_v9  ;;  %v3361_v9 = vld [vmem:[#allocation19 + $0x588] sm:$0xff]  ;;  %v6700_v26 = vpack.c.bf16 %v3356_v34, %v3352_v33 }
 0xd8f   :  { %v6702_v4 = vpack.c.bf16 %v3365_v35, %v3361_v9  ;;  %v8341_v9 = vld [vmem:[#allocation20 + $0x2] ss:$4 sm:$0xf] }
 0xd90   :  { %v3382_v35 = vrot.slane %v8341_v9, %v8075_v6 }
 0xd91   :  { %6641 = vmatpush1.bf16.msra.mxu1 %v6640_v41  ;;  %v3364_v41 = vld [vmem:[#allocation19 + $0x5a0] sm:$0xff] }
 0xd92   :  { %6643 = vmatprep.subr.bf16.mxu1 %v6642_v43  ;;  %v3369_v43 = vld [vmem:[#allocation19 + $0x5c8] sm:$0xff]  ;;  %v6704_v47 = vpack.c.bf16 %v3364_v41, %v3360_v37 }
 0xd95   :  { %6645 = vmatpush1.bf16.msra.mxu1 %v6644_v48  ;;  %v6706_v48 = vpack.c.bf16 %v3373_v45, %v3369_v43 }
 0xd96   :  { %6679 = vmatprep.subr.bf16.mxu1 %v6678_v14 }
 0xd98   :  { %3198 = vmatmul.mubr.f32.vlgmr.msra.gmra.mrb[42].mxu1 %v8266_v52 }
 0xd99   :  { %3203 = vmatprep.mubr.f32.mxu1 %v7616_v0  ;;  %6681 = vmatpush1.bf16.msra.mxu1 %v6680_v17 }
 0xd9a   :  { %6683 = vmatprep.subr.bf16.mxu1 %v6682_v32  ;;  %v8313_v32 = vld [vmem:[#allocation20 + $0x1] ss:$4 sm:$0xf] }
 0xd9b   :  { %v3116_v13 = vrot.slane %v8313_v32, %v8075_v6  ;;  %v3120_v22 = vrot.slane %v8313_v32, %v8053_v38 }
 0xd9c   :  { %3204 = vmatmul.mubr.f32.gmra.mrb[44].mxu1 %v8272_v57 }
 0xd9d   :  { %3209 = vmatprep.mubr.f32.mxu1 %v7616_v0  ;;  %6685 = vmatpush1.bf16.msra.mxu1 %v6684_v56 }
 0xd9e   :  { %6687 = vmatprep.subr.bf16.mxu1 %v6686_v59 }
 0xda0   :  { %3210 = vmatmul.mubr.f32.gmra.mrb[46].mxu1 %v8279_v2 }
 0xda1   :  { %3215 = vmatprep.mubr.f32.mxu1 %v7616_v0  ;;  %6689 = vmatpush1.bf16.msra.mxu1 %v6688_v24 }
 0xda2   :  { %6691 = vmatprep.subr.bf16.mxu1 %v6690_v55 }
 0xda4   :  { %3216 = vmatmul.mubr.f32.gmra.mrb[48].mxu1 %v8286_v10 }
 0xda5   :  { %3463 = vmatprep.mubr.f32.mxu1 %v7616_v0  ;;  %6693 = vmatpush1.bf16.msra.mxu1 %v6692_v27 }
 0xda6   :  { %6695 = vmatprep.subr.bf16.mxu1 %v6694_v5 }
 0xda9   :  { %6697 = vmatpush1.bf16.msra.mxu1 %v6696_v62 }
 0xdaa   :  { %6699 = vmatprep.subr.bf16.mxu1 %v6698_v31 }
 0xdad   :  { %6701 = vmatpush1.bf16.msra.mxu1 %v6700_v26 }
 0xdae   :  { %6703 = vmatprep.subr.bf16.mxu1 %v6702_v4  ;;  %v3386_v4 = vrot.slane %v8341_v9, %v8053_v38 }
 0xdb1   :  { %6705 = vmatpush1.bf16.msra.mxu1 %v6704_v47 }
 0xdb2   :  { %6707 = vmatprep.subr.bf16.mxu1 %v6706_v48 }
 0xdb5   :  { %6709 = vmatpush1.bf16.msra.mxu1 %v6708_v1 }
 0xdb6   :  { %6742 = vmatprep.subr.bf16.mxu1 %v7618_v51 }
 0xdb8   :  { %3464 = vmatmul.mubr.f32.vlgmr.msra.gmra.mrb[50].mxu1 %v8263_v49 }
 0xdb9   :  { %3469 = vmatprep.mubr.f32.mxu1 %v7616_v0 }
 0xdbc   :  { %3470 = vmatmul.mubr.f32.gmra.mrb[52].mxu1 %v8268_v53 }
 0xdbd   :  { %3475 = vmatprep.mubr.f32.mxu1 %v7616_v0 }
 0xdc0   :  { %3476 = vmatmul.mubr.f32.gmra.mrb[54].mxu1 %v8275_v46 }
 0xdc1   :  { %3481 = vmatprep.mubr.f32.mxu1 %v7616_v0 }
 0xdc4   :  { %3482 = vmatmul.mubr.f32.gmra.mrb[56].mxu1 %v8282_v42 }
 0xdc5   :  { %5912 = vmatprep.mubr.msk.f32.mxu1 %vm7617_vm0, %v7616_v0 }
 0xe2b   :  { %v2957_v60 = vpop.f32.mrb[34].mxu1 }
 0xe2c   :  { %v8301_v12 = vpop.f32.mrb[35].mxu1  ;;  %v2958_v29 = vadd.f32 %v2957_v60, %v2874_v28 }
 0xe2f   :  { %v2963_v14 = vpop.f32.mrb[36].mxu1 }
 0xe30   :  { %v8303_v15 = vpop.f32.mrb[37].mxu1  ;;  %v2964_v34 = vadd.f32 %v2963_v14, %v2874_v28 }
 0xe4b   :  { %v8305_v16 = vpop.f32.mrb[38].mxu1 }
 0xe4c   :  { %v8307_v17 = vpop.f32.mrb[39].mxu1 }
 0xe4f   :  { %v8309_v11 = vpop.f32.mrb[40].mxu1 }
 0xe50   :  { %v8311_v19 = vpop.f32.mrb[41].mxu1 }
 0xe6b   :  { %v3199_v20 = vpop.f32.mrb[42].mxu1 }
 0xe6c   :  { %v3201_v56 = vpop.f32.mrb[43].mxu1  ;;  %v3200_v59 = vadd.f32 %v3199_v20, %v3116_v13 }
 0xe6d   :  { %v8319_v24 = vadd.f32 %v3201_v56, %v3120_v22 }
 0xe6f   :  { %v3205_v40 = vpop.f32.mrb[44].mxu1 }
 0xe70   :  { %v3206_v7 = vadd.f32 %v3205_v40, %v3116_v13  ;;  %v3207_v23 = vpop.f32.mrb[45].mxu1 }
 0xe71   :  { %v8321_v44 = vadd.f32 %v3207_v23, %v3120_v22 }
 0xe72   :  { %v6743_v55 = vpack.c.bf16 %v3206_v7, %v3200_v59 }
 0xe73   :  { %v6755_v21 = vpack.c.bf16 %v8321_v44, %v8319_v24  ;;  %v3211_v36 = vpop.f32.mrb[46].mxu1  ;;  %v3048_v44 = vld [vmem:[#allocation19 + $0x210] sm:$0xff] }
 0xe74   :  { %6744 = vmatpush3.bf16.xpose.msra.mxu1 %v6743_v55  ;;  %v3213_v27 = vpop.f32.mrb[47].mxu1  ;;  %v3212_v3 = vadd.f32 %v3211_v36, %v3116_v13 }
 0xe75   :  { %6745 = vmatprep.subr.bf16.mxu1 %v7618_v51  ;;  %v8330_v30 = vadd.f32 %v3213_v27, %v3120_v22 }
 0xe77   :  { %v3217_v58 = vpop.f32.mrb[48].mxu1 }
 0xe78   :  { %v3218_v5 = vadd.f32 %v3217_v58, %v3116_v13  ;;  %v3219_v25 = vpop.f32.mrb[49].mxu1 }
 0xe79   :  { %v8332_v62 = vadd.f32 %v3219_v25, %v3120_v22 }
 0xe7a   :  { %v6746_v31 = vpack.c.bf16 %v3218_v5, %v3212_v3 }
 0xe7b   :  { %5913 = vmatmul.mubr.f32.vlgmr.msra.gmra.mrb[58].mxu1 %v2958_v29  ;;  %v6758_v33 = vpack.c.bf16 %v8332_v62, %v8330_v30  ;;  %v3052_v30 = vld [vmem:[#allocation19 + $0x230] sm:$0xff]  ;;  %v3057_v62 = vld [vmem:[#allocation19 + $0x258] sm:$0xff] }
 0xe7c   :  { %6747 = vmatpush3.bf16.xpose.msra.mxu1 %v6746_v31  ;;  %5919 = vmatprep.mubr.msk.f32.mxu1 %vm7617_vm0, %v7616_v0 }
 0xe7d   :  { %6748 = vmatprep.subr.bf16.mxu1 %v7618_v51 }
 0xe83   :  { %5920 = vmatmul.mubr.f32.vlgmr.msra.gmra.mrb[60].mxu1 %v2964_v34 }
 0xe84   :  { %5926 = vmatprep.mubr.msk.f32.mxu1 %vm7617_vm0, %v7616_v0 }
 0xe8b   :  { %v3465_v26 = vpop.f32.mrb[50].mxu1 }
 0xe8c   :  { %v3467_v37 = vpop.f32.mrb[51].mxu1  ;;  %v3466_v41 = vadd.f32 %v3465_v26, %v3382_v35 }
 0xe8d   :  { %v8347_v43 = vadd.f32 %v3467_v37, %v3386_v4 }
 0xe8f   :  { %v3471_v45 = vpop.f32.mrb[52].mxu1 }
 0xe90   :  { %v3472_v47 = vadd.f32 %v3471_v45, %v3382_v35  ;;  %v3473_v48 = vpop.f32.mrb[53].mxu1 }
 0xe91   :  { %v3474_v50 = vadd.f32 %v3473_v48, %v3386_v4 }
 0xe92   :  { %v6749_v54 = vpack.c.bf16 %v3472_v47, %v3466_v41 }
 0xe93   :  { %v6761_v1 = vpack.c.bf16 %v3474_v50, %v8347_v43  ;;  %v3477_v60 = vpop.f32.mrb[54].mxu1 }
 0xe94   :  { %v3478_v14 = vadd.f32 %v3477_v60, %v3382_v35  ;;  %v3479_v20 = vpop.f32.mrb[55].mxu1  ;;  %6750 = vmatpush3.bf16.msra.mxu1 %v6749_v54  ;;  %v2878_v54 = vrot.slane %v8323_v8, %v8053_v38  ;;  %v3049_v38 = vld [vmem:[#allocation19 + $0x218] sm:$0xff] }
 0xe95   :  { %v8350_v6 = vadd.f32 %v3479_v20, %v3386_v4  ;;  %6751 = vmatprep.subr.bf16.mxu1 %v7618_v51 }
 0xe96   :  { %v2960_v60 = vadd.f32 %v8301_v12, %v2878_v54  ;;  %v2966_v24 = vadd.f32 %v8303_v15, %v2878_v54  ;;  %v3053_v12 = vld [vmem:[#allocation19 + $0x238] sm:$0xff] }
 0xe97   :  { %v3483_v13 = vpop.f32.mrb[56].mxu1  ;;  %v3069_v15 = vld [vmem:[#allocation19 + $0x2b8] sm:$0xff] }
 0xe98   :  { %v3484_v56 = vadd.f32 %v3483_v13, %v3382_v35  ;;  %v3485_v22 = vpop.f32.mrb[57].mxu1  ;;  %v3056_v13 = vld [vmem:[#allocation19 + $0x250] sm:$0xff] }
 0xe99   :  { %v8353_v40 = vadd.f32 %v3485_v22, %v3386_v4  ;;  %v3065_v22 = vld [vmem:[#allocation19 + $0x298] sm:$0xff] }
 0xe9a   :  { %v6752_v59 = vpack.c.bf16 %v3484_v56, %v3478_v14  ;;  %v6648_v14 = vpack.c.bf16 %v3052_v30, %v3048_v44  ;;  %v3060_v56 = vld [vmem:[#allocation19 + $0x270] sm:$0xff]  ;;  %v3109_v44 = vld [vmem:[#allocation19 + $0x3f8] sm:$0xff] }
 0xe9b   :  { %v6764_v7 = vpack.c.bf16 %v8353_v40, %v8350_v6  ;;  %v2882_v6 = vrot.slane %v8323_v8, %v8121_v61 }
 0xe9d   :  { %v3035_v40 = vadd.f32 %v8305_v16, %v2882_v6  ;;  %v617_v16 = vld [vmem:[#allocation22 + $0xf0] sm:$0xff] }
 0xf4e   :  { %v3644_v23 = vpop.f32.mrb[58].mxu1 }
 0xf4f   :  { %v5914_v55 = vpop.f32.mrb[59].mxu1  ;;  %v3719_v36 = vsel %vm3718_vm2, %v3644_v23, -inf }
 0xf50   :  { %3720 = vmax.xlane.f32.xlu0 %v3719_v36  ;;  %v3068_v55 = vld [vmem:[#allocation19 + $0x2b0] sm:$0xff]  ;;  %v3073_v36 = vld [vmem:[#allocation19 + $0x2d8] sm:$0xff] }
 0xf56   :  { %v3714_v27 = vpop.f32.mrb[60].mxu1 }
 0xf57   :  { %v5921_v28 = vpop.f32.mrb[61].mxu1  ;;  %v3722_v58 = vsel %vm3718_vm2, %v3714_v27, -inf }
 0xf58   :  { %3723 = vmax.xlane.f32.xlu1 %v3722_v58 }
 0xfdd   :  { %v3721_v3 = vpop.xlane.xlu0 %3720 }
 0xfde   :  { %v3725_v5 = vsub.f32 %v3644_v23, %v3721_v3  ;;  %v3064_v23 = vld [vmem:[#allocation19 + $0x290] sm:$0xff] }
 0xfdf   :  { %v6656_v28 = vpack.c.bf16 %v3068_v55, %v3064_v23  ;;  %v3072_v3 = vld [vmem:[#allocation19 + $0x2d0] sm:$0xff] }
 0xfe0   :  { %v3727_v25 = vmul.f32 1.442695, %v3725_v5  ;;  %v3076_v5 = vld [vmem:[#allocation19 + $0x2f0] sm:$0xff] }
 0xfe2   :  { %7060 = vpow2.f32 %v3727_v25  ;;  %v3081_v25 = vld [vmem:[#allocation19 + $0x318] sm:$0xff] }
 0xfe5   :  { %v3724_v29 = vpop.xlane.xlu1 %3723 }
 0xfe6   :  { %v3726_v31 = vsub.f32 %v3714_v27, %v3724_v29  ;;  %v3077_v27 = vld [vmem:[#allocation19 + $0x2f8] sm:$0xff] }
 0xfe7   :  { %v6658_v58 = vpack.c.bf16 %v3077_v27, %v3073_v36  ;;  %v3085_v29 = vld [vmem:[#allocation19 + $0x338] sm:$0xff] }
 0xfe8   :  { %v3729_v34 = vmul.f32 1.442695, %v3726_v31  ;;  %v6660_v31 = vpack.c.bf16 %v3076_v5, %v3072_v3 }
 0xfea   :  { %7062 = vpow2.f32 %v3729_v34  ;;  %v6662_v34 = vpack.c.bf16 %v3085_v29, %v3081_v25 }
 0xfec   :  { %v7061_v35 = vpop.eup %7060 }
 0xfed   :  { %v3731_v26 = vsel %vm3718_vm2, %v7061_v35, 0.0 }
 0xfee   :  { %3732 = vadd.xlane.f32.xlu0 %v3731_v26  ;;  %v3084_v26 = vld [vmem:[#allocation19 + $0x330] sm:$0xff] }
 0xff4   :  { %v7063_v4 = vpop.eup %7062 }
 0xff5   :  { %v3734_v37 = vsel %vm3718_vm2, %v7063_v4, 0.0 }
 0xff6   :  { %3735 = vadd.xlane.f32.xlu1 %v3734_v37  ;;  %v3093_v37 = vld [vmem:[#allocation19 + $0x378] sm:$0xff] }
0x107b   :  { %v3733_v41 = vpop.xlane.xlu0 %3732 }
0x107c   :  { %7064 = vrcp.f32 %v3733_v41 }
0x1083   :  { %v3736_v43 = vpop.xlane.xlu1 %3735 }
0x1084   :  { %7066 = vrcp.f32 %v3736_v43 }
0x1086   :  { %v7065_v45 = vpop.eup %7064 }
0x1087   :  { %v3738_v47 = vmul.f32 %v7065_v45, %v7061_v35  ;;  %v3080_v35 = vld [vmem:[#allocation19 + $0x310] sm:$0xff] }
0x1088   :  { %v6664_v41 = vpack.c.bf16 %v3084_v26, %v3080_v35  ;;  %v3088_v45 = vld [vmem:[#allocation19 + $0x350] sm:$0xff]  ;;  %v3128_v35 = vrot.slane %v8313_v32, %v8126_v63 }
0x1089   :  { %5927 = vmatmul.mubr.msk.f32.vlgmr.msra.gmra.mrb[62].mxu1 %vm3718_vm2, %v3738_v47  ;;  %v3092_v47 = vld [vmem:[#allocation19 + $0x370] sm:$0xff] }
0x108a   :  { %6753 = vmatpush3.bf16.msra.mxu1 %v6752_v59  ;;  %5933 = vmatprep.mubr.msk.f32.mxu1 %vm7617_vm0, %v7616_v0  ;;  %v6654_v59 = vpack.c.bf16 %v3069_v15, %v3065_v22  ;;  %v6668_v54 = vpack.c.bf16 %v3092_v47, %v3088_v45 }
0x108b   :  { %6754 = vmatprep.subr.bf16.mxu1 %v7618_v51 }
0x108e   :  { %v7067_v48 = vpop.eup %7066 }
0x108f   :  { %v3740_v50 = vmul.f32 %v7067_v48, %v7063_v4  ;;  %v3089_v4 = vld [vmem:[#allocation19 + $0x358] sm:$0xff] }
0x1090   :  { %v6666_v43 = vpack.c.bf16 %v3093_v37, %v3089_v4  ;;  %v3097_v48 = vld [vmem:[#allocation19 + $0x398] sm:$0xff] }
0x1091   :  { %5934 = vmatmul.mubr.msk.f32.vlgmr.msra.gmra.mrb[64].mxu1 %vm3718_vm2, %v3740_v50  ;;  %v3101_v50 = vld [vmem:[#allocation19 + $0x3b8] sm:$0xff] }
0x1092   :  { %5940 = vmatprep.mubr.msk.f32.mxu1 %vm7617_vm0, %v7616_v0 }
0x1093   :  { %6756 = vmatpush3.bf16.xpose.msra.mxu1 %v6755_v21  ;;  %v6646_v21 = vpack.c.bf16 %v3053_v12, %v3049_v38  ;;  %v3100_v38 = vld [vmem:[#allocation19 + $0x3b0] sm:$0xff]  ;;  %v3105_v12 = vld [vmem:[#allocation19 + $0x3d8] sm:$0xff] }
0x1094   :  { %6757 = vmatprep.subr.bf16.mxu1 %v7618_v51  ;;  %v6674_v30 = vpack.c.bf16 %v3109_v44, %v3105_v12 }
0x1095   :  { %6647 = vmatprep.subr.bf16.mxu0 %v6646_v21 }
0x1096   :  { %6649 = vmatpush1.bf16.msra.mxu0 %v6648_v14 }
0x109a   :  { %5941 = vmatmul.mubr.f32.vlgmr.msra.gmra.mrb[66].mxu1 %v2960_v60  ;;  %v6670_v60 = vpack.c.bf16 %v3101_v50, %v3097_v48 }
0x109b   :  { %6759 = vmatpush3.bf16.xpose.msra.mxu1 %v6758_v33  ;;  %5947 = vmatprep.mubr.msk.f32.mxu1 %vm7617_vm0, %v7616_v0  ;;  %v3061_v33 = vld [vmem:[#allocation19 + $0x278] sm:$0xff] }
0x109c   :  { %6760 = vmatprep.subr.bf16.mxu1 %v7618_v51  ;;  %v6650_v20 = vpack.c.bf16 %v3061_v33, %v3057_v62  ;;  %v3104_v62 = vld [vmem:[#allocation19 + $0x3d0] sm:$0xff] }
0x109d   :  { %v3108_v33 = vld [vmem:[#allocation19 + $0x3f0] sm:$0xff] }
0x109e   :  { %6651 = vmatprep.subr.bf16.mxu0 %v6650_v20  ;;  %v6676_v14 = vpack.c.bf16 %v3108_v33, %v3104_v62  ;;  %v3315_v62 = vld [vmem:[#allocation19 + $0x418] sm:$0xff] }
0x109f   :  { %v3319_v33 = vld [vmem:[#allocation19 + $0x438] sm:$0xff] }
0x10a2   :  { %5948 = vmatmul.mubr.f32.vlgmr.msra.gmra.mrb[68].mxu1 %v2966_v24  ;;  %v3096_v24 = vld [vmem:[#allocation19 + $0x390] sm:$0xff] }
0x10a3   :  { %6762 = vmatpush3.bf16.msra.mxu1 %v6761_v1  ;;  %5954 = vmatprep.mubr.msk.f32.mxu1 %vm7617_vm0, %v7616_v0  ;;  %v6652_v1 = vpack.c.bf16 %v3060_v56, %v3056_v13  ;;  %v6672_v21 = vpack.c.bf16 %v3100_v38, %v3096_v24 }
0x10a4   :  { %6763 = vmatprep.subr.bf16.mxu1 %v7618_v51 }
0x10a5   :  { %6653 = vmatpush1.bf16.msra.mxu0 %v6652_v1 }
0x10a6   :  { %6655 = vmatprep.subr.bf16.mxu0 %v6654_v59 }
0x10a9   :  { %6657 = vmatpush1.bf16.msra.mxu0 %v6656_v28 }
0x10aa   :  { %6659 = vmatprep.subr.bf16.mxu0 %v6658_v58 }
0x10ad   :  { %6661 = vmatpush1.bf16.msra.mxu0 %v6660_v31 }
0x10ae   :  { %6663 = vmatprep.subr.bf16.mxu0 %v6662_v34  ;;  %v3124_v34 = vrot.slane %v8313_v32, %v8121_v61 }
0x10b1   :  { %6665 = vmatpush1.bf16.msra.mxu0 %v6664_v41 }
0x10b2   :  { %6667 = vmatprep.subr.bf16.mxu0 %v6666_v43 }
0x10b5   :  { %6669 = vmatpush1.bf16.msra.mxu0 %v6668_v54 }
0x10b6   :  { %6671 = vmatprep.subr.bf16.mxu0 %v6670_v60 }
0x10b9   :  { %6673 = vmatpush1.bf16.msra.mxu0 %v6672_v21 }
0x10ba   :  { %6675 = vmatprep.subr.bf16.mxu0 %v6674_v30 }
0x10bd   :  { %6677 = vmatpush1.bf16.msra.mxu0 %v6676_v14  ;;  %v3314_v14 = vld [vmem:[#allocation19 + $0x410] sm:$0xff] }
0x10c0   :  { %3287 = vmatmul.mubr.f32.vlgmr.msra.gmra.mrb[24].mxu0 %v8266_v52 }
0x10c1   :  { %3292 = vmatprep.mubr.f32.mxu0 %v7616_v0 }
0x10c4   :  { %3293 = vmatmul.mubr.f32.gmra.mrb[26].mxu0 %v8272_v57 }
0x10c5   :  { %3298 = vmatprep.mubr.f32.mxu0 %v7616_v0 }
0x10c8   :  { %3299 = vmatmul.mubr.f32.gmra.mrb[28].mxu0 %v8279_v2 }
0x10c9   :  { %3304 = vmatprep.mubr.f32.mxu0 %v7616_v0 }
0x10cc   :  { %3305 = vmatmul.mubr.f32.gmra.mrb[30].mxu0 %v8286_v10 }
0x10cd   :  { %3552 = vmatprep.mubr.f32.mxu0 %v7616_v0 }
0x115c   :  { %v8393_v20 = vpop.f32.mrb[62].mxu1 }
0x115d   :  { %v5928_v13 = vpop.f32.mrb[63].mxu1 }
0x115e   :  { %v6710_v13 = vpack.c.bf16 %v3319_v33, %v3315_v62  ;;  %v3355_v62 = vld [vmem:[#allocation19 + $0x558] sm:$0xff] }
0x115f   :  { %v3359_v33 = vld [vmem:[#allocation19 + $0x578] sm:$0xff] }
0x1160   :  { %6711 = vmatprep.subr.bf16.mxu0 %v6710_v13  ;;  %v6730_v13 = vpack.c.bf16 %v3359_v33, %v3355_v62  ;;  %v610_v62 = vld [vmem:[#allocation22 + $0xb8] sm:$0xff] }
0x1164   :  { %v8395_v56 = vpop.f32.mrb[64].mxu1 }
0x1165   :  { %v5935_v52 = vpop.f32.mrb[65].mxu1 }
0x1166   :  { %v3318_v52 = vld [vmem:[#allocation19 + $0x430] sm:$0xff] }
0x116d   :  { %v3953_v22 = vpop.f32.mrb[66].mxu1 }
0x116e   :  { %v5942_v15 = vpop.f32.mrb[67].mxu1  ;;  %v4027_v57 = vsel %vm3718_vm2, %v3953_v22, -inf }
0x116f   :  { %4028 = vmax.xlane.f32.xlu0 %v4027_v57  ;;  %v3327_v15 = vld [vmem:[#allocation19 + $0x478] sm:$0xff]  ;;  %v6712_v57 = vpack.c.bf16 %v3318_v52, %v3314_v14  ;;  %v3354_v52 = vld [vmem:[#allocation19 + $0x550] sm:$0xff] }
0x1171   :  { %6713 = vmatpush1.bf16.msra.mxu0 %v6712_v57  ;;  %v3367_v57 = vld [vmem:[#allocation19 + $0x5b8] sm:$0xff] }
0x1175   :  { %v4023_v1 = vpop.f32.mrb[68].mxu1 }
0x1176   :  { %v5949_v59 = vpop.f32.mrb[69].mxu1  ;;  %v4030_v2 = vsel %vm3718_vm2, %v4023_v1, -inf }
0x1177   :  { %4031 = vmax.xlane.f32.xlu1 %v4030_v2  ;;  %v3322_v59 = vld [vmem:[#allocation19 + $0x450] sm:$0xff] }
0x1178   :  { %v3326_v2 = vld [vmem:[#allocation19 + $0x470] sm:$0xff] }
0x1193   :  { %v3288_v29 = vpop.f32.mrb[24].mxu0 }
0x1194   :  { %v3290_v31 = vpop.f32.mrb[25].mxu0  ;;  %v8411_v37 = vadd.f32 %v3288_v29, %v3124_v34 }
0x1195   :  { %v8413_v41 = vadd.f32 %v3290_v31, %v3128_v35 }
0x1197   :  { %v3294_v26 = vpop.f32.mrb[26].mxu0 }
0x1198   :  { %v3296_v4 = vpop.f32.mrb[27].mxu0  ;;  %v8415_v43 = vadd.f32 %v3294_v26, %v3124_v34  ;;  %v3347_v26 = vld [vmem:[#allocation19 + $0x518] sm:$0xff] }
0x1199   :  { %v8417_v45 = vadd.f32 %v3296_v4, %v3128_v35  ;;  %v3351_v4 = vld [vmem:[#allocation19 + $0x538] sm:$0xff] }
0x119a   :  { %v6831_v47 = vpack.c.bf16 %v8415_v43, %v8411_v37  ;;  %v618_v43 = vld [vmem:[#allocation22 + $0xf8] sm:$0xff] }
0x119b   :  { %v6875_v48 = vpack.c.bf16 %v8417_v45, %v8413_v41  ;;  %v3300_v50 = vpop.f32.mrb[28].mxu0  ;;  %v633_v45 = vld [vmem:[#allocation22 + $0x170] sm:$0xff] }
0x119c   :  { %v3302_v54 = vpop.f32.mrb[29].mxu0  ;;  %v8423_v32 = vadd.f32 %v3300_v50, %v3124_v34 }
0x119d   :  { %v8425_v24 = vadd.f32 %v3302_v54, %v3128_v35  ;;  %v6726_v54 = vpack.c.bf16 %v3351_v4, %v3347_v26  ;;  %v606_v26 = vld [vmem:[#allocation22 + $0x98] sm:$0xff] }
0x119f   :  { %v3306_v60 = vpop.f32.mrb[30].mxu0 }
0x11a0   :  { %v8427_v38 = vadd.f32 %v3306_v60, %v3124_v34  ;;  %v3308_v12 = vpop.f32.mrb[31].mxu0  ;;  %v3338_v34 = vld [vmem:[#allocation19 + $0x4d0] sm:$0xff] }
0x11a1   :  { %v8429_v44 = vadd.f32 %v3308_v12, %v3128_v35  ;;  %v3342_v35 = vld [vmem:[#allocation19 + $0x4f0] sm:$0xff] }
0x11a2   :  { %v6834_v21 = vpack.c.bf16 %v8427_v38, %v8423_v32  ;;  %v6724_v50 = vpack.c.bf16 %v3342_v35, %v3338_v34  ;;  %v3346_v60 = vld [vmem:[#allocation19 + $0x510] sm:$0xff]  ;;  %v605_v35 = vld [vmem:[#allocation22 + $0x90] sm:$0xff]  ;;  %v588_v38 = vld [vmem:[#allocation22 + $0x8] sm:$0xff] }
0x11a3   :  { %v6878_v30 = vpack.c.bf16 %v8429_v44, %v8425_v24  ;;  %v3350_v12 = vld [vmem:[#allocation19 + $0x530] sm:$0xff]  ;;  %v6770_v4 = vpack.c.bf16 %v606_v26, %v605_v35  ;;  %v596_v26 = vld [vmem:[#allocation22 + $0x48] sm:$0xff] }
0x11a4   :  { %v6728_v14 = vpack.c.bf16 %v3350_v12, %v3346_v60  ;;  %v609_v12 = vld [vmem:[#allocation22 + $0xb0] sm:$0xff]  ;;  %v587_v32 = vld [vmem:[#allocation22] sm:$0xff] }
0x11a5   :  { %v6778_v33 = vpack.c.bf16 %v610_v62, %v609_v12  ;;  %v595_v35 = vld [vmem:[#allocation22 + $0x40] sm:$0xff]  ;;  %v597_v12 = vld [vmem:[#allocation22 + $0x50] sm:$0xff]  ;;  %v598_v62 = vld [vmem:[#allocation22 + $0x58] sm:$0xff] }
0x11fc   :  { %v4029_v23 = vpop.xlane.xlu0 %4028 }
0x11fd   :  { %v4033_v10 = vsub.f32 %v3953_v22, %v4029_v23  ;;  %v3323_v22 = vld [vmem:[#allocation19 + $0x458] sm:$0xff] }
0x11fe   :  { %v3331_v23 = vld [vmem:[#allocation19 + $0x498] sm:$0xff] }
0x11ff   :  { %v4035_v55 = vmul.f32 1.442695, %v4033_v10  ;;  %v3335_v10 = vld [vmem:[#allocation19 + $0x4b8] sm:$0xff] }
0x1201   :  { %7068 = vpow2.f32 %v4035_v55  ;;  %v6716_v55 = vpack.c.bf16 %v3326_v2, %v3322_v59  ;;  %v3362_v2 = vld [vmem:[#allocation19 + $0x590] sm:$0xff] }
0x1204   :  { %v4032_v36 = vpop.xlane.xlu1 %4031 }
0x1205   :  { %v4034_v27 = vsub.f32 %v4023_v1, %v4032_v36  ;;  %v6714_v1 = vpack.c.bf16 %v3327_v15, %v3323_v22  ;;  %v6718_v36 = vpack.c.bf16 %v3335_v10, %v3331_v23  ;;  %v3358_v22 = vld [vmem:[#allocation19 + $0x570] sm:$0xff]  ;;  %v3363_v15 = vld [vmem:[#allocation19 + $0x598] sm:$0xff] }
0x1206   :  { %v6734_v59 = vpack.c.bf16 %v3367_v57, %v3363_v15  ;;  %v3366_v23 = vld [vmem:[#allocation19 + $0x5b0] sm:$0xff]  ;;  %v3371_v10 = vld [vmem:[#allocation19 + $0x5d8] sm:$0xff] }
0x1207   :  { %v4037_v28 = vmul.f32 1.442695, %v4034_v27  ;;  %6715 = vmatprep.subr.bf16.mxu0 %v6714_v1  ;;  %v3330_v27 = vld [vmem:[#allocation19 + $0x490] sm:$0xff]  ;;  %v6732_v1 = vpack.c.bf16 %v3358_v22, %v3354_v52  ;;  %v613_v52 = vld [vmem:[#allocation22 + $0xd0] sm:$0xff]  ;;  %v614_v22 = vld [vmem:[#allocation22 + $0xd8] sm:$0xff] }
0x1208   :  { %6717 = vmatpush1.bf16.msra.mxu0 %v6716_v55  ;;  %v3375_v55 = vld [vmem:[#allocation19 + $0x5f8] sm:$0xff] }
0x1209   :  { %7070 = vpow2.f32 %v4037_v28  ;;  %v3334_v28 = vld [vmem:[#allocation19 + $0x4b0] sm:$0xff]  ;;  %6719 = vmatprep.subr.bf16.mxu0 %v6718_v36  ;;  %v6736_v36 = vpack.c.bf16 %v3366_v23, %v3362_v2  ;;  %v589_v23 = vld [vmem:[#allocation22 + $0x10] sm:$0xff] }
0x120a   :  { %v6720_v29 = vpack.c.bf16 %v3334_v28, %v3330_v27  ;;  %v6738_v27 = vpack.c.bf16 %v3375_v55, %v3371_v10  ;;  %v3370_v28 = vld [vmem:[#allocation19 + $0x5d0] sm:$0xff]  ;;  %v590_v10 = vld [vmem:[#allocation22 + $0x18] sm:$0xff] }
0x120b   :  { %v8399_v58 = vpop.eup %7068  ;;  %v6802_v55 = vpack.c.bf16 %v590_v10, %v589_v23 }
0x120c   :  { %v4039_v3 = vsel %vm3718_vm2, %v8399_v58, 0.0  ;;  %6721 = vmatpush1.bf16.msra.mxu0 %v6720_v29  ;;  %v604_v29 = vld [vmem:[#allocation22 + $0x88] sm:$0xff] }
0x120d   :  { %4040 = vadd.xlane.f32.xlu0 %v4039_v3  ;;  %v3339_v3 = vld [vmem:[#allocation19 + $0x4d8] sm:$0xff] }
0x1213   :  { %v8403_v5 = vpop.eup %7070 }
0x1214   :  { %v4042_v25 = vsel %vm3718_vm2, %v8403_v5, 0.0 }
0x1215   :  { %4043 = vadd.xlane.f32.xlu1 %v4042_v25  ;;  %v3343_v25 = vld [vmem:[#allocation19 + $0x4f8] sm:$0xff] }
0x1216   :  { %v6722_v31 = vpack.c.bf16 %v3343_v25, %v3339_v3  ;;  %v3374_v3 = vld [vmem:[#allocation19 + $0x5f0] sm:$0xff] }
0x1217   :  { %v603_v25 = vld [vmem:[#allocation22 + $0x80] sm:$0xff] }
0x1218   :  { %6723 = vmatprep.subr.bf16.mxu0 %v6722_v31  ;;  %v6740_v31 = vpack.c.bf16 %v3374_v3, %v3370_v28  ;;  %v6766_v34 = vpack.c.bf16 %v604_v29, %v603_v25  ;;  %v592_v28 = vld [vmem:[#allocation22 + $0x28] sm:$0xff]  ;;  %v593_v29 = vld [vmem:[#allocation22 + $0x30] sm:$0xff] }
0x1219   :  { %6725 = vmatpush1.bf16.msra.mxu0 %v6724_v50  ;;  %v607_v50 = vld [vmem:[#allocation22 + $0xa0] sm:$0xff] }
0x121a   :  { %6727 = vmatprep.subr.bf16.mxu0 %v6726_v54  ;;  %v608_v54 = vld [vmem:[#allocation22 + $0xa8] sm:$0xff] }
0x121b   :  { %v6774_v60 = vpack.c.bf16 %v608_v54, %v607_v50 }
0x121d   :  { %6729 = vmatpush1.bf16.msra.mxu0 %v6728_v14  ;;  %v611_v14 = vld [vmem:[#allocation22 + $0xc0] sm:$0xff] }
0x121e   :  { %6731 = vmatprep.subr.bf16.mxu0 %v6730_v13  ;;  %v612_v13 = vld [vmem:[#allocation22 + $0xc8] sm:$0xff] }
0x1221   :  { %6733 = vmatpush1.bf16.msra.mxu0 %v6732_v1 }
0x1222   :  { %6735 = vmatprep.subr.bf16.mxu0 %v6734_v59 }
0x1225   :  { %6737 = vmatpush1.bf16.msra.mxu0 %v6736_v36 }
0x1226   :  { %6739 = vmatprep.subr.bf16.mxu0 %v6738_v27  ;;  %v591_v27 = vld [vmem:[#allocation22 + $0x20] sm:$0xff] }
0x1227   :  { %v6806_v25 = vpack.c.bf16 %v592_v28, %v591_v27 }
0x1229   :  { %6741 = vmatpush1.bf16.msra.mxu0 %v6740_v31  ;;  %v594_v31 = vld [vmem:[#allocation22 + $0x38] sm:$0xff] }
0x122a   :  { %6767 = vmatprep.subr.bf16.mxu0 %v6766_v34 }
0x122c   :  { %3553 = vmatmul.mubr.f32.vlgmr.msra.gmra.mrb[32].mxu0 %v8263_v49  ;;  %v6782_v49 = vpack.c.bf16 %v612_v13, %v611_v14  ;;  %v600_v14 = vld [vmem:[#allocation22 + $0x68] sm:$0xff] }
0x122d   :  { %6769 = vmatpush3.bf16.msra.mxu0 %v6766_v34  ;;  %3558 = vmatprep.mubr.f32.mxu0 %v7616_v0  ;;  %v6810_v34 = vpack.c.bf16 %v594_v31, %v593_v29 }
0x122e   :  { %6771 = vmatprep.subr.bf16.mxu0 %v6770_v4 }
0x1230   :  { %3559 = vmatmul.mubr.f32.gmra.mrb[34].mxu0 %v8268_v53  ;;  %v6786_v53 = vpack.c.bf16 %v614_v22, %v613_v52 }
0x1231   :  { %6773 = vmatpush3.bf16.msra.mxu0 %v6770_v4  ;;  %3564 = vmatprep.mubr.f32.mxu0 %v7616_v0 }
0x1232   :  { %6775 = vmatprep.subr.bf16.mxu0 %v6774_v60 }
0x1234   :  { %3565 = vmatmul.mubr.f32.gmra.mrb[36].mxu0 %v8275_v46 }
0x1235   :  { %6777 = vmatpush3.bf16.msra.mxu0 %v6774_v60  ;;  %3570 = vmatprep.mubr.f32.mxu0 %v7616_v0  ;;  %v6814_v60 = vpack.c.bf16 %v596_v26, %v595_v35  ;;  %v619_v35 = vld [vmem:[#allocation22 + $0x100] sm:$0xff]  ;;  %v620_v26 = vld [vmem:[#allocation22 + $0x108] sm:$0xff] }
0x1236   :  { %6779 = vmatprep.subr.bf16.mxu0 %v6778_v33 }
0x1238   :  { %3571 = vmatmul.mubr.f32.gmra.mrb[38].mxu0 %v8282_v42 }
0x1239   :  { %6781 = vmatpush3.bf16.msra.mxu0 %v6778_v33  ;;  %v599_v33 = vld [vmem:[#allocation22 + $0x60] sm:$0xff] }
0x123a   :  { %6783 = vmatprep.subr.bf16.mxu0 %v6782_v49  ;;  %v6822_v22 = vpack.c.bf16 %v600_v14, %v599_v33  ;;  %v625_v33 = vld [vmem:[#allocation22 + $0x130] sm:$0xff]  ;;  %v626_v14 = vld [vmem:[#allocation22 + $0x138] sm:$0xff] }
0x123d   :  { %6785 = vmatpush3.bf16.msra.mxu0 %v6782_v49 }
0x123e   :  { %6787 = vmatprep.subr.bf16.mxu0 %v6786_v53 }
0x1241   :  { %6789 = vmatpush3.bf16.msra.mxu0 %v6786_v53  ;;  %v601_v53 = vld [vmem:[#allocation22 + $0x70] sm:$0xff] }
0x129a   :  { %v4041_v15 = vpop.xlane.xlu0 %4040 }
0x129b   :  { %7072 = vrcp.f32 %v4041_v15  ;;  %v602_v15 = vld [vmem:[#allocation22 + $0x78] sm:$0xff] }
0x12a2   :  { %v4044_v57 = vpop.xlane.xlu1 %4043 }
0x12a3   :  { %7074 = vrcp.f32 %v4044_v57  ;;  %v6826_v57 = vpack.c.bf16 %v602_v15, %v601_v53  ;;  %v629_v53 = vld [vmem:[#allocation22 + $0x150] sm:$0xff]  ;;  %v630_v15 = vld [vmem:[#allocation22 + $0x158] sm:$0xff] }
0x12a5   :  { %v7073_v46 = vpop.eup %7072 }
0x12a6   :  { %v4046_v1 = vmul.f32 %v7073_v46, %v8399_v58  ;;  %v615_v58 = vld [vmem:[#allocation22 + $0xe0] sm:$0xff] }
0x12a8   :  { %5955 = vmatmul.mubr.msk.f32.vlgmr.msra.gmra.mrb[70].mxu1 %vm3718_vm2, %v4046_v1 }
0x12a9   :  { %6765 = vmatpush3.bf16.msra.mxu1 %v6764_v7  ;;  %5961 = vmatprep.mubr.msk.f32.mxu1 %vm7617_vm0, %v7616_v0  ;;  %v3041_v7 = vadd.f32 %v8309_v11, %v2882_v6 }
0x12aa   :  { %6830 = vmatprep.subr.bf16.mxu1 %v7618_v51 }
0x12ad   :  { %v7075_v42 = vpop.eup %7074 }
0x12ae   :  { %v4048_v59 = vmul.f32 %v7075_v42, %v8403_v5  ;;  %v616_v5 = vld [vmem:[#allocation22 + $0xe8] sm:$0xff] }
0x12af   :  { %v6790_v37 = vpack.c.bf16 %v616_v5, %v615_v58 }
0x12b0   :  { %5962 = vmatmul.mubr.msk.f32.vlgmr.msra.gmra.mrb[72].mxu1 %vm3718_vm2, %v4048_v59 }
0x12b1   :  { %6038 = vmatprep.mubr.msk.f32.mxu1 %vm7617_vm0, %v7616_v0  ;;  %6791 = vmatprep.subr.bf16.mxu0 %v6790_v37 }
0x12b2   :  { %6832 = vmatpush3.bf16.xpose.msra.mxu1 %v6831_v47  ;;  %6793 = vmatpush3.bf16.msra.mxu0 %v6790_v37  ;;  %v6794_v47 = vpack.c.bf16 %v618_v43, %v617_v16  ;;  %v3390_v43 = vrot.slane %v8341_v9, %v8121_v61 }
0x12b3   :  { %6833 = vmatprep.subr.bf16.mxu1 %v7618_v51 }
0x12b4   :  { %6795 = vmatprep.subr.bf16.mxu0 %v6794_v47 }
0x12b6   :  { %6797 = vmatpush3.bf16.msra.mxu0 %v6794_v47  ;;  %v3394_v47 = vrot.slane %v8341_v9, %v8126_v63 }
0x12b9   :  { %6039 = vmatmul.mubr.f32.vlgmr.msra.gmra.mrb[74].mxu1 %v3035_v40 }
0x12ba   :  { %6835 = vmatpush3.bf16.xpose.msra.mxu1 %v6834_v21  ;;  %6045 = vmatprep.mubr.msk.f32.mxu1 %vm7617_vm0, %v7616_v0  ;;  %v6798_v21 = vpack.c.bf16 %v588_v38, %v587_v32 }
0x12bb   :  { %6836 = vmatprep.subr.bf16.mxu1 %v7618_v51 }
0x12bc   :  { %6799 = vmatprep.subr.bf16.mxu0 %v6798_v21 }
0x12c1   :  { %6046 = vmatmul.mubr.f32.vlgmr.msra.gmra.mrb[76].mxu1 %v3041_v7 }
0x12c2   :  { %6052 = vmatprep.mubr.msk.f32.mxu1 %vm7617_vm0, %v7616_v0 }
0x137b   :  { %v4118_v2 = vpop.f32.mrb[70].mxu1 }
0x137c   :  { %v5956_v11 = vpop.f32.mrb[71].mxu1  ;;  %5996 = vmatprep.mubr.f32.mxu0 %v4118_v2 }
0x1383   :  { %v4191_v36 = vpop.f32.mrb[72].mxu1 }
0x1384   :  { %v5963_v3 = vpop.f32.mrb[73].mxu1  ;;  %5997 = vmatmul.mubr.f32.vlgmr.msra.gmra.mrb[40].mxu0 %v4191_v36 }
0x1385   :  { %6801 = vmatpush3.bf16.msra.mxu0 %v6798_v21  ;;  %6031 = vmatprep.mubr.f32.mxu0 %v8393_v20  ;;  %v6818_v20 = vpack.c.bf16 %v598_v62, %v597_v12  ;;  %v623_v12 = vld [vmem:[#allocation22 + $0x120] sm:$0xff]  ;;  %v624_v62 = vld [vmem:[#allocation22 + $0x128] sm:$0xff] }
0x1386   :  { %6803 = vmatprep.subr.bf16.mxu0 %v6802_v55 }
0x1389   :  { %6805 = vmatpush3.bf16.msra.mxu0 %v6802_v55 }
0x138a   :  { %6807 = vmatprep.subr.bf16.mxu0 %v6806_v25 }
0x138c   :  { %v4411_v4 = vpop.f32.mrb[74].mxu1 }
0x138d   :  { %6809 = vmatpush3.bf16.msra.mxu0 %v6806_v25  ;;  %v6040_v50 = vpop.f32.mrb[75].mxu1  ;;  %v4485_v54 = vsel %vm3718_vm2, %v4411_v4, -inf }
0x138e   :  { %4486 = vmax.xlane.f32.xlu0 %v4485_v54  ;;  %6811 = vmatprep.subr.bf16.mxu0 %v6810_v34  ;;  %v6842_v50 = vpack.c.bf16 %v620_v26, %v619_v35  ;;  %v622_v54 = vld [vmem:[#allocation22 + $0x118] sm:$0xff]  ;;  %v639_v26 = vld [vmem:[#allocation22 + $0x1a0] sm:$0xff] }
0x1391   :  { %6813 = vmatpush3.bf16.msra.mxu0 %v6810_v34 }
0x1392   :  { %6815 = vmatprep.subr.bf16.mxu0 %v6814_v60 }
0x1394   :  { %v4481_v13 = vpop.f32.mrb[76].mxu1 }
0x1395   :  { %6817 = vmatpush3.bf16.msra.mxu0 %v6814_v60  ;;  %v6047_v49 = vpop.f32.mrb[77].mxu1  ;;  %v4488_v52 = vsel %vm3718_vm2, %v4481_v13, -inf }
0x1396   :  { %4489 = vmax.xlane.f32.xlu1 %v4488_v52  ;;  %6819 = vmatprep.subr.bf16.mxu0 %v6818_v20  ;;  %v627_v49 = vld [vmem:[#allocation22 + $0x140] sm:$0xff]  ;;  %v628_v52 = vld [vmem:[#allocation22 + $0x148] sm:$0xff] }
0x1399   :  { %6821 = vmatpush3.bf16.msra.mxu0 %v6818_v20  ;;  %v6850_v20 = vpack.c.bf16 %v624_v62, %v623_v12  ;;  %v643_v62 = vld [vmem:[#allocation22 + $0x1c0] sm:$0xff] }
0x139a   :  { %6823 = vmatprep.subr.bf16.mxu0 %v6822_v22 }
0x139d   :  { %6825 = vmatpush3.bf16.msra.mxu0 %v6822_v22  ;;  %v6858_v22 = vpack.c.bf16 %v628_v52, %v627_v49 }
0x139e   :  { %6827 = vmatprep.subr.bf16.mxu0 %v6826_v57 }
0x13a1   :  { %6829 = vmatpush3.bf16.msra.mxu0 %v6826_v57  ;;  %v6862_v57 = vpack.c.bf16 %v630_v15, %v629_v53 }
0x13a2   :  { %6843 = vmatprep.subr.bf16.mxu0 %v6842_v50 }
0x13a4   :  { %6032 = vmatmul.mubr.f32.vlgmr.msra.gmra.mrb[40].mxu0 %v8395_v56  ;;  %v3554_v56 = vpop.f32.mrb[32].mxu0 }
0x13a5   :  { %v3556_v16 = vpop.f32.mrb[33].mxu0  ;;  %v3555_v21 = vadd.f32 %v3554_v56, %v3390_v43  ;;  %6845 = vmatpush3.bf16.msra.mxu0 %v6842_v50 }
0x13a6   :  { %v3560_v32 = vpop.f32.mrb[34].mxu0  ;;  %v8486_v2 = vadd.f32 %v3556_v16, %v3394_v47 }
0x13a7   :  { %v3562_v38 = vpop.f32.mrb[35].mxu0  ;;  %v3561_v11 = vadd.f32 %v3560_v32, %v3390_v43 }
0x13a8   :  { %v8488_v23 = vadd.f32 %v3562_v38, %v3394_v47  ;;  %v3566_v36 = vpop.f32.mrb[36].mxu0 }
0x13a9   :  { %v6837_v10 = vpack.c.bf16 %v3561_v11, %v3555_v21  ;;  %v3568_v27 = vpop.f32.mrb[37].mxu0  ;;  %v3567_v9 = vadd.f32 %v3566_v36, %v3390_v43 }
0x13aa   :  { %v6881_v55 = vpack.c.bf16 %v8488_v23, %v8486_v2  ;;  %v3572_v61 = vpop.f32.mrb[38].mxu0  ;;  %v8493_v3 = vadd.f32 %v3568_v27, %v3394_v47 }
0x13ab   :  { %6838 = vmatpush3.bf16.msra.mxu1 %v6837_v10  ;;  %v3574_v28 = vpop.f32.mrb[39].mxu0  ;;  %v3573_v25 = vadd.f32 %v3572_v61, %v3390_v43  ;;  %v635_v61 = vld [vmem:[#allocation22 + $0x180] sm:$0xff] }
0x13ac   :  { %6839 = vmatprep.subr.bf16.mxu1 %v7618_v51  ;;  %v8495_v29 = vadd.f32 %v3574_v28, %v3394_v47  ;;  %v636_v28 = vld [vmem:[#allocation22 + $0x188] sm:$0xff] }
0x13ad   :  { %v6840_v31 = vpack.c.bf16 %v3573_v25, %v3567_v9  ;;  %v637_v9 = vld [vmem:[#allocation22 + $0x190] sm:$0xff]  ;;  %v6886_v25 = vpack.c.bf16 %v636_v28, %v635_v61  ;;  %v666_v28 = vld [vmem:[#allocation25 + $0x78] sm:$0xff] }
0x13ae   :  { %v6884_v34 = vpack.c.bf16 %v8495_v29, %v8493_v3  ;;  %v665_v61 = vld [vmem:[#allocation25 + $0x70] sm:$0xff] }
0x141b   :  { %v4487_v46 = vpop.xlane.xlu0 %4486 }
0x141c   :  { %v4491_v1 = vsub.f32 %v4411_v4, %v4487_v46  ;;  %v621_v4 = vld [vmem:[#allocation22 + $0x110] sm:$0xff] }
0x141d   :  { %v6846_v60 = vpack.c.bf16 %v622_v54, %v621_v4  ;;  %v640_v4 = vld [vmem:[#allocation22 + $0x1a8] sm:$0xff]  ;;  %v641_v54 = vld [vmem:[#allocation22 + $0x1b0] sm:$0xff] }
0x141e   :  { %v4493_v42 = vmul.f32 1.442695, %v4491_v1  ;;  %v6894_v50 = vpack.c.bf16 %v640_v4, %v639_v26 }
0x141f   :  { %6847 = vmatprep.subr.bf16.mxu0 %v6846_v60 }
0x1420   :  { %7076 = vpow2.f32 %v4493_v42  ;;  %6849 = vmatpush3.bf16.msra.mxu0 %v6846_v60  ;;  %v642_v60 = vld [vmem:[#allocation22 + $0x1b8] sm:$0xff] }
0x1421   :  { %6851 = vmatprep.subr.bf16.mxu0 %v6850_v20  ;;  %v6898_v12 = vpack.c.bf16 %v642_v60, %v641_v54 }
0x1423   :  { %v4490_v59 = vpop.xlane.xlu1 %4489 }
0x1424   :  { %v4492_v6 = vsub.f32 %v4481_v13, %v4490_v59  ;;  %v6854_v13 = vpack.c.bf16 %v626_v14, %v625_v33  ;;  %6853 = vmatpush3.bf16.msra.mxu0 %v6850_v20  ;;  %v644_v20 = vld [vmem:[#allocation22 + $0x1c8] sm:$0xff]  ;;  %v645_v14 = vld [vmem:[#allocation22 + $0x1d0] sm:$0xff] }
0x1425   :  { %v6902_v33 = vpack.c.bf16 %v644_v20, %v643_v62 }
0x1426   :  { %v4495_v40 = vmul.f32 1.442695, %v4492_v6  ;;  %6855 = vmatprep.subr.bf16.mxu0 %v6854_v13 }
0x1428   :  { %7078 = vpow2.f32 %v4495_v40  ;;  %6857 = vmatpush3.bf16.msra.mxu0 %v6854_v13  ;;  %v646_v13 = vld [vmem:[#allocation22 + $0x1d8] sm:$0xff] }
0x1429   :  { %6859 = vmatprep.subr.bf16.mxu0 %v6858_v22  ;;  %v6906_v49 = vpack.c.bf16 %v646_v13, %v645_v14 }
0x142a   :  { %v8474_v7 = vpop.eup %7076 }
0x142b   :  { %v4497_v58 = vsel %vm3718_vm2, %v8474_v7, 0.0 }
0x142c   :  { %4498 = vadd.xlane.f32.xlu0 %v4497_v58  ;;  %6861 = vmatpush3.bf16.msra.mxu0 %v6858_v22 }
0x142d   :  { %6863 = vmatprep.subr.bf16.mxu0 %v6862_v57 }
0x1430   :  { %6865 = vmatpush3.bf16.msra.mxu0 %v6862_v57 }
0x1432   :  { %v8478_v5 = vpop.eup %7078 }
0x1433   :  { %v4500_v37 = vsel %vm3718_vm2, %v8478_v5, 0.0 }
0x1434   :  { %4501 = vadd.xlane.f32.xlu1 %v4500_v37 }
0x14b9   :  { %v4499_v46 = vpop.xlane.xlu0 %4498 }
0x14ba   :  { %7080 = vrcp.f32 %v4499_v46 }
0x14c1   :  { %v4502_v1 = vpop.xlane.xlu1 %4501 }
0x14c2   :  { %7082 = vrcp.f32 %v4502_v1  ;;  %v647_v1 = vld [vmem:[#allocation22 + $0x1e0] sm:$0xff] }
0x14c4   :  { %v7081_v42 = vpop.eup %7080 }
0x14c5   :  { %v4504_v59 = vmul.f32 %v7081_v42, %v8474_v7  ;;  %v2886_v7 = vrot.slane %v8323_v8, %v8126_v63  ;;  %v631_v63 = vld [vmem:[#allocation22 + $0x160] sm:$0xff]  ;;  %v648_v42 = vld [vmem:[#allocation22 + $0x1e8] sm:$0xff] }
0x14c7   :  { %6053 = vmatmul.mubr.msk.f32.vlgmr.msra.gmra.mrb[78].mxu1 %vm3718_vm2, %v4504_v59  ;;  %v3037_v58 = vadd.f32 %v8307_v17, %v2886_v7  ;;  %v3043_v41 = vadd.f32 %v8311_v19, %v2886_v7  ;;  %v632_v17 = vld [vmem:[#allocation22 + $0x168] sm:$0xff]  ;;  %v6910_v59 = vpack.c.bf16 %v648_v42, %v647_v1 }
0x14c8   :  { %6841 = vmatpush3.bf16.msra.mxu1 %v6840_v31  ;;  %6059 = vmatprep.mubr.msk.f32.mxu1 %vm7617_vm0, %v7616_v0  ;;  %v6866_v8 = vpack.c.bf16 %v632_v17, %v631_v63  ;;  %v638_v31 = vld [vmem:[#allocation22 + $0x198] sm:$0xff]  ;;  %v5421_v17 = vld [vmem:[#allocation23] ss:$0 sm:$0xff] }
0x14c9   :  { %6874 = vmatprep.subr.bf16.mxu1 %v7618_v51  ;;  %v6890_v35 = vpack.c.bf16 %v638_v31, %v637_v9  ;;  %v6946_v9 = vpack.c.bf16 %v666_v28, %v665_v61  ;;  %v668_v31 = vld [vmem:[#allocation28 + $0x8] sm:$0xff] }
0x14ca   :  { %6867 = vmatprep.subr.bf16.mxu0 %v6866_v8 }
0x14cb   :  { %6869 = vmatpush3.bf16.msra.mxu0 %v6866_v8 }
0x14cc   :  { %v7083_v6 = vpop.eup %7082 }
0x14cd   :  { %v4506_v40 = vmul.f32 %v7083_v6, %v8478_v5  ;;  %v649_v6 = vld [vmem:[#allocation22 + $0x1f0] sm:$0xff] }
0x14cf   :  { %6060 = vmatmul.mubr.msk.f32.vlgmr.msra.gmra.mrb[80].mxu1 %vm3718_vm2, %v4506_v40  ;;  %v650_v40 = vld [vmem:[#allocation22 + $0x1f8] sm:$0xff] }
0x14d0   :  { %6101 = vmatprep.mubr.msk.f32.mxu1 %vm7617_vm0, %v7616_v0  ;;  %v6914_v7 = vpack.c.bf16 %v650_v40, %v649_v6  ;;  %v5423_v6 = vld [vmem:[#allocation32 + $0x1] ss:$0 sm:$0xff] }
0x14d1   :  { %6876 = vmatpush3.bf16.xpose.msra.mxu1 %v6875_v48  ;;  %v634_v48 = vld [vmem:[#allocation22 + $0x178] sm:$0xff] }
0x14d2   :  { %6877 = vmatprep.subr.bf16.mxu1 %v7618_v51  ;;  %v6870_v24 = vpack.c.bf16 %v634_v48, %v633_v45 }
0x14d4   :  { %6871 = vmatprep.subr.bf16.mxu0 %v6870_v24 }
0x14d5   :  { %6873 = vmatpush3.bf16.msra.mxu0 %v6870_v24 }
0x14d6   :  { %6887 = vmatprep.subr.bf16.mxu0 %v6886_v25 }
0x14d8   :  { %6102 = vmatmul.mubr.f32.vlgmr.msra.gmra.mrb[82].mxu1 %v3037_v58 }
0x14d9   :  { %6879 = vmatpush3.bf16.xpose.msra.mxu1 %v6878_v30  ;;  %6108 = vmatprep.mubr.msk.f32.mxu1 %vm7617_vm0, %v7616_v0 }
0x14da   :  { %6880 = vmatprep.subr.bf16.mxu1 %v7618_v51 }
0x14e0   :  { %6109 = vmatmul.mubr.f32.vlgmr.msra.gmra.mrb[84].mxu1 %v3043_v41  ;;  %v652_v41 = vld [vmem:[#allocation25 + $0x8] sm:$0xff] }
0x14e1   :  { %6882 = vmatpush3.bf16.msra.mxu1 %v6881_v55  ;;  %6115 = vmatprep.mubr.msk.f32.mxu1 %vm7617_vm0, %v7616_v0 }
0x14e2   :  { %6883 = vmatprep.subr.bf16.mxu1 %v7618_v51 }
0x159a   :  { %v4576_v19 = vpop.f32.mrb[78].mxu1 }
0x159b   :  { %v6054_v44 = vpop.f32.mrb[79].mxu1  ;;  %6094 = vmatprep.mubr.f32.mxu0 %v4576_v19 }
0x15a2   :  { %v4649_v30 = vpop.f32.mrb[80].mxu1 }
0x15a3   :  { %v6061_v5 = vpop.f32.mrb[81].mxu1  ;;  %6095 = vmatmul.mubr.f32.vlgmr.msra.gmra.mrb[40].mxu0 %v4649_v30 }
0x15a4   :  { %6889 = vmatpush3.bf16.msra.mxu0 %v6886_v25  ;;  %v667_v25 = vld [vmem:[#allocation28] sm:$0xff] }
0x15a5   :  { %6891 = vmatprep.subr.bf16.mxu0 %v6890_v35 }
0x15a8   :  { %6893 = vmatpush3.bf16.msra.mxu0 %v6890_v35  ;;  %v6950_v35 = vpack.c.bf16 %v668_v31, %v667_v25 }
0x15a9   :  { %6895 = vmatprep.subr.bf16.mxu0 %v6894_v50 }
0x15ab   :  { %v4796_v37 = vpop.f32.mrb[82].mxu1 }
0x15ac   :  { %v6103_v56 = vpop.f32.mrb[83].mxu1  ;;  %v4870_v51 = vsel %vm3718_vm2, %v4796_v37, -inf  ;;  %6897 = vmatpush3.bf16.msra.mxu0 %v6894_v50 }
0x15ad   :  { %4871 = vmax.xlane.f32.xlu0 %v4870_v51  ;;  %6899 = vmatprep.subr.bf16.mxu0 %v6898_v12  ;;  %v654_v56 = vld [vmem:[#allocation25 + $0x18] sm:$0xff] }
0x15b0   :  { %6901 = vmatpush3.bf16.msra.mxu0 %v6898_v12 }
0x15b1   :  { %6903 = vmatprep.subr.bf16.mxu0 %v6902_v33 }
0x15b3   :  { %v4866_v16 = vpop.f32.mrb[84].mxu1 }
0x15b4   :  { %v6110_v43 = vpop.f32.mrb[85].mxu1  ;;  %v4873_v47 = vsel %vm3718_vm2, %v4866_v16, -inf  ;;  %6905 = vmatpush3.bf16.msra.mxu0 %v6902_v33 }
0x15b5   :  { %4874 = vmax.xlane.f32.xlu1 %v4873_v47  ;;  %6907 = vmatprep.subr.bf16.mxu0 %v6906_v49  ;;  %v657_v43 = vld [vmem:[#allocation25 + $0x30] sm:$0xff]  ;;  %v658_v47 = vld [vmem:[#allocation25 + $0x38] sm:$0xff] }
0x15b8   :  { %6909 = vmatpush3.bf16.msra.mxu0 %v6906_v49 }
0x15b9   :  { %6911 = vmatprep.subr.bf16.mxu0 %v6910_v59 }
0x15bc   :  { %6913 = vmatpush3.bf16.msra.mxu0 %v6910_v59 }
0x15bd   :  { %6915 = vmatprep.subr.bf16.mxu0 %v6914_v7 }
0x15c0   :  { %6917 = vmatpush3.bf16.msra.mxu0 %v6914_v7 }
0x163a   :  { %v4872_v32 = vpop.xlane.xlu0 %4871 }
0x163b   :  { %v4876_v38 = vsub.f32 %v4796_v37, %v4872_v32  ;;  %v653_v37 = vld [vmem:[#allocation25 + $0x10] sm:$0xff]  ;;  %v6930_v32 = vpack.c.bf16 %v658_v47, %v657_v43  ;;  %v5424_v47 = vld [vmem:[#allocation26] ss:$0 sm:$0xff] }
0x163c   :  { %v6922_v51 = vpack.c.bf16 %v654_v56, %v653_v37  ;;  %v679_v56 = vld [vmem:[#allocation28 + $0x60] sm:$0xff] }
0x163d   :  { %v4878_v21 = vmul.f32 1.442695, %v4876_v38  ;;  %v659_v38 = vld [vmem:[#allocation25 + $0x40] sm:$0xff] }
0x163f   :  { %7084 = vpow2.f32 %v4878_v21  ;;  %v660_v21 = vld [vmem:[#allocation25 + $0x48] sm:$0xff] }
0x1642   :  { %v4875_v2 = vpop.xlane.xlu1 %4874 }
0x1643   :  { %v4877_v11 = vsub.f32 %v4866_v16, %v4875_v2  ;;  %v661_v2 = vld [vmem:[#allocation25 + $0x50] sm:$0xff] }
0x1645   :  { %v4880_v23 = vmul.f32 1.442695, %v4877_v11  ;;  %v6934_v11 = vpack.c.bf16 %v660_v21, %v659_v38 }
0x1647   :  { %7086 = vpow2.f32 %v4880_v23  ;;  %v662_v23 = vld [vmem:[#allocation25 + $0x58] sm:$0xff] }
0x1649   :  { %v7085_v10 = vpop.eup %7084 }
0x164a   :  { %v4882_v55 = vsel %vm3718_vm2, %v7085_v10, 0.0 }
0x164b   :  { %4883 = vadd.xlane.f32.xlu0 %v4882_v55  ;;  %v663_v55 = vld [vmem:[#allocation25 + $0x60] sm:$0xff] }
0x1651   :  { %v7087_v36 = vpop.eup %7086 }
0x1652   :  { %v4885_v27 = vsel %vm3718_vm2, %v7087_v36, 0.0 }
0x1653   :  { %4886 = vadd.xlane.f32.xlu1 %v4885_v27 }
0x16d8   :  { %v4884_v52 = vpop.xlane.xlu0 %4883 }
0x16d9   :  { %7088 = vrcp.f32 %v4884_v52 }
0x16e0   :  { %v4887_v22 = vpop.xlane.xlu1 %4886 }
0x16e1   :  { %7090 = vrcp.f32 %v4887_v22 }
0x16e3   :  { %v7089_v53 = vpop.eup %7088 }
0x16e4   :  { %v4889_v15 = vmul.f32 %v7089_v53, %v7085_v10  ;;  %v6938_v10 = vpack.c.bf16 %v662_v23, %v661_v2 }
0x16e6   :  { %6116 = vmatmul.mubr.msk.f32.vlgmr.msra.gmra.mrb[86].mxu1 %vm3718_vm2, %v4889_v15 }
0x16e7   :  { %6885 = vmatpush3.bf16.msra.mxu1 %v6884_v34  ;;  %6122 = vmatprep.mubr.msk.f32.mxu1 %vm7617_vm0, %v7616_v0  ;;  %v651_v0 = vld [vmem:[#allocation25] sm:$0xff] }
0x16e8   :  { %v6918_v63 = vpack.c.bf16 %v652_v41, %v651_v0  ;;  %v671_v41 = vld [vmem:[#allocation28 + $0x20] sm:$0xff] }
0x16ea   :  { %6919 = vmatprep.subr.bf16.mxu1 %v6918_v63 }
0x16eb   :  { %v7091_v57 = vpop.eup %7090 }
0x16ec   :  { %v4891_v46 = vmul.f32 %v7091_v57, %v7087_v36  ;;  %v664_v36 = vld [vmem:[#allocation25 + $0x68] sm:$0xff] }
0x16ed   :  { %v6942_v27 = vpack.c.bf16 %v664_v36, %v663_v55 }
0x16ee   :  { %6123 = vmatmul.mubr.msk.f32.vlgmr.msra.gmra.mrb[88].mxu1 %vm3718_vm2, %v4891_v46  ;;  %v5422_v46 = vld [vmem:[#allocation31 + $0x1] ss:$0 sm:$0xff] }
0x16ef   :  { %6921 = vmatpush3.bf16.msra.mxu1 %v6918_v63  ;;  %v672_v63 = vld [vmem:[#allocation28 + $0x28] sm:$0xff] }
0x16f0   :  { %6923 = vmatprep.subr.bf16.mxu1 %v6922_v51 }
0x16f3   :  { %6925 = vmatpush3.bf16.msra.mxu1 %v6922_v51  ;;  %v680_v51 = vld [vmem:[#allocation28 + $0x68] sm:$0xff] }
0x17b9   :  { %v4961_v58 = vpop.f32.mrb[86].mxu1 }
0x17ba   :  { %v6117_v3 = vpop.f32.mrb[87].mxu1  ;;  %6157 = vmatprep.mubr.f32.mxu0 %v4961_v58  ;;  %v669_v58 = vld [vmem:[#allocation28 + $0x10] sm:$0xff] }
0x17bb   :  { %v670_v3 = vld [vmem:[#allocation28 + $0x18] sm:$0xff] }
0x17bc   :  { %v6954_v0 = vpack.c.bf16 %v670_v3, %v669_v58 }
0x17c1   :  { %v5034_v29 = vpop.f32.mrb[88].mxu1 }
0x17c2   :  { %v6124_v34 = vpop.f32.mrb[89].mxu1  ;;  %6158 = vmatmul.mubr.f32.vlgmr.msra.gmra.mrb[40].mxu0 %v5034_v29 }
0x1895   :  { %v6159_v8 = vpop.f32.mrb[40].mxu0 }
0x1896   :  { %v5122_v45 = vadd.f32 %v6159_v8, %v5421_v17  ;;  %v5104_v48 = vpop.f32.mrb[41].mxu0  ;;  %v673_v8 = vld [vmem:[#allocation28 + $0x30] sm:$0xff] }
0x1897   :  { %v5121_v24 = vadd.f32 %v5421_v17, %v5104_v48  ;;  %v6958_v17 = vpack.c.bf16 %v672_v63, %v671_v41 }
0x1898   :  { %v8540_v19 = vadd.f32 %v5122_v45, %v8251_v39  ;;  %v655_v39 = vld [vmem:[#allocation25 + $0x20] sm:$0xff] }
0x1899   :  { %v8543_v44 = vadd.f32 %v5121_v24, %v8245_v18  ;;  %v656_v18 = vld [vmem:[#allocation25 + $0x28] sm:$0xff]  ;;  %v674_v45 = vld [vmem:[#allocation28 + $0x38] sm:$0xff] }
0x189a   :  { %5129 = vadd.xlane.f32.xlu1 %v8540_v19  ;;  %v5134_v30 = vmul.f32 %v8540_v19, %v8540_v19  ;;  %v6926_v16 = vpack.c.bf16 %v656_v18, %v655_v39  ;;  %v6962_v48 = vpack.c.bf16 %v674_v45, %v673_v8  ;;  %v675_v24 = vld [vmem:[#allocation28 + $0x40] sm:$0xff]  ;;  %v6974_v39 = vpack.c.bf16 %v680_v51, %v679_v56  ;;  %v681_v18 = vld [vmem:[#allocation28 + $0x70] sm:$0xff] }
0x189b   :  { %5127 = vadd.xlane.f32.xlu0 %v8543_v44  ;;  %v5133_v5 = vmul.f32 %v8543_v44, %v8543_v44 }
0x189c   :  { %6927 = vmatprep.subr.bf16.mxu1 %v6926_v16 }
0x189d   :  { %6929 = vmatpush3.bf16.msra.mxu1 %v6926_v16  ;;  %v682_v16 = vld [vmem:[#allocation28 + $0x78] sm:$0xff] }
0x189e   :  { %5137 = vadd.xlane.f32.xlu1 %v5134_v30  ;;  %6931 = vmatprep.subr.bf16.mxu1 %v6930_v32  ;;  %v677_v30 = vld [vmem:[#allocation28 + $0x50] sm:$0xff]  ;;  %v6978_v43 = vpack.c.bf16 %v682_v16, %v681_v18 }
0x189f   :  { %5135 = vadd.xlane.f32.xlu0 %v5133_v5  ;;  %v678_v5 = vld [vmem:[#allocation28 + $0x58] sm:$0xff] }
0x18a0   :  { %v6970_v37 = vpack.c.bf16 %v678_v5, %v677_v30 }
0x18a1   :  { %6933 = vmatpush3.bf16.msra.mxu1 %v6930_v32 }
0x18a2   :  { %6935 = vmatprep.subr.bf16.mxu1 %v6934_v11 }
0x18a5   :  { %6937 = vmatpush3.bf16.msra.mxu1 %v6934_v11 }
0x18a6   :  { %6939 = vmatprep.subr.bf16.mxu1 %v6938_v10 }
0x18a9   :  { %6941 = vmatpush3.bf16.msra.mxu1 %v6938_v10  ;;  %v5425_v10 = vld [vmem:[#allocation29] ss:$0 sm:$0xff] }
0x18aa   :  { %6943 = vmatprep.subr.bf16.mxu1 %v6942_v27 }
0x18ad   :  { %6945 = vmatpush3.bf16.msra.mxu1 %v6942_v27 }
0x18ae   :  { %6947 = vmatprep.subr.bf16.mxu1 %v6946_v9 }
0x18b1   :  { %6949 = vmatpush3.bf16.msra.mxu1 %v6946_v9 }
0x18b2   :  { %6951 = vmatprep.subr.bf16.mxu1 %v6950_v35 }
0x1927   :  { %v5130_v26 = vpop.xlane.xlu1 %5129 }
0x1928   :  { %v5132_v4 = vmul.f32 0.03125, %v5130_v26  ;;  %v5128_v50 = vpop.xlane.xlu0 %5127 }
0x1929   :  { %v5131_v54 = vmul.f32 0.03125, %v5128_v50 }
0x192a   :  { %v5142_v12 = vmul.f32 %v5132_v4, %v5132_v4  ;;  %v5146_v53 = vsub.f32 %v8540_v19, %v5132_v4  ;;  %v676_v19 = vld [vmem:[#allocation28 + $0x48] sm:$0xff] }
0x192b   :  { %v5138_v60 = vpop.xlane.xlu1 %5137  ;;  %v5141_v33 = vmul.f32 %v5131_v54, %v5131_v54  ;;  %v5145_v57 = vsub.f32 %v8543_v44, %v5131_v54  ;;  %v6966_v44 = vpack.c.bf16 %v676_v19, %v675_v24 }
0x192c   :  { %v5140_v62 = vmul.f32 0.03125, %v5138_v60  ;;  %v5136_v20 = vpop.xlane.xlu0 %5135 }
0x192d   :  { %v5139_v14 = vmul.f32 0.03125, %v5136_v20 }
0x192e   :  { %v5144_v13 = vsub.f32 %v5140_v62, %v5142_v12 }
0x192f   :  { %v5143_v49 = vsub.f32 %v5139_v14, %v5141_v33 }
0x1930   :  { %v5148_v52 = vadd.f32 1e-05, %v5144_v13 }
0x1931   :  { %v5147_v22 = vadd.f32 1e-05, %v5143_v49 }
0x1932   :  { %7092 = vrsqrt.f32 %v5148_v52 }
0x1933   :  { %7094 = vrsqrt.f32 %v5147_v22 }
0x193c   :  { %v7093_v15 = vpop.eup %7092 }
0x193d   :  { %v7095_v1 = vpop.eup %7094  ;;  %v5152_v42 = vmul.f32 %v7093_v15, %v5146_v53 }
0x193e   :  { %v5151_v59 = vmul.f32 %v7095_v1, %v5145_v57  ;;  %v5426_v57 = vld [vmem:[#allocation31 + $0x2] ss:$0 sm:$0xff] }
0x193f   :  { %v5158_v40 = vmul.f32 %v5422_v46, %v5152_v42  ;;  %v5427_v42 = vld [vmem:[#allocation32 + $0x2] ss:$0 sm:$0xff] }
0x1940   :  { %v5157_v7 = vmul.f32 %v5422_v46, %v5151_v59 }
0x1941   :  { %v5164_v34 = vadd.f32 %v5423_v6, %v5158_v40 }
0x1942   :  { %v5163_v29 = vadd.f32 %v5423_v6, %v5157_v7 }
0x1944   :  { %6192 = vmatprep.mubr.f32.mxu1 %v5163_v29 }
0x1945   :  { %6193 = vmatmul.mubr.f32.vlgmr.msra.gmra.mrb[90].mxu1 %v5164_v34 }
0x1946   :  { %6953 = vmatpush3.bf16.msra.mxu1 %v6950_v35 }
0x1947   :  { %6955 = vmatprep.subr.bf16.mxu1 %v6954_v0 }
0x194a   :  { %6957 = vmatpush3.bf16.msra.mxu1 %v6954_v0 }
0x194b   :  { %6959 = vmatprep.subr.bf16.mxu1 %v6958_v17 }
0x194e   :  { %6961 = vmatpush3.bf16.msra.mxu1 %v6958_v17 }
0x194f   :  { %6963 = vmatprep.subr.bf16.mxu1 %v6962_v48 }
0x1952   :  { %6965 = vmatpush3.bf16.msra.mxu1 %v6962_v48 }
0x1953   :  { %6967 = vmatprep.subr.bf16.mxu1 %v6966_v44 }
0x1956   :  { %6969 = vmatpush3.bf16.msra.mxu1 %v6966_v44 }
0x1957   :  { %6971 = vmatprep.subr.bf16.mxu1 %v6970_v37 }
0x195a   :  { %6973 = vmatpush3.bf16.msra.mxu1 %v6970_v37 }
0x195b   :  { %6975 = vmatprep.subr.bf16.mxu1 %v6974_v39 }
0x195e   :  { %6977 = vmatpush3.bf16.msra.mxu1 %v6974_v39 }
0x195f   :  { %6979 = vmatprep.subr.bf16.mxu1 %v6978_v43 }
0x1962   :  { %6981 = vmatpush3.bf16.msra.mxu1 %v6978_v43 }
0x1a18   :  { %v6194_v32 = vpop.f32.mrb[90].mxu1 }
0x1a19   :  { %v5244_v38 = vadd.f32 %v6194_v32, %v5424_v47  ;;  %v5238_v21 = vpop.f32.mrb[91].mxu1 }
0x1a1a   :  { %v5239_v2 = vadd.f32 %v5424_v47, %v5238_v21 }
0x1a1b   :  { %v5248_v23 = vmax.f32 %v5244_v38, 0.0 }
0x1a1c   :  { %v5247_v11 = vmax.f32 %v5239_v2, 0.0 }
0x1a1e   :  { %6227 = vmatprep.mubr.f32.mxu1 %v5247_v11 }
0x1a1f   :  { %6228 = vmatmul.mubr.f32.vlgmr.msra.gmra.mrb[92].mxu1 %v5248_v23 }
0x1af2   :  { %v6229_v55 = vpop.f32.mrb[92].mxu1 }
0x1af3   :  { %v5328_v36 = vadd.f32 %v6229_v55, %v5425_v10  ;;  %v5322_v27 = vpop.f32.mrb[93].mxu1 }
0x1af4   :  { %v5323_v61 = vadd.f32 %v5425_v10, %v5322_v27 }
0x1af5   :  { %v5332_v28 = vadd.f32 %v5328_v36, %v5164_v34 }
0x1af6   :  { %v5331_v9 = vadd.f32 %v5323_v61, %v5163_v29 }
0x1af7   :  { %5337 = vadd.xlane.f32.xlu1 %v5332_v28  ;;  %v5342_v25 = vmul.f32 %v5332_v28, %v5332_v28 }
0x1af8   :  { %5335 = vadd.xlane.f32.xlu0 %v5331_v9  ;;  %v5341_v31 = vmul.f32 %v5331_v9, %v5331_v9 }
0x1afb   :  { %5345 = vadd.xlane.f32.xlu1 %v5342_v25 }
0x1afc   :  { %5343 = vadd.xlane.f32.xlu0 %v5341_v31 }
0x1b84   :  { %v5338_v35 = vpop.xlane.xlu1 %5337 }
0x1b85   :  { %v5340_v26 = vmul.f32 0.03125, %v5338_v35  ;;  %v5336_v4 = vpop.xlane.xlu0 %5335 }
0x1b86   :  { %v5339_v50 = vmul.f32 0.03125, %v5336_v4 }
0x1b87   :  { %v5350_v60 = vmul.f32 %v5340_v26, %v5340_v26  ;;  %v5354_v22 = vsub.f32 %v5332_v28, %v5340_v26 }
0x1b88   :  { %v5346_v54 = vpop.xlane.xlu1 %5345  ;;  %v5349_v20 = vmul.f32 %v5339_v50, %v5339_v50  ;;  %v5353_v15 = vsub.f32 %v5331_v9, %v5339_v50 }
0x1b89   :  { %v5348_v12 = vmul.f32 0.03125, %v5346_v54  ;;  %v5344_v62 = vpop.xlane.xlu0 %5343 }
0x1b8a   :  { %v5347_v33 = vmul.f32 0.03125, %v5344_v62 }
0x1b8b   :  { %v5352_v14 = vsub.f32 %v5348_v12, %v5350_v60 }
0x1b8c   :  { %v5351_v13 = vsub.f32 %v5347_v33, %v5349_v20 }
0x1b8d   :  { %v5356_v49 = vadd.f32 1e-05, %v5352_v14 }
0x1b8e   :  { %v5355_v52 = vadd.f32 1e-05, %v5351_v13 }
0x1b8f   :  { %7096 = vrsqrt.f32 %v5356_v49 }
0x1b90   :  { %7098 = vrsqrt.f32 %v5355_v52 }
0x1b99   :  { %v7097_v53 = vpop.eup %7096 }
0x1b9a   :  { %v7099_v46 = vpop.eup %7098  ;;  %v5360_v1 = vmul.f32 %v7097_v53, %v5354_v22 }
0x1b9b   :  { %v5359_v59 = vmul.f32 %v7099_v46, %v5353_v15 }
0x1b9c   :  { %v5366_v6 = vmul.f32 %v5426_v57, %v5360_v1 }
0x1b9d   :  { %v5365_v40 = vmul.f32 %v5426_v57, %v5359_v59 }
0x1b9e   :  { %v5372_v7 = vadd.f32 %v5427_v42, %v5366_v6 }
0x1b9f   :  { %v5371_v58 = vadd.f32 %v5427_v42, %v5365_v40 }
0x1ba0   :  { %5374 = vst [vmem:[#allocation34 + $0x8] sm:$0xff] %v5372_v7 }
0x1ba1   :  { %5373 = vst [vmem:[#allocation34] sm:$0xff] %v5371_v58 }
0x1ba2   :  { %7555 = shalt.err (!%p7552_p10)
}
0x1ba3   :  { %s8609_s25 = sld [smem:[#allocation53_spill]] }
0x1ba9   :  { %s7556_s10 = scalar_lea.hbm %s8609_s25, 256 }
0x1baa   :  { %p7557_p11 = scmp.ne.s32.totalorder %s8609_s25, %s7556_s10  ;;  %p7560_p12 = scmp.lt.u32.totalorder %s7556_s10, %s8609_s25 }
0x1bac   :  { %p7562_p13 = pnand %p7560_p12, %p7557_p11 }
0x1bae   :  { %7565 = shalt.err (!%p7562_p13)
}
0x1baf   :  { %5386 = dma.vmem_to_hbm [thread:$0]  %s5381_s6, 256, %s8609_s25, [#allocation4], %s7592_s0, %s7592_s0, %s7593_s21  }
0x1bb0   :  { %7588 = dma.done.wait [#allocation4], 256  }
0x1bb1   :  { %7589 = vsyncadd [#allocation4], 4294967040 }
0x1bb2   :  { %5390 = vsyncpa [#allocation3], 1 }
0x1bb3   :  { %5391 = vsyncpa [#allocation6], 1 }
0x1bb4   :  { %5392 = vsyncpa [#allocation9], 1 }
0x1bb5   :  { %5393 = vsyncpa [#allocation12], 1 }
0x1bb6   :  { %5394 = vsyncpa [#allocation15], 1 }
0x1bb7   :  { %5395 = vsyncpa [#allocation18], 1 }
0x1bb8   :  { %5396 = vsyncpa [#allocation21], 1 }
0x1bb9   :  { %5397 = vsyncpa [#allocation24], 1 }
0x1bba   :  { %5398 = vsyncpa [#allocation27], 1 }
0x1bbb   :  { %5399 = vsyncpa [#allocation30], 1 }
0x1bbc   :  { %5400 = vsyncpa [#allocation33], 1 }
0x1bbd   :  { %5401 = vsyncpa [#allocation4], 1 }

</bundles_post_ra>
